<compile_context>
chip_gen: v7x
topology: tpu7x:2x2x1
jax: 0.10.0
libtpu: 0.0.40
codegen_flags: <defaults>
</compile_context>

<pallas_src>
import functools
import numpy as np
import jax
import jax.numpy as jnp
from jax.experimental import pallas as pl
from jax.experimental.pallas import tpu as pltpu


def _leaky_relu(x, slope=0.2):
    return jnp.where(x > 0, x, slope * x)


def _batchnorm_train(x, gamma, beta, eps):
    # Two-pass reference form (used only by the pure-JAX reference).
    mean = jnp.mean(x, axis=0, keepdims=True)
    var = jnp.mean((x - mean) ** 2, axis=0, keepdims=True)  # biased variance
    return (x - mean) * jax.lax.rsqrt(var + eps) * gamma + beta


def generator_kernel(
    x_ref,
    w1_ref, b1_ref,
    w2_ref, b2_ref, g2_ref, be2_ref,
    w3_ref, b3_ref, g3_ref, be3_ref,
    w4_ref, b4_ref, g4_ref, be4_ref,
    w5_ref, b5_ref,
    out_ref,
    *, eps,
):
    def linear(h, w_ref, b_ref):
        # bf16 x bf16 MXU matmul with f32 accumulate; bias add in f32.
        return jnp.dot(h.astype(jnp.bfloat16), w_ref[...],
                       preferred_element_type=jnp.float32) + b_ref[...]

    def bn_scale_shift(h, g_ref, be_ref):
        # Single-pass stats: mean and E[x^2]; biased var = E[x^2] - mean^2.
        inv_n = 1.0 / h.shape[0]
        mean = jnp.sum(h, axis=0, keepdims=True) * inv_n
        ex2 = jnp.sum(h * h, axis=0, keepdims=True) * inv_n
        var = ex2 - mean * mean
        s = g_ref[...] * jax.lax.rsqrt(var + eps)   # rsqrt -> EUP slot
        t = be_ref[...] - mean * s
        return h * s + t                             # one FMA-shaped pass

    x = x_ref[...].astype(jnp.float32)

    # block(latent_dim, 128, norm=False): Linear + LeakyReLU(0.2)
    h = _leaky_relu(linear(x, w1_ref, b1_ref))

    # block(128, 256): Linear + BatchNorm1d(eps=0.8) + LeakyReLU(0.2)
    h = _leaky_relu(bn_scale_shift(linear(h, w2_ref, b2_ref), g2_ref, be2_ref))

    # block(256, 512)
    h = _leaky_relu(bn_scale_shift(linear(h, w3_ref, b3_ref), g3_ref, be3_ref))

    # block(512, 1024)
    h = _leaky_relu(bn_scale_shift(linear(h, w4_ref, b4_ref), g4_ref, be4_ref))

    # final Linear(1024, padded_out_dim) + Tanh; padded columns carry zeros.
    h = linear(h, w5_ref, b5_ref)
    out_ref[...] = jnp.tanh(h).astype(out_ref.dtype)


def generator_forward(x, params, img_shape, eps=0.8):
    """x: (B, latent_dim) float32 -> (B, *img_shape) float32."""
    B = x.shape[0]
    out_dim = int(np.prod(img_shape))
    out_dim_padded = params["w5"].shape[1]   # lane-padded to a multiple of 128
    latent_padded = params["w1"].shape[0]    # latent dim padded to 128 lanes
    if x.shape[1] < latent_padded:
        # Zero-pad the latent lanes so the kernel sees a lane-dense (B, 128) input;
        # padded rows of w1 are zero so the matmul result is unchanged.
        x = jnp.pad(x, ((0, 0), (0, latent_padded - x.shape[1])))
    flat_args = (
        x,
        params["w1"], params["b1"],
        params["w2"], params["b2"], params["g2"], params["be2"],
        params["w3"], params["b3"], params["g3"], params["be3"],
        params["w4"], params["b4"], params["g4"], params["be4"],
        params["w5"], params["b5"],
    )
    # Small model: ~1.7 MB of bf16 weights + tiny activations fit in VMEM; no grid,
    # whole arrays as single blocks (keeps BN statistics full-batch).
    out_flat = pl.pallas_call(
        functools.partial(generator_kernel, eps=eps),
        out_shape=jax.ShapeDtypeStruct((B, out_dim_padded), jnp.float32),
        in_specs=[pl.BlockSpec(memory_space=pltpu.MemorySpace.VMEM)] * len(flat_args),
        out_specs=pl.BlockSpec(memory_space=pltpu.MemorySpace.VMEM),
        compiler_params=pltpu.CompilerParams(vmem_limit_bytes=32 << 20),
    )(*flat_args)
    # Lane-dense kernel output; slice away the zero-padded tail and reshape.
    return out_flat[:, :out_dim].reshape((B,) + tuple(img_shape))


def init_params(key, latent_dim, img_shape):
    """Deterministic synthetic parameters (same logical shapes as the PyTorch module).

    Linear weights are stored (in_features, out_features) in bfloat16; biases and
    BatchNorm affine params stay float32.  w1 is zero-padded on the input-feature axis
    up to 128 (lane-dense latent), and the final layer is zero-padded on the
    output-feature axis up to a multiple of 128 lanes.
    """
    out_dim = int(np.prod(img_shape))
    out_dim_padded = int(pl.cdiv(out_dim, 128)) * 128
    latent_padded = int(pl.cdiv(latent_dim, 128)) * 128
    dims = [latent_dim, 128, 256, 512, 1024, out_dim]
    keys = jax.random.split(key, 10)
    p = {}

    def lin(kw, kb, fan_in, fan_out, pad_out_to=None, pad_in_to=None):
        bound = 1.0 / np.sqrt(fan_in)
        w = jax.random.uniform(kw, (fan_in, fan_out), jnp.float32, -bound, bound)
        b = jax.random.uniform(kb, (1, fan_out), jnp.float32, -bound, bound)
        if pad_out_to is not None and pad_out_to > fan_out:
            w = jnp.pad(w, ((0, 0), (0, pad_out_to - fan_out)))
            b = jnp.pad(b, ((0, 0), (0, pad_out_to - fan_out)))
        if pad_in_to is not None and pad_in_to > fan_in:
            w = jnp.pad(w, ((0, pad_in_to - fan_in), (0, 0)))
        return w.astype(jnp.bfloat16), b.astype(jnp.float32)

    p["w1"], p["b1"] = lin(keys[0], keys[1], dims[0], dims[1], pad_in_to=latent_padded)
    p["w2"], p["b2"] = lin(keys[2], keys[3], dims[1], dims[2])
    p["w3"], p["b3"] = lin(keys[4], keys[5], dims[2], dims[3])
    p["w4"], p["b4"] = lin(keys[6], keys[7], dims[3], dims[4])
    p["w5"], p["b5"] = lin(keys[8], keys[9], dims[4], dims[5], pad_out_to=out_dim_padded)
    # BatchNorm affine params at PyTorch defaults: gamma=1, beta=0.
    for name, f in (("2", dims[2]), ("3", dims[3]), ("4", dims[4])):
        p["g" + name] = jnp.ones((1, f), jnp.float32)
        p["be" + name] = jnp.zeros((1, f), jnp.float32)
    return p


def reference_forward(x, params, img_shape, eps=0.8):
    """Pure-JAX reference using the same bf16-rounded weights/activations."""
    def linear(h, w, b):
        return jnp.dot(h.astype(jnp.bfloat16).astype(jnp.float32),
                       w.astype(jnp.float32)) + b

    latent_dim = x.shape[1]
    w1 = params["w1"][:latent_dim, :]   # un-pad the latent axis (zero rows anyway)
    h = _leaky_relu(linear(x, w1, params["b1"]))
    h = _leaky_relu(_batchnorm_train(linear(h, params["w2"], params["b2"]),
                                     params["g2"], params["be2"], eps))
    h = _leaky_relu(_batchnorm_train(linear(h, params["w3"], params["b3"]),
                                     params["g3"], params["be3"], eps))
    h = _leaky_relu(_batchnorm_train(linear(h, params["w4"], params["b4"]),
                                     params["g4"], params["be4"], eps))
    h = jnp.tanh(linear(h, params["w5"], params["b5"]))
    out_dim = int(np.prod(img_shape))
    return h[:, :out_dim].reshape((x.shape[0],) + tuple(img_shape))


if __name__ == "__main__":
    latent_dim = 16
    img_shape = (1, 8, 8)          # small synthetic image shape; prod = 64
    batch = 8                      # functional test only; batch >=128 for throughput

    key = jax.random.PRNGKey(0)
    k_param, k_x = jax.random.split(key)
    params = init_params(k_param, latent_dim, img_shape)
    x = jax.random.normal(k_x, (batch, latent_dim), jnp.float32)

    out = generator_forward(x, params, img_shape)
    out = jax.block_until_ready(out)

    ref = reference_forward(x, params, img_shape)
    assert out.shape == (batch,) + img_shape, out.shape
    np.testing.assert_allclose(np.asarray(out), np.asarray(ref), rtol=2e-3, atol=2e-3)

    print("KERNEL_OK")
</pallas_src>

<mosaic_0001>
module attributes {stable_mosaic.version = 11 : i64} {
  func.func @generator_kernel(%arg0: memref<8x128xf32, #tpu.memory_space<vmem>>, %arg1: memref<128x128xbf16, #tpu.memory_space<vmem>>, %arg2: memref<1x128xf32, #tpu.memory_space<vmem>>, %arg3: memref<128x256xbf16, #tpu.memory_space<vmem>>, %arg4: memref<1x256xf32, #tpu.memory_space<vmem>>, %arg5: memref<1x256xf32, #tpu.memory_space<vmem>>, %arg6: memref<1x256xf32, #tpu.memory_space<vmem>>, %arg7: memref<256x512xbf16, #tpu.memory_space<vmem>>, %arg8: memref<1x512xf32, #tpu.memory_space<vmem>>, %arg9: memref<1x512xf32, #tpu.memory_space<vmem>>, %arg10: memref<1x512xf32, #tpu.memory_space<vmem>>, %arg11: memref<512x1024xbf16, #tpu.memory_space<vmem>>, %arg12: memref<1x1024xf32, #tpu.memory_space<vmem>>, %arg13: memref<1x1024xf32, #tpu.memory_space<vmem>>, %arg14: memref<1x1024xf32, #tpu.memory_space<vmem>>, %arg15: memref<1024x128xbf16, #tpu.memory_space<vmem>>, %arg16: memref<1x128xf32, #tpu.memory_space<vmem>>, %arg17: memref<8x128xf32, #tpu.memory_space<vmem>>) attributes {dimension_semantics = [], scalar_prefetch = 0 : i64, scratch_operands = 0 : i64, tpu.core_type = #tpu.core_type<tc>} {
    %c0 = arith.constant 0 : index
    %c0_0 = arith.constant 0 : index
    %0 = vector.load %arg0[%c0, %c0_0] : memref<8x128xf32, #tpu.memory_space<vmem>>, vector<8x128xf32>
    %1 = arith.truncf %0 : vector<8x128xf32> to vector<8x128xbf16>
    %c0_1 = arith.constant 0 : index
    %c0_2 = arith.constant 0 : index
    %2 = vector.load %arg1[%c0_1, %c0_2] : memref<128x128xbf16, #tpu.memory_space<vmem>>, vector<128x128xbf16>
    %cst = arith.constant dense<0.000000e+00> : vector<8x128xf32>
    %3 = tpu.matmul %1, %2, %cst {dimension_numbers = #tpu.dot_dimension_numbers<[1], [0], [0], [1], [0, 0, 1, 1], [], []>} : vector<8x128xbf16>, vector<128x128xbf16>, vector<8x128xf32> -> vector<8x128xf32>
    %c0_3 = arith.constant 0 : index
    %c0_4 = arith.constant 0 : index
    %4 = vector.load %arg2[%c0_3, %c0_4] : memref<1x128xf32, #tpu.memory_space<vmem>>, vector<1x128xf32>
    %5 = vector.broadcast %4 : vector<1x128xf32> to vector<8x128xf32>
    %6 = arith.addf %3, %5 : vector<8x128xf32>
    %cst_5 = arith.constant 0.000000e+00 : f32
    %7 = vector.broadcast %cst_5 : f32 to vector<8x128xf32>
    %8 = arith.cmpf ogt, %6, %7 : vector<8x128xf32>
    %cst_6 = arith.constant 2.000000e-01 : f32
    %9 = vector.broadcast %cst_6 : f32 to vector<8x128xf32>
    %10 = arith.mulf %9, %6 : vector<8x128xf32>
    %11 = arith.select %8, %6, %10 : vector<8x128xi1>, vector<8x128xf32>
    %12 = arith.truncf %11 : vector<8x128xf32> to vector<8x128xbf16>
    %c0_7 = arith.constant 0 : index
    %c0_8 = arith.constant 0 : index
    %13 = vector.load %arg3[%c0_7, %c0_8] : memref<128x256xbf16, #tpu.memory_space<vmem>>, vector<128x256xbf16>
    %cst_9 = arith.constant dense<0.000000e+00> : vector<8x256xf32>
    %14 = tpu.matmul %12, %13, %cst_9 {dimension_numbers = #tpu.dot_dimension_numbers<[1], [0], [0], [1], [0, 0, 1, 1], [], []>} : vector<8x128xbf16>, vector<128x256xbf16>, vector<8x256xf32> -> vector<8x256xf32>
    %c0_10 = arith.constant 0 : index
    %c0_11 = arith.constant 0 : index
    %15 = vector.load %arg4[%c0_10, %c0_11] : memref<1x256xf32, #tpu.memory_space<vmem>>, vector<1x256xf32>
    %16 = vector.broadcast %15 : vector<1x256xf32> to vector<8x256xf32>
    %17 = arith.addf %14, %16 : vector<8x256xf32>
    %cst_12 = arith.constant dense<0.000000e+00> : vector<256xf32>
    %18 = vector.multi_reduction <add>, %17, %cst_12 [0] : vector<8x256xf32> to vector<256xf32>
    %19 = vector.shape_cast %18 : vector<256xf32> to vector<1x256xf32>
    %cst_13 = arith.constant 1.250000e-01 : f32
    %20 = vector.broadcast %cst_13 : f32 to vector<1x256xf32>
    %21 = arith.mulf %19, %20 : vector<1x256xf32>
    %22 = arith.mulf %17, %17 : vector<8x256xf32>
    %cst_14 = arith.constant dense<0.000000e+00> : vector<256xf32>
    %23 = vector.multi_reduction <add>, %22, %cst_14 [0] : vector<8x256xf32> to vector<256xf32>
    %24 = vector.shape_cast %23 : vector<256xf32> to vector<1x256xf32>
    %cst_15 = arith.constant 1.250000e-01 : f32
    %25 = vector.broadcast %cst_15 : f32 to vector<1x256xf32>
    %26 = arith.mulf %24, %25 : vector<1x256xf32>
    %27 = arith.mulf %21, %21 : vector<1x256xf32>
    %28 = arith.subf %26, %27 : vector<1x256xf32>
    %c0_16 = arith.constant 0 : index
    %c0_17 = arith.constant 0 : index
    %29 = vector.load %arg5[%c0_16, %c0_17] : memref<1x256xf32, #tpu.memory_space<vmem>>, vector<1x256xf32>
    %cst_18 = arith.constant 8.000000e-01 : f32
    %30 = vector.broadcast %cst_18 : f32 to vector<1x256xf32>
    %31 = arith.addf %28, %30 : vector<1x256xf32>
    %32 = math.rsqrt %31 : vector<1x256xf32>
    %33 = arith.mulf %29, %32 : vector<1x256xf32>
    %c0_19 = arith.constant 0 : index
    %c0_20 = arith.constant 0 : index
    %34 = vector.load %arg6[%c0_19, %c0_20] : memref<1x256xf32, #tpu.memory_space<vmem>>, vector<1x256xf32>
    %35 = arith.mulf %21, %33 : vector<1x256xf32>
    %36 = arith.subf %34, %35 : vector<1x256xf32>
    %37 = vector.broadcast %33 : vector<1x256xf32> to vector<8x256xf32>
    %38 = arith.mulf %17, %37 : vector<8x256xf32>
    %39 = vector.broadcast %36 : vector<1x256xf32> to vector<8x256xf32>
    %40 = arith.addf %38, %39 : vector<8x256xf32>
    %cst_21 = arith.constant 0.000000e+00 : f32
    %41 = vector.broadcast %cst_21 : f32 to vector<8x256xf32>
    %42 = arith.cmpf ogt, %40, %41 : vector<8x256xf32>
    %cst_22 = arith.constant 2.000000e-01 : f32
    %43 = vector.broadcast %cst_22 : f32 to vector<8x256xf32>
    %44 = arith.mulf %43, %40 : vector<8x256xf32>
    %45 = arith.select %42, %40, %44 : vector<8x256xi1>, vector<8x256xf32>
    %46 = arith.truncf %45 : vector<8x256xf32> to vector<8x256xbf16>
    %c0_23 = arith.constant 0 : index
    %c0_24 = arith.constant 0 : index
    %47 = vector.load %arg7[%c0_23, %c0_24] : memref<256x512xbf16, #tpu.memory_space<vmem>>, vector<256x512xbf16>
    %cst_25 = arith.constant dense<0.000000e+00> : vector<8x512xf32>
    %48 = tpu.matmul %46, %47, %cst_25 {dimension_numbers = #tpu.dot_dimension_numbers<[1], [0], [0], [1], [0, 0, 1, 1], [], []>} : vector<8x256xbf16>, vector<256x512xbf16>, vector<8x512xf32> -> vector<8x512xf32>
    %c0_26 = arith.constant 0 : index
    %c0_27 = arith.constant 0 : index
    %49 = vector.load %arg8[%c0_26, %c0_27] : memref<1x512xf32, #tpu.memory_space<vmem>>, vector<1x512xf32>
    %50 = vector.broadcast %49 : vector<1x512xf32> to vector<8x512xf32>
    %51 = arith.addf %48, %50 : vector<8x512xf32>
    %cst_28 = arith.constant dense<0.000000e+00> : vector<512xf32>
    %52 = vector.multi_reduction <add>, %51, %cst_28 [0] : vector<8x512xf32> to vector<512xf32>
    %53 = vector.shape_cast %52 : vector<512xf32> to vector<1x512xf32>
    %cst_29 = arith.constant 1.250000e-01 : f32
    %54 = vector.broadcast %cst_29 : f32 to vector<1x512xf32>
    %55 = arith.mulf %53, %54 : vector<1x512xf32>
    %56 = arith.mulf %51, %51 : vector<8x512xf32>
    %cst_30 = arith.constant dense<0.000000e+00> : vector<512xf32>
    %57 = vector.multi_reduction <add>, %56, %cst_30 [0] : vector<8x512xf32> to vector<512xf32>
    %58 = vector.shape_cast %57 : vector<512xf32> to vector<1x512xf32>
    %cst_31 = arith.constant 1.250000e-01 : f32
    %59 = vector.broadcast %cst_31 : f32 to vector<1x512xf32>
    %60 = arith.mulf %58, %59 : vector<1x512xf32>
    %61 = arith.mulf %55, %55 : vector<1x512xf32>
    %62 = arith.subf %60, %61 : vector<1x512xf32>
    %c0_32 = arith.constant 0 : index
    %c0_33 = arith.constant 0 : index
    %63 = vector.load %arg9[%c0_32, %c0_33] : memref<1x512xf32, #tpu.memory_space<vmem>>, vector<1x512xf32>
    %cst_34 = arith.constant 8.000000e-01 : f32
    %64 = vector.broadcast %cst_34 : f32 to vector<1x512xf32>
    %65 = arith.addf %62, %64 : vector<1x512xf32>
    %66 = math.rsqrt %65 : vector<1x512xf32>
    %67 = arith.mulf %63, %66 : vector<1x512xf32>
    %c0_35 = arith.constant 0 : index
    %c0_36 = arith.constant 0 : index
    %68 = vector.load %arg10[%c0_35, %c0_36] : memref<1x512xf32, #tpu.memory_space<vmem>>, vector<1x512xf32>
    %69 = arith.mulf %55, %67 : vector<1x512xf32>
    %70 = arith.subf %68, %69 : vector<1x512xf32>
    %71 = vector.broadcast %67 : vector<1x512xf32> to vector<8x512xf32>
    %72 = arith.mulf %51, %71 : vector<8x512xf32>
    %73 = vector.broadcast %70 : vector<1x512xf32> to vector<8x512xf32>
    %74 = arith.addf %72, %73 : vector<8x512xf32>
    %cst_37 = arith.constant 0.000000e+00 : f32
    %75 = vector.broadcast %cst_37 : f32 to vector<8x512xf32>
    %76 = arith.cmpf ogt, %74, %75 : vector<8x512xf32>
    %cst_38 = arith.constant 2.000000e-01 : f32
    %77 = vector.broadcast %cst_38 : f32 to vector<8x512xf32>
    %78 = arith.mulf %77, %74 : vector<8x512xf32>
    %79 = arith.select %76, %74, %78 : vector<8x512xi1>, vector<8x512xf32>
    %80 = arith.truncf %79 : vector<8x512xf32> to vector<8x512xbf16>
    %c0_39 = arith.constant 0 : index
    %c0_40 = arith.constant 0 : index
    %81 = vector.load %arg11[%c0_39, %c0_40] : memref<512x1024xbf16, #tpu.memory_space<vmem>>, vector<512x1024xbf16>
    %cst_41 = arith.constant dense<0.000000e+00> : vector<8x1024xf32>
    %82 = tpu.matmul %80, %81, %cst_41 {dimension_numbers = #tpu.dot_dimension_numbers<[1], [0], [0], [1], [0, 0, 1, 1], [], []>} : vector<8x512xbf16>, vector<512x1024xbf16>, vector<8x1024xf32> -> vector<8x1024xf32>
    %c0_42 = arith.constant 0 : index
    %c0_43 = arith.constant 0 : index
    %83 = vector.load %arg12[%c0_42, %c0_43] : memref<1x1024xf32, #tpu.memory_space<vmem>>, vector<1x1024xf32>
    %84 = vector.broadcast %83 : vector<1x1024xf32> to vector<8x1024xf32>
    %85 = arith.addf %82, %84 : vector<8x1024xf32>
    %cst_44 = arith.constant dense<0.000000e+00> : vector<1024xf32>
    %86 = vector.multi_reduction <add>, %85, %cst_44 [0] : vector<8x1024xf32> to vector<1024xf32>
    %87 = vector.shape_cast %86 : vector<1024xf32> to vector<1x1024xf32>
    %cst_45 = arith.constant 1.250000e-01 : f32
    %88 = vector.broadcast %cst_45 : f32 to vector<1x1024xf32>
    %89 = arith.mulf %87, %88 : vector<1x1024xf32>
    %90 = arith.mulf %85, %85 : vector<8x1024xf32>
    %cst_46 = arith.constant dense<0.000000e+00> : vector<1024xf32>
    %91 = vector.multi_reduction <add>, %90, %cst_46 [0] : vector<8x1024xf32> to vector<1024xf32>
    %92 = vector.shape_cast %91 : vector<1024xf32> to vector<1x1024xf32>
    %cst_47 = arith.constant 1.250000e-01 : f32
    %93 = vector.broadcast %cst_47 : f32 to vector<1x1024xf32>
    %94 = arith.mulf %92, %93 : vector<1x1024xf32>
    %95 = arith.mulf %89, %89 : vector<1x1024xf32>
    %96 = arith.subf %94, %95 : vector<1x1024xf32>
    %c0_48 = arith.constant 0 : index
    %c0_49 = arith.constant 0 : index
    %97 = vector.load %arg13[%c0_48, %c0_49] : memref<1x1024xf32, #tpu.memory_space<vmem>>, vector<1x1024xf32>
    %cst_50 = arith.constant 8.000000e-01 : f32
    %98 = vector.broadcast %cst_50 : f32 to vector<1x1024xf32>
    %99 = arith.addf %96, %98 : vector<1x1024xf32>
    %100 = math.rsqrt %99 : vector<1x1024xf32>
    %101 = arith.mulf %97, %100 : vector<1x1024xf32>
    %c0_51 = arith.constant 0 : index
    %c0_52 = arith.constant 0 : index
    %102 = vector.load %arg14[%c0_51, %c0_52] : memref<1x1024xf32, #tpu.memory_space<vmem>>, vector<1x1024xf32>
    %103 = arith.mulf %89, %101 : vector<1x1024xf32>
    %104 = arith.subf %102, %103 : vector<1x1024xf32>
    %105 = vector.broadcast %101 : vector<1x1024xf32> to vector<8x1024xf32>
    %106 = arith.mulf %85, %105 : vector<8x1024xf32>
    %107 = vector.broadcast %104 : vector<1x1024xf32> to vector<8x1024xf32>
    %108 = arith.addf %106, %107 : vector<8x1024xf32>
    %cst_53 = arith.constant 0.000000e+00 : f32
    %109 = vector.broadcast %cst_53 : f32 to vector<8x1024xf32>
    %110 = arith.cmpf ogt, %108, %109 : vector<8x1024xf32>
    %cst_54 = arith.constant 2.000000e-01 : f32
    %111 = vector.broadcast %cst_54 : f32 to vector<8x1024xf32>
    %112 = arith.mulf %111, %108 : vector<8x1024xf32>
    %113 = arith.select %110, %108, %112 : vector<8x1024xi1>, vector<8x1024xf32>
    %114 = arith.truncf %113 : vector<8x1024xf32> to vector<8x1024xbf16>
    %c0_55 = arith.constant 0 : index
    %c0_56 = arith.constant 0 : index
    %115 = vector.load %arg15[%c0_55, %c0_56] : memref<1024x128xbf16, #tpu.memory_space<vmem>>, vector<1024x128xbf16>
    %cst_57 = arith.constant dense<0.000000e+00> : vector<8x128xf32>
    %116 = tpu.matmul %114, %115, %cst_57 {dimension_numbers = #tpu.dot_dimension_numbers<[1], [0], [0], [1], [0, 0, 1, 1], [], []>} : vector<8x1024xbf16>, vector<1024x128xbf16>, vector<8x128xf32> -> vector<8x128xf32>
    %c0_58 = arith.constant 0 : index
    %c0_59 = arith.constant 0 : index
    %117 = vector.load %arg16[%c0_58, %c0_59] : memref<1x128xf32, #tpu.memory_space<vmem>>, vector<1x128xf32>
    %118 = vector.broadcast %117 : vector<1x128xf32> to vector<8x128xf32>
    %119 = arith.addf %116, %118 : vector<8x128xf32>
    %120 = math.tanh %119 : vector<8x128xf32>
    %c0_60 = arith.constant 0 : index
    %c0_61 = arith.constant 0 : index
    %121 = vector.load %arg17[%c0_60, %c0_61] : memref<8x128xf32, #tpu.memory_space<vmem>>, vector<8x128xf32>
    tpu.vector_store %arg17[%c0_60, %c0_61], %120 {strides = array<i32>} : memref<8x128xf32, #tpu.memory_space<vmem>>, vector<8x128xf32>,
    return
  }
}

</mosaic_0001>

<bundles_post_ra>
// kernel: tpu_custom_call.1
= control target key start
LH: loop header
LB: loop body
LE: loop exit
PB: predicated region body
PF: predicated region fallthrough
CT: control target
= control target key end

     0   :  { %s5844_s0 = inlined_call_operand.hbm [shape: f32[8,128], index: 0, kind: input, shape index: {}]   ;;  %s5845_s1 = inlined_call_operand.hbm [shape: bf16[128,128], index: 1, kind: input, shape index: {}]   ;;  %s5846_s2 = inlined_call_operand.vmem [shape: f32[1,128], index: 2, kind: input, shape index: {}]   ;;  %s5847_s3 = inlined_call_operand.hbm [shape: bf16[128,256], index: 3, kind: input, shape index: {}]   ;;  %s5848_s4 = inlined_call_operand.hbm [shape: f32[1,256], index: 4, kind: input, shape index: {}]   ;;  %s5849_s5 = inlined_call_operand.hbm [shape: f32[1,256], index: 5, kind: input, shape index: {}]   ;;  %s5850_s6 = inlined_call_operand.hbm [shape: f32[1,256], index: 6, kind: input, shape index: {}]   ;;  %s5851_s7 = inlined_call_operand.hbm [shape: bf16[256,512], index: 7, kind: input, shape index: {}]   ;;  %s5852_s8 = inlined_call_operand.vmem [shape: f32[1,512], index: 8, kind: input, shape index: {}]   ;;  %s5853_s9 = inlined_call_operand.vmem [shape: f32[1,512], index: 9, kind: input, shape index: {}]   ;;  %s5854_s10 = inlined_call_operand.vmem [shape: f32[1,512], index: 10, kind: input, shape index: {}]   ;;  %s5855_s11 = inlined_call_operand.hbm [shape: bf16[512,1024], index: 11, kind: input, shape index: {}]   ;;  %s5856_s12 = inlined_call_operand.vmem [shape: f32[1,1024], index: 12, kind: input, shape index: {}]   ;;  %s5857_s13 = inlined_call_operand.vmem [shape: f32[1,1024], index: 13, kind: input, shape index: {}]   ;;  %s5858_s14 = inlined_call_operand.vmem [shape: f32[1,1024], index: 14, kind: input, shape index: {}]   ;;  %s5859_s15 = inlined_call_operand.hbm [shape: bf16[1024,128], index: 15, kind: input, shape index: {}]   ;;  %s5860_s16 = inlined_call_operand.vmem [shape: f32[1,128], index: 16, kind: input, shape index: {}]   ;;  %s5861_s17 = inlined_call_operand.hbm [shape: f32[8,128], index: 17, kind: output, shape index: {}]  }
   0x1   :  { %5865 = sst [smem:[#allocation24_spill]] %s5844_s0 }
   0x2   :  { %5866 = sst [smem:[#allocation25_spill]] %s5845_s1 }
   0x3   :  { %5867 = sst [smem:[#allocation26_spill]] %s5860_s16 }
   0x4   :  { %5868 = sst [smem:[#allocation27_spill]] %s5861_s17 }
   0x5   :  { %22 = vsyncpa [#allocation3], 0 }
   0x6   :  { %23 = vsyncpa [#allocation6], 0 }
   0x7   :  { %24 = vsyncpa [#allocation9], 0 }
   0x8   :  { %25 = vsyncpa [#allocation12], 0 }
   0x9   :  { %26 = vsyncpa [#allocation15], 0 }
   0xa   :  { %27 = vsyncpa [#allocation4], 0  ;;  %s5291_s24 = smov [#allocation5]   ;;  %s5869_s28 = sld [smem:[#allocation25_spill]] }
   0xb   :  { %s43_s25 = sshll.u32 %s5291_s24, 4  ;;  %s44_s25 = int_to_ptr.vmem [resolvable:$true] %s43_s25 }
  0x10   :  { %s5059_s29 = scalar_lea.hbm %s5869_s28, 1024 }
  0x11   :  { %p5060_p0 = scmp.ne.s32.totalorder %s5869_s28, %s5059_s29  ;;  %p5063_p1 = scmp.lt.u32.totalorder %s5059_s29, %s5869_s28 }
  0x13   :  { %p5065_p2 = pnand %p5063_p1, %p5060_p0 }
  0x15   :  { %5068 = shalt.err (!%p5065_p2)
}
  0x16   :  { %s5069_s1 = scalar_lea.vmem %s44_s25, 1024  ;;  %p5074_p4 = scmp.lt.s32.totalorder %s44_s25, %s44_s25 }
  0x17   :  { %p5070_p3 = scmp.ne.s32.totalorder %s44_s25, %s5069_s1  ;;  %p5075_p5 = scmp.lt.s32.totalorder %s5069_s1, %s5069_s1 }
  0x19   :  { %p5076_p6 = por %p5075_p5, %p5074_p4 }
  0x1b   :  { %p5077_p7 = pnand %p5076_p6, %p5070_p3 }
  0x1d   :  { %5080 = shalt.err (!%p5077_p7)
}
  0x1e   :  { %s5292_s20 = smov 64   ;;  %s5293_s21 = smov 4  }
  0x1f   :  { %49 = dma.hbm_to_vmem [thread:$0]  %s5869_s28, 1024, %s44_s25, [#allocation6], %s5292_s20, %s5292_s20, %s5293_s21  }
  0x20   :  { %s5294_s24 = smov [#allocation8]   ;;  %s5295_s27 = smov [#allocation11]  }
  0x21   :  { %s70_s26 = sshll.u32 %s5294_s24, 4  ;;  %s90_s29 = sshll.u32 %s5295_s27, 4  ;;  %s71_s26 = int_to_ptr.vmem [resolvable:$true] %s70_s26  ;;  %s91_s29 = int_to_ptr.vmem [resolvable:$true] %s90_s29 }
  0x22   :  { %s5081_s18 = scalar_lea.hbm %s5848_s4, 32 }
  0x23   :  { %p5082_p8 = scmp.ne.s32.totalorder %s5848_s4, %s5081_s18  ;;  %p5085_p9 = scmp.lt.u32.totalorder %s5081_s18, %s5848_s4 }
  0x25   :  { %p5087_p10 = pnand %p5085_p9, %p5082_p8 }
  0x27   :  { %5090 = shalt.err (!%p5087_p10)
}
  0x28   :  { %s5091_s25 = scalar_lea.vmem %s71_s26, 32  ;;  %p5096_p12 = scmp.lt.s32.totalorder %s71_s26, %s71_s26 }
  0x29   :  { %p5092_p11 = scmp.ne.s32.totalorder %s71_s26, %s5091_s25  ;;  %p5097_p13 = scmp.lt.s32.totalorder %s5091_s25, %s5091_s25 }
  0x2b   :  { %p5098_p0 = por %p5097_p13, %p5096_p12 }
  0x2d   :  { %p5099_p1 = pnand %p5098_p0, %p5092_p11 }
  0x2f   :  { %5102 = shalt.err (!%p5099_p1)
}
  0x30   :  { %73 = dma.hbm_to_vmem [thread:$0]  %s5848_s4, 32, %s71_s26, [#allocation9]  }
  0x31   :  { %s5103_s27 = scalar_lea.hbm %s5850_s6, 32 }
  0x32   :  { %p5104_p2 = scmp.ne.s32.totalorder %s5850_s6, %s5103_s27  ;;  %p5107_p3 = scmp.lt.u32.totalorder %s5103_s27, %s5850_s6 }
  0x34   :  { %p5109_p4 = pnand %p5107_p3, %p5104_p2 }
  0x36   :  { %5112 = shalt.err (!%p5109_p4)
}
  0x37   :  { %s5113_s18 = scalar_lea.vmem %s91_s29, 32  ;;  %p5118_p6 = scmp.lt.s32.totalorder %s91_s29, %s91_s29 }
  0x38   :  { %p5114_p5 = scmp.ne.s32.totalorder %s91_s29, %s5113_s18  ;;  %p5119_p7 = scmp.lt.s32.totalorder %s5113_s18, %s5113_s18 }
  0x3a   :  { %p5120_p8 = por %p5119_p7, %p5118_p6 }
  0x3c   :  { %p5121_p9 = pnand %p5120_p8, %p5114_p5 }
  0x3e   :  { %5124 = shalt.err (!%p5121_p9)
}
  0x3f   :  { %93 = dma.hbm_to_vmem [thread:$0]  %s5850_s6, 32, %s91_s29, [#allocation12]  }
  0x40   :  { %s5296_s19 = smov [#allocation14]   ;;  %s5125_s22 = scalar_lea.hbm %s5855_s11, 32768 }
  0x41   :  { %s117_s1 = sshll.u32 %s5296_s19, 4  ;;  %p5126_p10 = scmp.ne.s32.totalorder %s5855_s11, %s5125_s22  ;;  %s118_s1 = int_to_ptr.vmem [resolvable:$true] %s117_s1 }
  0x42   :  { %p5129_p11 = scmp.lt.u32.totalorder %s5125_s22, %s5855_s11 }
  0x44   :  { %p5131_p12 = pnand %p5129_p11, %p5126_p10 }
  0x46   :  { %5134 = shalt.err (!%p5131_p12)
}
  0x47   :  { %s5135_s17 = scalar_lea.vmem %s118_s1, 32768  ;;  %p5140_p0 = scmp.lt.s32.totalorder %s118_s1, %s118_s1 }
  0x48   :  { %p5136_p13 = scmp.ne.s32.totalorder %s118_s1, %s5135_s17  ;;  %p5141_p1 = scmp.lt.s32.totalorder %s5135_s17, %s5135_s17 }
  0x4a   :  { %p5142_p2 = por %p5141_p1, %p5140_p0 }
  0x4c   :  { %p5143_p3 = pnand %p5142_p2, %p5136_p13 }
  0x4e   :  { %5146 = shalt.err (!%p5143_p3)
}
  0x4f   :  { %s5297_s6 = smov 512   ;;  %s5298_s29 = smov 32  }
  0x50   :  { %123 = dma.hbm_to_vmem [thread:$0]  %s5855_s11, 32768, %s118_s1, [#allocation15], %s5297_s6, %s5297_s6, %s5298_s29  }
  0x51   :  { %s5299_s18 = smov [#allocation2]   ;;  %s5300_s26 = smov [#allocation7]  }
  0x52   :  { %s34_s4 = sshll.u32 %s5299_s18, 4  ;;  %s57_s19 = sshll.u32 %s5300_s26, 4  ;;  %s35_s4 = int_to_ptr.vmem [resolvable:$true] %s34_s4  ;;  %s5454_s19 = int_to_ptr.vmem [resolvable:$true] %s57_s19 }
  0x53   :  { %s5870_s22 = sld [smem:[#allocation24_spill]] }
  0x59   :  { %s5147_s23 = scalar_lea.hbm %s5870_s22, 128 }
  0x5a   :  { %p5148_p4 = scmp.ne.s32.totalorder %s5870_s22, %s5147_s23  ;;  %p5151_p5 = scmp.lt.u32.totalorder %s5147_s23, %s5870_s22 }
  0x5c   :  { %p5153_p6 = pnand %p5151_p5, %p5148_p4 }
  0x5e   :  { %5156 = shalt.err (!%p5153_p6)
}
  0x5f   :  { %s5157_s11 = scalar_lea.vmem %s35_s4, 128  ;;  %p5162_p8 = scmp.lt.s32.totalorder %s35_s4, %s35_s4 }
  0x60   :  { %p5158_p7 = scmp.ne.s32.totalorder %s35_s4, %s5157_s11  ;;  %p5163_p9 = scmp.lt.s32.totalorder %s5157_s11, %s5157_s11 }
  0x62   :  { %p5164_p10 = por %p5163_p9, %p5162_p8 }
  0x64   :  { %p5165_p11 = pnand %p5164_p10, %p5158_p7 }
  0x66   :  { %5168 = shalt.err (!%p5165_p11)
}
  0x67   :  { %37 = dma.hbm_to_vmem [thread:$0]  %s5870_s22, 128, %s35_s4, [#allocation3]  }
  0x68   :  { %s5169_s30 = scalar_lea.hbm %s5847_s3, 2048 }
  0x69   :  { %p5170_p12 = scmp.ne.s32.totalorder %s5847_s3, %s5169_s30  ;;  %p5173_p13 = scmp.lt.u32.totalorder %s5169_s30, %s5847_s3 }
  0x6b   :  { %p5175_p0 = pnand %p5173_p13, %p5170_p12 }
  0x6d   :  { %5178 = shalt.err (!%p5175_p0)
}
  0x6e   :  { %s5179_s23 = scalar_lea.vmem %s5454_s19, 2048  ;;  %p5184_p2 = scmp.lt.s32.totalorder %s5454_s19, %s5454_s19 }
  0x6f   :  { %p5180_p1 = scmp.ne.s32.totalorder %s5454_s19, %s5179_s23  ;;  %p5185_p3 = scmp.lt.s32.totalorder %s5179_s23, %s5179_s23 }
  0x71   :  { %p5186_p4 = por %p5185_p3, %p5184_p2 }
  0x73   :  { %p5187_p5 = pnand %p5186_p4, %p5180_p1 }
  0x75   :  { %5190 = shalt.err (!%p5187_p5)
}
  0x76   :  { %s5301_s4 = smov 128   ;;  %s5302_s22 = smov 8  }
  0x77   :  { %63 = dma.hbm_to_vmem [thread:$0]  %s5847_s3, 2048, %s5454_s19, [#allocation6], %s5301_s4, %s5301_s4, %s5302_s22  }
  0x78   :  { %s5303_s16 = smov [#allocation10]   ;;  %s5304_s11 = smov [#allocation13]  }
  0x79   :  { %s80_s17 = sshll.u32 %s5303_s16, 4  ;;  %s99_s1 = sshll.u32 %s5304_s11, 4  ;;  %s81_s17 = int_to_ptr.vmem [resolvable:$true] %s80_s17  ;;  %s5485_s1 = int_to_ptr.vmem [resolvable:$true] %s99_s1 }
  0x7a   :  { %s5191_s0 = scalar_lea.hbm %s5849_s5, 32 }
  0x7b   :  { %p5192_p6 = scmp.ne.s32.totalorder %s5849_s5, %s5191_s0  ;;  %p5195_p7 = scmp.lt.u32.totalorder %s5191_s0, %s5849_s5 }
  0x7d   :  { %p5197_p8 = pnand %p5195_p7, %p5192_p6 }
  0x7f   :  { %5200 = shalt.err (!%p5197_p8)
}
  0x80   :  { %s5201_s3 = scalar_lea.vmem %s81_s17, 32  ;;  %p5206_p10 = scmp.lt.s32.totalorder %s81_s17, %s81_s17 }
  0x81   :  { %p5202_p9 = scmp.ne.s32.totalorder %s81_s17, %s5201_s3  ;;  %p5207_p11 = scmp.lt.s32.totalorder %s5201_s3, %s5201_s3 }
  0x83   :  { %p5208_p12 = por %p5207_p11, %p5206_p10 }
  0x85   :  { %p5209_p13 = pnand %p5208_p12, %p5202_p9 }
  0x87   :  { %5212 = shalt.err (!%p5209_p13)
}
  0x88   :  { %83 = dma.hbm_to_vmem [thread:$0]  %s5849_s5, 32, %s81_s17, [#allocation9]  }
  0x89   :  { %s5213_s22 = scalar_lea.hbm %s5851_s7, 8192 }
  0x8a   :  { %p5214_p0 = scmp.ne.s32.totalorder %s5851_s7, %s5213_s22  ;;  %p5217_p1 = scmp.lt.u32.totalorder %s5213_s22, %s5851_s7 }
  0x8c   :  { %p5219_p2 = pnand %p5217_p1, %p5214_p0 }
  0x8e   :  { %5222 = shalt.err (!%p5219_p2)
}
  0x8f   :  { %s5223_s6 = scalar_lea.vmem %s5485_s1, 8192  ;;  %p5228_p4 = scmp.lt.s32.totalorder %s5485_s1, %s5485_s1 }
  0x90   :  { %p5224_p3 = scmp.ne.s32.totalorder %s5485_s1, %s5223_s6  ;;  %p5229_p5 = scmp.lt.s32.totalorder %s5223_s6, %s5223_s6 }
  0x92   :  { %p5230_p6 = por %p5229_p5, %p5228_p4 }
  0x94   :  { %p5231_p7 = pnand %p5230_p6, %p5224_p3 }
  0x96   :  { %5234 = shalt.err (!%p5231_p7)
}
  0x97   :  { %s5305_s5 = smov 256   ;;  %s5306_s17 = smov 16  }
  0x98   :  { %105 = dma.hbm_to_vmem [thread:$0]  %s5851_s7, 8192, %s5485_s1, [#allocation12], %s5305_s5, %s5305_s5, %s5306_s17  }
  0x99   :  { %s5307_s30 = smov [#allocation16]   ;;  %s5235_s3 = scalar_lea.hbm %s5859_s15, 8192 }
  0x9a   :  { %s135_s18 = sshll.u32 %s5307_s30, 4  ;;  %p5236_p8 = scmp.ne.s32.totalorder %s5859_s15, %s5235_s3  ;;  %s136_s18 = int_to_ptr.vmem [resolvable:$true] %s135_s18 }
  0x9b   :  { %p5239_p9 = scmp.lt.u32.totalorder %s5235_s3, %s5859_s15 }
  0x9d   :  { %p5241_p10 = pnand %p5239_p9, %p5236_p8 }
  0x9f   :  { %5244 = shalt.err (!%p5241_p10)
}
  0xa0   :  { %s5245_s22 = scalar_lea.vmem %s136_s18, 8192  ;;  %p5250_p12 = scmp.lt.s32.totalorder %s136_s18, %s136_s18 }
  0xa1   :  { %p5246_p11 = scmp.ne.s32.totalorder %s136_s18, %s5245_s22  ;;  %p5251_p13 = scmp.lt.s32.totalorder %s5245_s22, %s5245_s22 }
  0xa3   :  { %p5252_p0 = por %p5251_p13, %p5250_p12 }
  0xa5   :  { %p5253_p1 = pnand %p5252_p0, %p5246_p11 }
  0xa7   :  { %5256 = shalt.err (!%p5253_p1)
}
  0xa8   :  { %141 = dma.hbm_to_vmem [thread:$0]  %s5859_s15, 8192, %s136_s18, [#allocation15], %s5292_s20, %s5292_s20, %s5293_s21  }
  0xa9   :  { %5279 = dma.done.wait [#allocation3], 128  }
  0xaa   :  { %5280 = vsyncadd [#allocation3], 4294967168 }
  0xab   :  { %5281 = dma.done.wait [#allocation6], 3072  }
  0xac   :  { %5282 = vsyncadd [#allocation6], 4294964224 }
  0xad   :  { %5283 = dma.done.wait [#allocation9], 64  }
  0xae   :  { %5284 = vsyncadd [#allocation9], 4294967232 }
  0xaf   :  { %5285 = dma.done.wait [#allocation12], 8224  }
  0xb0   :  { %5286 = vsyncadd [#allocation12], 4294959072 }
  0xb1   :  { %5287 = dma.done.wait [#allocation15], 40960  }
  0xb2   :  { %5288 = vsyncadd [#allocation15], 4294926336  ;;  %v5308_v0 = vmov 0.0   ;;  %vm5309_vm0 = vmmov 0   ;;  %v4837_v1 = vld [vmem:[#allocation5] sm:$0xff]   ;;  %v4838_v2 = vld [vmem:[#allocation5 + $0x8] sm:$0xff]  }
  0xb3   :  { %4771 = vmatprep.subr.bf16.mxu0 %v5308_v0  ;;  %4787 = vmatprep.mubr.msk.bf16.mxu0 %vm5309_vm0, %v5308_v0  ;;  %v4839_v3 = vld [vmem:[#allocation5 + $0x10] sm:$0xff]   ;;  %v4845_v4 = vld [vmem:[#allocation7 + $0x4] ss:$8 sps:$4 sm:$0xff]   ;;  %v4847_v5 = vld [vmem:[#allocation7] ss:$8 sps:$4 sm:$0xff]   ;;  %v5310_v27 = vmov 0  }
  0xb4   :  { %4772 = vmatpush3.bf16.msra.mxu0 %v4837_v1  ;;  %v4840_v6 = vld [vmem:[#allocation5 + $0x18] sm:$0xff]   ;;  %397 = vmatprep.subr.bf16.mxu1 %v4845_v4  ;;  %v4851_v9 = vld [vmem:[#allocation7 + $0x24] ss:$8 sps:$4 sm:$0xff]   ;;  %v4853_v12 = vld [vmem:[#allocation7 + $0x20] ss:$8 sps:$4 sm:$0xff]   ;;  %s5871_s17 = sld [smem:[#allocation26_spill]] }
  0xb5   :  { %4773 = vmatprep.subr.bf16.mxu0 %v5308_v0  ;;  %v4848_v7 = vld [vmem:[#allocation7 + $0x14] ss:$8 sps:$4 sm:$0xff]   ;;  %398 = vmatpush1.bf16.msra.mxu1 %v4847_v5  ;;  %v4850_v8 = vld [vmem:[#allocation7 + $0x10] ss:$8 sps:$4 sm:$0xff]   ;;  %v4841_v10 = vld [vmem:[#allocation5 + $0x20] sm:$0xff]   ;;  %s5312_s29 = smov [#allocation17]  }
  0xb6   :  { %399 = vmatprep.subr.bf16.mxu1 %v4848_v7  ;;  %v4842_v11 = vld [vmem:[#allocation5 + $0x28] sm:$0xff]   ;;  %v4854_v13 = vld [vmem:[#allocation7 + $0x34] ss:$8 sps:$4 sm:$0xff]   ;;  %v4856_v14 = vld [vmem:[#allocation7 + $0x30] ss:$8 sps:$4 sm:$0xff]   ;;  %429 = vmatprep.mubr.bf16.mxu1 %v5310_v27  ;;  %s4251_s0 = sshll.u32 %s5312_s29, 4  ;;  %s4252_s0 = int_to_ptr.vmem [resolvable:$true] %s4251_s0 }
  0xb7   :  { %v4857_v15 = vld [vmem:[#allocation7 + $0x44] ss:$8 sps:$4 sm:$0xff]   ;;  %v4843_v16 = vld [vmem:[#allocation5 + $0x30] sm:$0xff]   ;;  %v4859_v17 = vld [vmem:[#allocation7 + $0x40] ss:$8 sps:$4 sm:$0xff]   ;;  %s5257_s30 = scalar_lea.vmem %s4252_s0, 128  ;;  %p5262_p3 = scmp.lt.s32.totalorder %s4252_s0, %s4252_s0 }
  0xb8   :  { %4774 = vmatpush3.bf16.msra.mxu0 %v4838_v2  ;;  %v4860_v18 = vld [vmem:[#allocation7 + $0x54] ss:$8 sps:$4 sm:$0xff]   ;;  %v4862_v21 = vld [vmem:[#allocation7 + $0x50] ss:$8 sps:$4 sm:$0xff]   ;;  %v4863_v23 = vld [vmem:[#allocation7 + $0x64] ss:$8 sps:$4 sm:$0xff]   ;;  %p5258_p2 = scmp.ne.s32.totalorder %s4252_s0, %s5257_s30  ;;  %p5263_p4 = scmp.lt.s32.totalorder %s5257_s30, %s5257_s30 }
  0xb9   :  { %4775 = vmatprep.subr.bf16.mxu0 %v5308_v0  ;;  %400 = vmatpush1.bf16.msra.mxu1 %v4850_v8  ;;  %v4844_v19 = vld [vmem:[#allocation5 + $0x38] sm:$0xff]   ;;  %v4865_v24 = vld [vmem:[#allocation7 + $0x60] ss:$8 sps:$4 sm:$0xff]  }
  0xba   :  { %401 = vmatprep.subr.bf16.mxu1 %v4851_v9  ;;  %v172_v20 = vld [vmem:[#allocation2] sm:$0xff]  ;;  %v4874_v38 = vld [vmem:[#allocation13 + $0xc] ss:$16 sps:$4 sm:$0xff]   ;;  %p5264_p5 = por %p5263_p4, %p5262_p3 }
  0xbb   :  { %v173_v22 = vpack.c.bf16 %v172_v20, %v172_v20  ;;  %v4866_v25 = vld [vmem:[#allocation7 + $0x74] ss:$8 sps:$4 sm:$0xff]   ;;  %v4868_v26 = vld [vmem:[#allocation7 + $0x70] ss:$8 sps:$4 sm:$0xff]  }
  0xbc   :  { %4776 = vmatpush3.bf16.msra.mxu0 %v4839_v3  ;;  %v4264_v28 = vld [vmem:[%s5846_s2] ss:$0 sm:$0xff]  ;;  %v4871_v37 = vld [vmem:[#allocation13 + $0x4] ss:$16 sps:$4 sm:$0xff]   ;;  %v4872_v40 = vld [vmem:[#allocation13 + $0x8] ss:$16 sps:$4 sm:$0xff]   ;;  %p5265_p6 = pnand %p5264_p5, %p5258_p2 }
  0xbd   :  { %4777 = vmatprep.subr.bf16.mxu0 %v5308_v0  ;;  %402 = vmatpush1.bf16.msra.mxu1 %v4853_v12  ;;  %v4869_v39 = vld [vmem:[#allocation13] ss:$16 sps:$4 sm:$0xff]   ;;  %v4877_v41 = vld [vmem:[#allocation13 + $0x24] ss:$16 sps:$4 sm:$0xff]   ;;  %v4880_v42 = vld [vmem:[#allocation13 + $0x2c] ss:$16 sps:$4 sm:$0xff]  }
  0xbe   :  { %403 = vmatprep.subr.bf16.mxu1 %v4854_v13  ;;  %v4875_v43 = vld [vmem:[#allocation13 + $0x20] ss:$16 sps:$4 sm:$0xff]   ;;  %v4878_v44 = vld [vmem:[#allocation13 + $0x28] ss:$16 sps:$4 sm:$0xff]   ;;  %v4883_v45 = vld [vmem:[#allocation13 + $0x44] ss:$16 sps:$4 sm:$0xff]  }
  0xbf   :  { %v4886_v46 = vld [vmem:[#allocation13 + $0x4c] ss:$16 sps:$4 sm:$0xff]   ;;  %v4881_v47 = vld [vmem:[#allocation13 + $0x40] ss:$16 sps:$4 sm:$0xff]   ;;  %v4884_v48 = vld [vmem:[#allocation13 + $0x48] ss:$16 sps:$4 sm:$0xff]  }
  0xc0   :  { %4778 = vmatpush3.bf16.msra.mxu0 %v4840_v6  ;;  %v4889_v49 = vld [vmem:[#allocation13 + $0x64] ss:$16 sps:$4 sm:$0xff]   ;;  %v4892_v50 = vld [vmem:[#allocation13 + $0x6c] ss:$16 sps:$4 sm:$0xff]   ;;  %v4887_v51 = vld [vmem:[#allocation13 + $0x60] ss:$16 sps:$4 sm:$0xff]  }
  0xc1   :  { %4779 = vmatprep.subr.bf16.mxu0 %v5308_v0  ;;  %404 = vmatpush1.bf16.msra.mxu1 %v4856_v14  ;;  %v4890_v52 = vld [vmem:[#allocation13 + $0x68] ss:$16 sps:$4 sm:$0xff]   ;;  %v4895_v53 = vld [vmem:[#allocation13 + $0x84] ss:$16 sps:$4 sm:$0xff]   ;;  %v4898_v54 = vld [vmem:[#allocation13 + $0x8c] ss:$16 sps:$4 sm:$0xff]  }
  0xc2   :  { %405 = vmatprep.subr.bf16.mxu1 %v4857_v15  ;;  %v4893_v55 = vld [vmem:[#allocation13 + $0x80] ss:$16 sps:$4 sm:$0xff]   ;;  %v4896_v56 = vld [vmem:[#allocation13 + $0x88] ss:$16 sps:$4 sm:$0xff]   ;;  %v4901_v57 = vld [vmem:[#allocation13 + $0xa4] ss:$16 sps:$4 sm:$0xff]  }
  0xc3   :  { %v4904_v58 = vld [vmem:[#allocation13 + $0xac] ss:$16 sps:$4 sm:$0xff]   ;;  %v4899_v59 = vld [vmem:[#allocation13 + $0xa0] ss:$16 sps:$4 sm:$0xff]   ;;  %v4902_v60 = vld [vmem:[#allocation13 + $0xa8] ss:$16 sps:$4 sm:$0xff]  }
  0xc4   :  { %4780 = vmatpush3.bf16.msra.mxu0 %v4841_v10  ;;  %v4907_v61 = vld [vmem:[#allocation13 + $0xc4] ss:$16 sps:$4 sm:$0xff]   ;;  %v4905_v62 = vld [vmem:[#allocation13 + $0xc0] ss:$16 sps:$4 sm:$0xff]   ;;  %v4908_v63 = vld [vmem:[#allocation13 + $0xc8] ss:$16 sps:$4 sm:$0xff]  }
  0xc5   :  { %4781 = vmatprep.subr.bf16.mxu0 %v5308_v0  ;;  %406 = vmatpush1.bf16.msra.mxu1 %v4859_v17  ;;  %v4913_v1 = vld [vmem:[#allocation13 + $0xe4] ss:$16 sps:$4 sm:$0xff]   ;;  %v4916_v2 = vld [vmem:[#allocation13 + $0xec] ss:$16 sps:$4 sm:$0xff]   ;;  %v4911_v3 = vld [vmem:[#allocation13 + $0xe0] ss:$16 sps:$4 sm:$0xff]  }
  0xc6   :  { %407 = vmatprep.subr.bf16.mxu1 %v4860_v18  ;;  %v4914_v4 = vld [vmem:[#allocation13 + $0xe8] ss:$16 sps:$4 sm:$0xff]   ;;  %v4919_v5 = vld [vmem:[#allocation13 + $0x104] ss:$16 sps:$4 sm:$0xff]   ;;  %v4922_v6 = vld [vmem:[#allocation13 + $0x10c] ss:$16 sps:$4 sm:$0xff]  }
  0xc7   :  { %v4917_v7 = vld [vmem:[#allocation13 + $0x100] ss:$16 sps:$4 sm:$0xff]   ;;  %v4920_v8 = vld [vmem:[#allocation13 + $0x108] ss:$16 sps:$4 sm:$0xff]   ;;  %v4925_v9 = vld [vmem:[#allocation13 + $0x124] ss:$16 sps:$4 sm:$0xff]  }
  0xc8   :  { %4782 = vmatpush3.bf16.msra.mxu0 %v4842_v11  ;;  %v4928_v10 = vld [vmem:[#allocation13 + $0x12c] ss:$16 sps:$4 sm:$0xff]   ;;  %v4923_v11 = vld [vmem:[#allocation13 + $0x120] ss:$16 sps:$4 sm:$0xff]   ;;  %v4926_v12 = vld [vmem:[#allocation13 + $0x128] ss:$16 sps:$4 sm:$0xff]  }
  0xc9   :  { %4783 = vmatprep.subr.bf16.mxu0 %v5308_v0  ;;  %408 = vmatpush1.bf16.msra.mxu1 %v4862_v21  ;;  %v4931_v13 = vld [vmem:[#allocation13 + $0x144] ss:$16 sps:$4 sm:$0xff]   ;;  %v4934_v14 = vld [vmem:[#allocation13 + $0x14c] ss:$16 sps:$4 sm:$0xff]   ;;  %v4929_v15 = vld [vmem:[#allocation13 + $0x140] ss:$16 sps:$4 sm:$0xff]  }
  0xca   :  { %409 = vmatprep.subr.bf16.mxu1 %v4863_v23  ;;  %v4937_v17 = vld [vmem:[#allocation13 + $0x164] ss:$16 sps:$4 sm:$0xff]   ;;  %v4940_v18 = vld [vmem:[#allocation13 + $0x16c] ss:$16 sps:$4 sm:$0xff]   ;;  %v4938_v20 = vld [vmem:[#allocation13 + $0x168] ss:$16 sps:$4 sm:$0xff]  }
  0xcb   :  { %v4943_v21 = vld [vmem:[#allocation13 + $0x184] ss:$16 sps:$4 sm:$0xff]   ;;  %v4941_v23 = vld [vmem:[#allocation13 + $0x180] ss:$16 sps:$4 sm:$0xff]   ;;  %v4952_v27 = vld [vmem:[#allocation13 + $0x1ac] ss:$16 sps:$4 sm:$0xff]  }
  0xcc   :  { %4784 = vmatpush3.bf16.msra.mxu0 %v4843_v16  ;;  %v4932_v16 = vld [vmem:[#allocation13 + $0x148] ss:$16 sps:$4 sm:$0xff]  }
  0xcd   :  { %4785 = vmatprep.subr.bf16.mxu0 %v5308_v0  ;;  %410 = vmatpush1.bf16.msra.mxu1 %v4865_v24  ;;  %v4910_v0 = vld [vmem:[#allocation13 + $0xcc] ss:$16 sps:$4 sm:$0xff]   ;;  %v4944_v24 = vld [vmem:[#allocation13 + $0x188] ss:$16 sps:$4 sm:$0xff]  }
  0xce   :  { %411 = vmatprep.subr.bf16.mxu1 %v4866_v25  ;;  %v4949_v25 = vld [vmem:[#allocation13 + $0x1a4] ss:$16 sps:$4 sm:$0xff]  }
  0xd0   :  { %4786 = vmatpush3.bf16.msra.mxu0 %v4844_v19  ;;  %v4935_v19 = vld [vmem:[#allocation13 + $0x160] ss:$16 sps:$4 sm:$0xff]  }
  0xd1   :  { %412 = vmatpush1.bf16.msra.mxu1 %v4868_v26  ;;  %958 = vmatprep.subr.bf16.mxu0 %v4871_v37  ;;  %v4947_v26 = vld [vmem:[#allocation13 + $0x1a0] ss:$16 sps:$4 sm:$0xff]   ;;  %v307_v37 = vlaneseq }
  0xd2   :  { %999 = vmatprep.subr.bf16.mxu1 %v4874_v38 }
  0xd3   :  { %4788 = vmatmul.mubr.bf16.vlgmr.msra.gmra.mrb[0].mxu0 %v173_v22  ;;  %v4946_v22 = vld [vmem:[#allocation13 + $0x18c] ss:$16 sps:$4 sm:$0xff]   ;;  %v5534_v38 = vshrl.u32 %v307_v37, 7 }
  0xd4   :  { %959 = vmatpush1.bf16.msra.mxu0 %v4869_v39 }
  0xd5   :  { %960 = vmatprep.subr.bf16.mxu0 %v4877_v41  ;;  %v5537_v39 = vsub.s32 0, %v5534_v38  ;;  %v5540_v41 = vsub.s32 1, %v5534_v38 }
  0xd8   :  { %961 = vmatpush1.bf16.msra.mxu0 %v4875_v43 }
  0xd9   :  { %962 = vmatprep.subr.bf16.mxu0 %v4883_v45 }
  0xdc   :  { %963 = vmatpush1.bf16.msra.mxu0 %v4881_v47 }
  0xdd   :  { %964 = vmatprep.subr.bf16.mxu0 %v4889_v49 }
  0xe0   :  { %965 = vmatpush1.bf16.msra.mxu0 %v4887_v51 }
  0xe1   :  { %966 = vmatprep.subr.bf16.mxu0 %v4895_v53 }
  0xe4   :  { %967 = vmatpush1.bf16.msra.mxu0 %v4893_v55 }
  0xe5   :  { %968 = vmatprep.subr.bf16.mxu0 %v4901_v57 }
  0xe8   :  { %969 = vmatpush1.bf16.msra.mxu0 %v4899_v59 }
  0xe9   :  { %970 = vmatprep.subr.bf16.mxu0 %v4907_v61 }
  0xec   :  { %971 = vmatpush1.bf16.msra.mxu0 %v4905_v62 }
  0xed   :  { %972 = vmatprep.subr.bf16.mxu0 %v4913_v1 }
  0xf0   :  { %973 = vmatpush1.bf16.msra.mxu0 %v4911_v3 }
  0xf1   :  { %974 = vmatprep.subr.bf16.mxu0 %v4919_v5 }
  0xf4   :  { %975 = vmatpush1.bf16.msra.mxu0 %v4917_v7 }
  0xf5   :  { %976 = vmatprep.subr.bf16.mxu0 %v4925_v9 }
  0xf8   :  { %977 = vmatpush1.bf16.msra.mxu0 %v4923_v11 }
  0xf9   :  { %978 = vmatprep.subr.bf16.mxu0 %v4931_v13 }
  0xfc   :  { %979 = vmatpush1.bf16.msra.mxu0 %v4929_v15 }
  0xfd   :  { %980 = vmatprep.subr.bf16.mxu0 %v4937_v17 }
 0x100   :  { %981 = vmatpush1.bf16.msra.mxu0 %v4935_v19 }
 0x101   :  { %982 = vmatprep.subr.bf16.mxu0 %v4943_v21 }
 0x104   :  { %983 = vmatpush1.bf16.msra.mxu0 %v4941_v23 }
 0x105   :  { %984 = vmatprep.subr.bf16.mxu0 %v4949_v25 }
 0x108   :  { %985 = vmatpush1.bf16.msra.mxu0 %v4947_v26 }
 0x1a6   :  { %v279_v29 = vpop.f32.mrb[0].mxu0 }
 0x1a7   :  { %v280_v30 = vadd.f32 %v4264_v28, %v279_v29  ;;  %v4789_v31 = vpop.f32.mrb[1].mxu0  ;;  %v4950_v28 = vld [vmem:[#allocation13 + $0x1a8] ss:$16 sps:$4 sm:$0xff]   ;;  %v4955_v29 = vld [vmem:[#allocation13 + $0x1c4] ss:$16 sps:$4 sm:$0xff]  }
 0x1a8   :  { %v282_v32 = vpop.f32.mrb[2].mxu0  ;;  %v4953_v31 = vld [vmem:[#allocation13 + $0x1c0] ss:$16 sps:$4 sm:$0xff]   ;;  %986 = vmatprep.subr.bf16.mxu0 %v4955_v29 }
 0x1a9   :  { %vm285_vm1 = vcmp.gt.f32.partialorder %v280_v30, 0.0  ;;  %v286_v33 = vmul.f32 0.2, %v280_v30  ;;  %v4790_v34 = vpop.f32.mrb[3].mxu0  ;;  %v4956_v32 = vld [vmem:[#allocation13 + $0x1c8] ss:$16 sps:$4 sm:$0xff]   ;;  %987 = vmatpush1.bf16.msra.mxu0 %v4953_v31 }
 0x1aa   :  { %v4964_v34 = vld [vmem:[#allocation13 + $0x1ec] ss:$16 sps:$4 sm:$0xff]  }
 0x1ab   :  { %v287_v35 = vsel %vm285_vm1, %v280_v30, %v286_v33  ;;  %v4958_v30 = vld [vmem:[#allocation13 + $0x1cc] ss:$16 sps:$4 sm:$0xff]   ;;  %v4961_v33 = vld [vmem:[#allocation13 + $0x1e4] ss:$16 sps:$4 sm:$0xff]  }
 0x1ac   :  { %v288_v36 = vpack.c.bf16 %v287_v35, %v287_v35  ;;  %v4959_v35 = vld [vmem:[#allocation13 + $0x1e0] ss:$16 sps:$4 sm:$0xff]   ;;  %988 = vmatprep.subr.bf16.mxu0 %v4961_v33 }
 0x1ad   :  { %989 = vmatpush1.bf16.msra.mxu0 %v4959_v35 }
 0x1ae   :  { %430 = vmatmul.mubr.bf16.vlgmr.msra.gmra.mrb[0].mxu1 %v288_v36  ;;  %v4962_v36 = vld [vmem:[#allocation13 + $0x1e8] ss:$16 sps:$4 sm:$0xff]  }
 0x1af   :  { %1000 = vmatpush1.bf16.msra.mxu1 %v4872_v40  ;;  %v305_v40 = vld [vmem:[#allocation8] sm:$0x3] }
 0x1b0   :  { %1001 = vmatprep.subr.bf16.mxu1 %v4880_v42  ;;  %v310_v42 = vrot.slane %v305_v40, %v5537_v39  ;;  %v314_v43 = vrot.slane %v305_v40, %v5540_v41 }
 0x1b3   :  { %1002 = vmatpush1.bf16.msra.mxu1 %v4878_v44 }
 0x1b4   :  { %1003 = vmatprep.subr.bf16.mxu1 %v4886_v46 }
 0x1b7   :  { %1004 = vmatpush1.bf16.msra.mxu1 %v4884_v48 }
 0x1b8   :  { %1005 = vmatprep.subr.bf16.mxu1 %v4892_v50 }
 0x1bb   :  { %1006 = vmatpush1.bf16.msra.mxu1 %v4890_v52 }
 0x1bc   :  { %1007 = vmatprep.subr.bf16.mxu1 %v4898_v54 }
 0x1bf   :  { %1008 = vmatpush1.bf16.msra.mxu1 %v4896_v56 }
 0x1c0   :  { %1009 = vmatprep.subr.bf16.mxu1 %v4904_v58 }
 0x1c3   :  { %1010 = vmatpush1.bf16.msra.mxu1 %v4902_v60 }
 0x1c4   :  { %1011 = vmatprep.subr.bf16.mxu1 %v4910_v0 }
 0x1c7   :  { %1012 = vmatpush1.bf16.msra.mxu1 %v4908_v63 }
 0x1c8   :  { %1013 = vmatprep.subr.bf16.mxu1 %v4916_v2 }
 0x1cb   :  { %1014 = vmatpush1.bf16.msra.mxu1 %v4914_v4 }
 0x1cc   :  { %1015 = vmatprep.subr.bf16.mxu1 %v4922_v6 }
 0x1cf   :  { %1016 = vmatpush1.bf16.msra.mxu1 %v4920_v8 }
 0x1d0   :  { %1017 = vmatprep.subr.bf16.mxu1 %v4928_v10 }
 0x1d3   :  { %1018 = vmatpush1.bf16.msra.mxu1 %v4926_v12 }
 0x1d4   :  { %1019 = vmatprep.subr.bf16.mxu1 %v4934_v14 }
 0x1d7   :  { %1020 = vmatpush1.bf16.msra.mxu1 %v4932_v16 }
 0x1d8   :  { %1021 = vmatprep.subr.bf16.mxu1 %v4940_v18 }
 0x1db   :  { %1022 = vmatpush1.bf16.msra.mxu1 %v4938_v20 }
 0x1dc   :  { %1023 = vmatprep.subr.bf16.mxu1 %v4946_v22  ;;  %v5311_v22 = vmov 1966171168  }
 0x1dd   :  { %v481_v23 = vunpack.c.l.s4 %v5311_v22 }
 0x1df   :  { %1024 = vmatpush1.bf16.msra.mxu1 %v4944_v24  ;;  %v482_v24 = vunpack.c.0.s8 %v481_v23 }
 0x1e0   :  { %1025 = vmatprep.subr.bf16.mxu1 %v4952_v27 }
 0x1e1   :  { %v5545_v26 = vsub.s32 %v482_v24, %v5534_v38 }
 0x1e3   :  { %1026 = vmatpush1.bf16.msra.mxu1 %v4950_v28 }
 0x1e4   :  { %1027 = vmatprep.subr.bf16.mxu1 %v4958_v30  ;;  %v472_v30 = vld [vmem:[#allocation10] sm:$0x3] }
 0x1e7   :  { %1028 = vmatpush1.bf16.msra.mxu1 %v4956_v32 }
 0x1e8   :  { %1029 = vmatprep.subr.bf16.mxu1 %v4964_v34 }
 0x1eb   :  { %1030 = vmatpush1.bf16.msra.mxu1 %v4962_v36 }
 0x281   :  { %v431_v44 = vpop.f32.mrb[0].mxu1 }
 0x282   :  { %v432_v45 = vadd.f32 %v431_v44, %v310_v42  ;;  %v433_v46 = vpop.f32.mrb[1].mxu1  ;;  %v496_v44 = vld [vmem:[#allocation11] sm:$0x3] }
 0x283   :  { %v434_v47 = vadd.f32 %v433_v46, %v314_v43  ;;  %v435_v48 = vpop.f32.mrb[2].mxu1 }
 0x284   :  { %v438_v49 = vrot.slane %v432_v45, 4  ;;  %v452_v50 = vmul.f32 %v432_v45, %v432_v45  ;;  %v436_v51 = vpop.f32.mrb[3].mxu1 }
 0x285   :  { %v444_v52 = vrot.slane %v434_v47, 4  ;;  %v453_v53 = vmul.f32 %v434_v47, %v434_v47 }
 0x286   :  { %v439_v54 = vadd.f32 %v438_v49, %v432_v45  ;;  %v454_v55 = vrot.slane %v452_v50, 4 }
 0x287   :  { %v445_v56 = vadd.f32 %v444_v52, %v434_v47  ;;  %v460_v57 = vrot.slane %v453_v53, 4 }
 0x288   :  { %v440_v58 = vrot.slane %v439_v54, 2  ;;  %v455_v59 = vadd.f32 %v454_v55, %v452_v50 }
 0x289   :  { %v446_v60 = vrot.slane %v445_v56, 2  ;;  %v461_v61 = vadd.f32 %v460_v57, %v453_v53  ;;  %v1248_v57 = vld [vmem:[#allocation14] sm:$0xff] }
 0x28a   :  { %v441_v62 = vadd.f32 %v440_v58, %v439_v54  ;;  %v456_v63 = vrot.slane %v455_v59, 2  ;;  %v1252_v58 = vld [vmem:[#allocation14 + $0x20] sm:$0xff] }
 0x28b   :  { %v447_v0 = vadd.f32 %v446_v60, %v445_v56  ;;  %v462_v1 = vrot.slane %v461_v61, 2  ;;  %v4354_v60 = vcombine.high %v1248_v57, %v1252_v58 }
 0x28c   :  { %v442_v2 = vrot.slane %v441_v62, 1  ;;  %v457_v3 = vadd.f32 %v456_v63, %v455_v59  ;;  %v1249_v59 = vld [vmem:[#allocation14 + $0x8] sm:$0xff] }
 0x28d   :  { %v448_v4 = vrot.slane %v447_v0, 1  ;;  %v463_v5 = vadd.f32 %v462_v1, %v461_v61  ;;  %v1253_v61 = vld [vmem:[#allocation14 + $0x28] sm:$0xff]  ;;  %2826 = vmatprep.subr.bf16.mxu0 %v4354_v60  ;;  %v1256_v1 = vld [vmem:[#allocation14 + $0x40] sm:$0xff] }
 0x28e   :  { %v443_v6 = vadd.f32 %v442_v2, %v441_v62  ;;  %v458_v7 = vrot.slane %v457_v3, 1  ;;  %v4353_v62 = vcombine.low %v1248_v57, %v1252_v58  ;;  %v4355_v63 = vcombine.low %v1249_v59, %v1253_v61  ;;  %v1260_v2 = vld [vmem:[#allocation14 + $0x60] sm:$0xff]  ;;  %v1309_v57 = vld [vmem:[#allocation14 + $0x1e8] sm:$0xff] }
 0x28f   :  { %v449_v8 = vadd.f32 %v448_v4, %v447_v0  ;;  %v464_v9 = vrot.slane %v463_v5, 1  ;;  %v4356_v0 = vcombine.high %v1249_v59, %v1253_v61  ;;  %v4362_v4 = vcombine.high %v1256_v1, %v1260_v2  ;;  %v1312_v61 = vld [vmem:[#allocation14 + $0x200] sm:$0xff] }
 0x290   :  { %v450_v10 = vmul.f32 0.125, %v443_v6  ;;  %v459_v11 = vadd.f32 %v458_v7, %v457_v3  ;;  %v1257_v3 = vld [vmem:[#allocation14 + $0x48] sm:$0xff]  ;;  %v4361_v6 = vcombine.low %v1256_v1, %v1260_v2 }
 0x291   :  { %v451_v12 = vmul.f32 0.125, %v449_v8  ;;  %v465_v13 = vadd.f32 %v464_v9, %v463_v5  ;;  %2908 = vmatprep.subr.bf16.mxu1 %v4356_v0  ;;  %v1261_v5 = vld [vmem:[#allocation14 + $0x68] sm:$0xff]  ;;  %v1264_v9 = vld [vmem:[#allocation14 + $0x80] sm:$0xff] }
 0x292   :  { %v466_v14 = vmul.f32 0.125, %v459_v11  ;;  %v468_v15 = vmul.f32 %v450_v10, %v450_v10  ;;  %v4363_v7 = vcombine.low %v1257_v3, %v1261_v5  ;;  %v4364_v8 = vcombine.high %v1257_v3, %v1261_v5  ;;  %v1265_v11 = vld [vmem:[#allocation14 + $0x88] sm:$0xff]  ;;  %v1320_v5 = vld [vmem:[#allocation14 + $0x240] sm:$0xff] }
 0x293   :  { %v467_v16 = vmul.f32 0.125, %v465_v13  ;;  %v469_v17 = vmul.f32 %v451_v12, %v451_v12  ;;  %v1269_v13 = vld [vmem:[#allocation14 + $0xa8] sm:$0xff] }
 0x294   :  { %v470_v18 = vsub.f32 %v466_v14, %v468_v15  ;;  %v4371_v15 = vcombine.low %v1265_v11, %v1269_v13  ;;  %v1317_v1 = vld [vmem:[#allocation14 + $0x228] sm:$0xff] }
 0x295   :  { %v471_v19 = vsub.f32 %v467_v16, %v469_v17  ;;  %v4372_v16 = vcombine.high %v1265_v11, %v1269_v13  ;;  %v1272_v17 = vld [vmem:[#allocation14 + $0xc0] sm:$0xff] }
 0x296   :  { %v473_v20 = vadd.f32 0.8, %v470_v18  ;;  %v1276_v18 = vld [vmem:[#allocation14 + $0xe0] sm:$0xff] }
 0x297   :  { %v474_v21 = vadd.f32 0.8, %v471_v19  ;;  %v1273_v19 = vld [vmem:[#allocation14 + $0xc8] sm:$0xff]  ;;  %v4377_v22 = vcombine.low %v1272_v17, %v1276_v18  ;;  %v1328_v13 = vld [vmem:[#allocation14 + $0x280] sm:$0xff] }
 0x298   :  { %5029 = vrsqrt.f32 %v473_v20  ;;  %v4378_v20 = vcombine.high %v1272_v17, %v1276_v18  ;;  %v1333_v17 = vld [vmem:[#allocation14 + $0x2a8] sm:$0xff] }
 0x299   :  { %5031 = vrsqrt.f32 %v474_v21  ;;  %v1277_v21 = vld [vmem:[#allocation14 + $0xe8] sm:$0xff] }
 0x29a   :  { %v4379_v23 = vcombine.low %v1273_v19, %v1277_v21  ;;  %v4380_v24 = vcombine.high %v1273_v19, %v1277_v21  ;;  %v1336_v21 = vld [vmem:[#allocation14 + $0x2c0] sm:$0xff] }
 0x2a2   :  { %v5030_v25 = vpop.eup %5029 }
 0x2a3   :  { %v5032_v27 = vpop.eup %5031 }
 0x2a4   :  { %v479_v28 = vcombine.low %v5030_v25, %v5032_v27  ;;  %v1280_v25 = vld [vmem:[#allocation14 + $0x100] sm:$0xff] }
 0x2a5   :  { %v1284_v27 = vld [vmem:[#allocation14 + $0x120] sm:$0xff] }
 0x2a6   :  { %v486_v29 = vrot.slane %v479_v28, %v5545_v26  ;;  %v1281_v28 = vld [vmem:[#allocation14 + $0x108] sm:$0xff] }
 0x2a8   :  { %v493_v31 = vrot.slane %v486_v29, %v5545_v26  ;;  %v4386_v29 = vcombine.high %v1280_v25, %v1284_v27 }
 0x2aa   :  { %v495_v32 = vmul.f32 %v493_v31, %v472_v30  ;;  %v1285_v30 = vld [vmem:[#allocation14 + $0x128] sm:$0xff]  ;;  %v4385_v31 = vcombine.low %v1280_v25, %v1284_v27 }
 0x2ab   :  { %v1341_v25 = vld [vmem:[#allocation14 + $0x2e8] sm:$0xff] }
 0x2ac   :  { %v501_v33 = vrot.slane %v495_v32, %v5537_v39  ;;  %v505_v34 = vrot.slane %v495_v32, %v5540_v41  ;;  %v4387_v32 = vcombine.low %v1281_v28, %v1285_v30 }
 0x2ae   :  { %v508_v35 = vmul.f32 %v501_v33, %v450_v10  ;;  %v509_v36 = vmul.f32 %v505_v34, %v451_v12  ;;  %v530_v37 = vmul.f32 %v505_v34, %v434_v47  ;;  %v529_v40 = vmul.f32 %v501_v33, %v432_v45  ;;  %v1268_v10 = vld [vmem:[#allocation14 + $0xa0] sm:$0xff] }
 0x2af   :  { %v4370_v12 = vcombine.high %v1264_v9, %v1268_v10  ;;  %v4369_v14 = vcombine.low %v1264_v9, %v1268_v10  ;;  %v4388_v33 = vcombine.high %v1281_v28, %v1285_v30  ;;  %v1288_v34 = vld [vmem:[#allocation14 + $0x140] sm:$0xff]  ;;  %v1325_v9 = vld [vmem:[#allocation14 + $0x268] sm:$0xff] }
 0x2b0   :  { %v512_v42 = vcombine.low %v508_v35, %v509_v36  ;;  %v1292_v35 = vld [vmem:[#allocation14 + $0x160] sm:$0xff]  ;;  %v1289_v36 = vld [vmem:[#allocation14 + $0x148] sm:$0xff] }
 0x2b1   :  { %v1344_v30 = vld [vmem:[#allocation14 + $0x300] sm:$0xff] }
 0x2b2   :  { %v519_v43 = vrot.slane %v512_v42, %v5545_v26  ;;  %v4393_v42 = vcombine.low %v1288_v34, %v1292_v35 }
 0x2b4   :  { %v526_v46 = vrot.slane %v519_v43, %v5545_v26 }
 0x2b6   :  { %v528_v48 = vsub.f32 %v496_v44, %v526_v46  ;;  %v1296_v46 = vld [vmem:[#allocation14 + $0x180] sm:$0xff] }
 0x2b8   :  { %v539_v49 = vrot.slane %v528_v48, %v5540_v41  ;;  %v535_v50 = vrot.slane %v528_v48, %v5537_v39  ;;  %v1300_v48 = vld [vmem:[#allocation14 + $0x1a0] sm:$0xff] }
 0x2ba   :  { %v543_v51 = vadd.f32 %v539_v49, %v530_v37  ;;  %v542_v52 = vadd.f32 %v535_v50, %v529_v40  ;;  %v4394_v37 = vcombine.high %v1288_v34, %v1292_v35  ;;  %v1293_v40 = vld [vmem:[#allocation14 + $0x168] sm:$0xff]  ;;  %v4402_v50 = vcombine.high %v1296_v46, %v1300_v48 }
 0x2bb   :  { %v4395_v43 = vcombine.low %v1289_v36, %v1293_v40  ;;  %v4396_v44 = vcombine.high %v1289_v36, %v1293_v40  ;;  %v1297_v49 = vld [vmem:[#allocation14 + $0x188] sm:$0xff]  ;;  %v1352_v40 = vld [vmem:[#allocation14 + $0x340] sm:$0xff] }
 0x2bc   :  { %vm545_vm2 = vcmp.gt.f32.partialorder %v543_v51, 0.0  ;;  %v547_v53 = vmul.f32 0.2, %v543_v51  ;;  %vm544_vm3 = vcmp.gt.f32.partialorder %v542_v52, 0.0  ;;  %v546_v54 = vmul.f32 0.2, %v542_v52 }
 0x2bd   :  { %v1349_v34 = vld [vmem:[#allocation14 + $0x328] sm:$0xff] }
 0x2be   :  { %v549_v55 = vsel %vm545_vm2, %v543_v51, %v547_v53  ;;  %v548_v47 = vsel %vm544_vm3, %v542_v52, %v546_v54  ;;  %v1301_v51 = vld [vmem:[#allocation14 + $0x1a8] sm:$0xff]  ;;  %v4401_v52 = vcombine.low %v1296_v46, %v1300_v48 }
 0x2bf   :  { %v551_v45 = vpack.c.bf16 %v549_v55, %v549_v55  ;;  %v550_v56 = vpack.c.bf16 %v548_v47, %v548_v47  ;;  %v4403_v53 = vcombine.low %v1297_v49, %v1301_v51  ;;  %v4404_v54 = vcombine.high %v1297_v49, %v1301_v51  ;;  %v1304_v55 = vld [vmem:[#allocation14 + $0x1c0] sm:$0xff]  ;;  %v1357_v46 = vld [vmem:[#allocation14 + $0x368] sm:$0xff] }
 0x2c0   :  { %v1308_v47 = vld [vmem:[#allocation14 + $0x1e0] sm:$0xff] }
 0x2c1   :  { %990 = vmatprep.mubr.bf16.mxu0 %v551_v45  ;;  %1031 = vmatprep.mubr.bf16.mxu1 %v551_v45  ;;  %v1305_v45 = vld [vmem:[#allocation14 + $0x1c8] sm:$0xff]  ;;  %v4409_v58 = vcombine.low %v1304_v55, %v1308_v47  ;;  %v1360_v51 = vld [vmem:[#allocation14 + $0x380] sm:$0xff] }
 0x2c2   :  { %991 = vmatmul.mubr.bf16.vlgmr.msra.gmra.mrb[4].mxu0 %v550_v56  ;;  %1032 = vmatmul.mubr.bf16.vlgmr.msra.gmra.mrb[4].mxu1 %v550_v56  ;;  %v4410_v56 = vcombine.high %v1304_v55, %v1308_v47  ;;  %v4411_v59 = vcombine.low %v1305_v45, %v1309_v57  ;;  %v4412_v60 = vcombine.high %v1305_v45, %v1309_v57  ;;  %v1365_v55 = vld [vmem:[#allocation14 + $0x3a8] sm:$0xff]  ;;  %v1368_v57 = vld [vmem:[#allocation14 + $0x3c0] sm:$0xff] }
 0x2c3   :  { %2827 = vmatpush1.bf16.msra.mxu0 %v4353_v62  ;;  %2909 = vmatpush1.bf16.msra.mxu1 %v4355_v63  ;;  %v1316_v62 = vld [vmem:[#allocation14 + $0x220] sm:$0xff]  ;;  %v1313_v63 = vld [vmem:[#allocation14 + $0x208] sm:$0xff] }
 0x2c4   :  { %2828 = vmatprep.subr.bf16.mxu0 %v4362_v4  ;;  %2910 = vmatprep.subr.bf16.mxu1 %v4364_v8  ;;  %v4418_v0 = vcombine.high %v1312_v61, %v1316_v62  ;;  %v4417_v2 = vcombine.low %v1312_v61, %v1316_v62  ;;  %v4419_v3 = vcombine.low %v1313_v63, %v1317_v1  ;;  %v1373_v62 = vld [vmem:[#allocation14 + $0x3e8] sm:$0xff] }
 0x2c5   :  { %v4420_v4 = vcombine.high %v1313_v63, %v1317_v1  ;;  %v5555_v1 = vld [vmem:[#allocation14 + $0x400] sm:$0xff] }
 0x2c7   :  { %2829 = vmatpush1.bf16.msra.mxu0 %v4361_v6  ;;  %2911 = vmatpush1.bf16.msra.mxu1 %v4363_v7  ;;  %v1324_v6 = vld [vmem:[#allocation14 + $0x260] sm:$0xff]  ;;  %v1321_v7 = vld [vmem:[#allocation14 + $0x248] sm:$0xff] }
 0x2c8   :  { %2830 = vmatprep.subr.bf16.mxu0 %v4370_v12  ;;  %2912 = vmatprep.subr.bf16.mxu1 %v4372_v16  ;;  %v4426_v8 = vcombine.high %v1320_v5, %v1324_v6  ;;  %v4425_v10 = vcombine.low %v1320_v5, %v1324_v6  ;;  %v4427_v11 = vcombine.low %v1321_v7, %v1325_v9  ;;  %v5563_v5 = vld [vmem:[#allocation14 + $0x428] sm:$0xff] }
 0x2c9   :  { %v4428_v12 = vcombine.high %v1321_v7, %v1325_v9  ;;  %v5572_v9 = vsub.s32 2, %v5534_v38 }
 0x2cb   :  { %2831 = vmatpush1.bf16.msra.mxu0 %v4369_v14  ;;  %2913 = vmatpush1.bf16.msra.mxu1 %v4371_v15  ;;  %v1332_v14 = vld [vmem:[#allocation14 + $0x2a0] sm:$0xff]  ;;  %v1329_v15 = vld [vmem:[#allocation14 + $0x288] sm:$0xff] }
 0x2cc   :  { %2832 = vmatprep.subr.bf16.mxu0 %v4378_v20  ;;  %2914 = vmatprep.subr.bf16.mxu1 %v4380_v24  ;;  %v4434_v16 = vcombine.high %v1328_v13, %v1332_v14  ;;  %v4433_v18 = vcombine.low %v1328_v13, %v1332_v14  ;;  %v4435_v19 = vcombine.low %v1329_v15, %v1333_v17 }
 0x2cd   :  { %v4436_v20 = vcombine.high %v1329_v15, %v1333_v17 }
 0x2cf   :  { %2833 = vmatpush1.bf16.msra.mxu0 %v4377_v22  ;;  %2915 = vmatpush1.bf16.msra.mxu1 %v4379_v23  ;;  %v1340_v22 = vld [vmem:[#allocation14 + $0x2e0] sm:$0xff]  ;;  %v1337_v23 = vld [vmem:[#allocation14 + $0x2c8] sm:$0xff] }
 0x2d0   :  { %2834 = vmatprep.subr.bf16.mxu0 %v4386_v29  ;;  %2916 = vmatprep.subr.bf16.mxu1 %v4388_v33  ;;  %v4442_v24 = vcombine.high %v1336_v21, %v1340_v22  ;;  %v4441_v27 = vcombine.low %v1336_v21, %v1340_v22  ;;  %v4443_v28 = vcombine.low %v1337_v23, %v1341_v25 }
 0x2d1   :  { %v4444_v29 = vcombine.high %v1337_v23, %v1341_v25 }
 0x2d3   :  { %2835 = vmatpush1.bf16.msra.mxu0 %v4385_v31  ;;  %2917 = vmatpush1.bf16.msra.mxu1 %v4387_v32  ;;  %v1348_v31 = vld [vmem:[#allocation14 + $0x320] sm:$0xff]  ;;  %v1345_v32 = vld [vmem:[#allocation14 + $0x308] sm:$0xff] }
 0x2d4   :  { %2836 = vmatprep.subr.bf16.mxu0 %v4394_v37  ;;  %2918 = vmatprep.subr.bf16.mxu1 %v4396_v44  ;;  %v4450_v33 = vcombine.high %v1344_v30, %v1348_v31  ;;  %v4449_v35 = vcombine.low %v1344_v30, %v1348_v31  ;;  %v4451_v36 = vcombine.low %v1345_v32, %v1349_v34 }
 0x2d5   :  { %v4452_v37 = vcombine.high %v1345_v32, %v1349_v34 }
 0x2d7   :  { %2837 = vmatpush1.bf16.msra.mxu0 %v4393_v42  ;;  %2919 = vmatpush1.bf16.msra.mxu1 %v4395_v43  ;;  %v1356_v42 = vld [vmem:[#allocation14 + $0x360] sm:$0xff]  ;;  %v1353_v43 = vld [vmem:[#allocation14 + $0x348] sm:$0xff] }
 0x2d8   :  { %2838 = vmatprep.subr.bf16.mxu0 %v4402_v50  ;;  %2920 = vmatprep.subr.bf16.mxu1 %v4404_v54  ;;  %v4458_v44 = vcombine.high %v1352_v40, %v1356_v42  ;;  %v4457_v48 = vcombine.low %v1352_v40, %v1356_v42  ;;  %v4459_v49 = vcombine.low %v1353_v43, %v1357_v46 }
 0x2d9   :  { %v4460_v50 = vcombine.high %v1353_v43, %v1357_v46 }
 0x2db   :  { %2839 = vmatpush1.bf16.msra.mxu0 %v4401_v52  ;;  %2921 = vmatpush1.bf16.msra.mxu1 %v4403_v53  ;;  %v1364_v52 = vld [vmem:[#allocation14 + $0x3a0] sm:$0xff]  ;;  %v1361_v53 = vld [vmem:[#allocation14 + $0x388] sm:$0xff] }
 0x2dc   :  { %2840 = vmatprep.subr.bf16.mxu0 %v4410_v56  ;;  %2922 = vmatprep.subr.bf16.mxu1 %v4412_v60  ;;  %v4466_v54 = vcombine.high %v1360_v51, %v1364_v52  ;;  %v4465_v47 = vcombine.low %v1360_v51, %v1364_v52  ;;  %v4467_v45 = vcombine.low %v1361_v53, %v1365_v55 }
 0x2dd   :  { %v4468_v56 = vcombine.high %v1361_v53, %v1365_v55 }
 0x2df   :  { %2841 = vmatpush1.bf16.msra.mxu0 %v4409_v58  ;;  %2923 = vmatpush1.bf16.msra.mxu1 %v4411_v59  ;;  %v1372_v58 = vld [vmem:[#allocation14 + $0x3e0] sm:$0xff]  ;;  %v1369_v59 = vld [vmem:[#allocation14 + $0x3c8] sm:$0xff] }
 0x2e0   :  { %2842 = vmatprep.subr.bf16.mxu0 %v4418_v0  ;;  %2924 = vmatprep.subr.bf16.mxu1 %v4420_v4  ;;  %v4473_v60 = vcombine.low %v1368_v57, %v1372_v58  ;;  %v4474_v61 = vcombine.high %v1368_v57, %v1372_v58  ;;  %v4475_v63 = vcombine.low %v1369_v59, %v1373_v62 }
 0x2e1   :  { %v4476_v0 = vcombine.high %v1369_v59, %v1373_v62 }
 0x2e3   :  { %2843 = vmatpush1.bf16.msra.mxu0 %v4417_v2  ;;  %2925 = vmatpush1.bf16.msra.mxu1 %v4419_v3  ;;  %v5557_v2 = vld [vmem:[#allocation14 + $0x420] sm:$0xff]  ;;  %v5559_v3 = vld [vmem:[#allocation14 + $0x408] sm:$0xff] }
 0x2e4   :  { %2844 = vmatprep.subr.bf16.mxu0 %v4426_v8  ;;  %2926 = vmatprep.subr.bf16.mxu1 %v4428_v12  ;;  %v4482_v4 = vcombine.high %v5555_v1, %v5557_v2  ;;  %v4481_v6 = vcombine.low %v5555_v1, %v5557_v2  ;;  %v4483_v7 = vcombine.low %v5559_v3, %v5563_v5 }
 0x2e5   :  { %v4484_v8 = vcombine.high %v5559_v3, %v5563_v5 }
 0x2e7   :  { %2845 = vmatpush1.bf16.msra.mxu0 %v4425_v10  ;;  %2927 = vmatpush1.bf16.msra.mxu1 %v4427_v11  ;;  %v616_v10 = vld [vmem:[%s5852_s8] sm:$0xf]  ;;  %v5578_v11 = vsub.s32 3, %v5534_v38 }
 0x2e8   :  { %2846 = vmatprep.subr.bf16.mxu0 %v4434_v16  ;;  %2928 = vmatprep.subr.bf16.mxu1 %v4436_v20  ;;  %v621_v12 = vrot.slane %v616_v10, %v5537_v39  ;;  %v629_v13 = vrot.slane %v616_v10, %v5572_v9  ;;  %v625_v14 = vrot.slane %v616_v10, %v5540_v41 }
 0x2e9   :  { %v633_v15 = vrot.slane %v616_v10, %v5578_v11 }
 0x2eb   :  { %2847 = vmatpush1.bf16.msra.mxu0 %v4433_v18  ;;  %2929 = vmatpush1.bf16.msra.mxu1 %v4435_v19 }
 0x2ec   :  { %2848 = vmatprep.subr.bf16.mxu0 %v4442_v24  ;;  %2930 = vmatprep.subr.bf16.mxu1 %v4444_v29 }
 0x2ef   :  { %2849 = vmatpush1.bf16.msra.mxu0 %v4441_v27  ;;  %2931 = vmatpush1.bf16.msra.mxu1 %v4443_v28 }
 0x2f0   :  { %2850 = vmatprep.subr.bf16.mxu0 %v4450_v33  ;;  %2932 = vmatprep.subr.bf16.mxu1 %v4452_v37 }
 0x2f3   :  { %2851 = vmatpush1.bf16.msra.mxu0 %v4449_v35  ;;  %2933 = vmatpush1.bf16.msra.mxu1 %v4451_v36 }
 0x2f4   :  { %2852 = vmatprep.subr.bf16.mxu0 %v4458_v44  ;;  %2934 = vmatprep.subr.bf16.mxu1 %v4460_v50 }
 0x2f7   :  { %2853 = vmatpush1.bf16.msra.mxu0 %v4457_v48  ;;  %2935 = vmatpush1.bf16.msra.mxu1 %v4459_v49 }
 0x2f8   :  { %2854 = vmatprep.subr.bf16.mxu0 %v4466_v54  ;;  %2936 = vmatprep.subr.bf16.mxu1 %v4468_v56 }
 0x2fb   :  { %2855 = vmatpush1.bf16.msra.mxu0 %v4465_v47  ;;  %2937 = vmatpush1.bf16.msra.mxu1 %v4467_v45 }
 0x2fc   :  { %2856 = vmatprep.subr.bf16.mxu0 %v4474_v61  ;;  %2938 = vmatprep.subr.bf16.mxu1 %v4476_v0 }
 0x2ff   :  { %2857 = vmatpush1.bf16.msra.mxu0 %v4473_v60  ;;  %2939 = vmatpush1.bf16.msra.mxu1 %v4475_v63 }
 0x300   :  { %2867 = vmatprep.subr.bf16.mxu0 %v4482_v4  ;;  %2949 = vmatprep.subr.bf16.mxu1 %v4484_v8 }
 0x395   :  { %v992_v16 = vpop.f32.mrb[4].mxu0  ;;  %v1033_v17 = vpop.f32.mrb[4].mxu1 }
 0x396   :  { %v5584_v18 = vadd.f32 %v992_v16, %v621_v12  ;;  %v5586_v19 = vadd.f32 %v1033_v17, %v629_v13  ;;  %v994_v20 = vpop.f32.mrb[5].mxu0  ;;  %v1035_v21 = vpop.f32.mrb[5].mxu1 }
 0x397   :  { %v5588_v22 = vadd.f32 %v994_v20, %v625_v14  ;;  %v5590_v23 = vadd.f32 %v1035_v21, %v633_v15  ;;  %v996_v24 = vpop.f32.mrb[6].mxu0  ;;  %v1037_v25 = vpop.f32.mrb[6].mxu1 }
 0x398   :  { %v1040_v27 = vrot.slane %v5584_v18, 4  ;;  %v1068_v28 = vmul.f32 %v5584_v18, %v5584_v18  ;;  %v1052_v29 = vrot.slane %v5586_v19, 4  ;;  %v1070_v30 = vmul.f32 %v5586_v19, %v5586_v19  ;;  %v997_v31 = vpop.f32.mrb[7].mxu0  ;;  %v1038_v32 = vpop.f32.mrb[7].mxu1 }
 0x399   :  { %v1046_v33 = vrot.slane %v5588_v22, 4  ;;  %v1069_v34 = vmul.f32 %v5588_v22, %v5588_v22  ;;  %v1058_v35 = vrot.slane %v5590_v23, 4  ;;  %v1071_v36 = vmul.f32 %v5590_v23, %v5590_v23 }
 0x39a   :  { %v1041_v37 = vadd.f32 %v1040_v27, %v5584_v18  ;;  %v1072_v40 = vrot.slane %v1068_v28, 4  ;;  %v1053_v42 = vadd.f32 %v1052_v29, %v5586_v19  ;;  %v1084_v43 = vrot.slane %v1070_v30, 4 }
 0x39b   :  { %v1047_v44 = vadd.f32 %v1046_v33, %v5588_v22  ;;  %v1078_v46 = vrot.slane %v1069_v34, 4  ;;  %v1059_v48 = vadd.f32 %v1058_v35, %v5590_v23  ;;  %v1090_v49 = vrot.slane %v1071_v36, 4 }
 0x39c   :  { %v1042_v50 = vrot.slane %v1041_v37, 2  ;;  %v1073_v51 = vadd.f32 %v1072_v40, %v1068_v28  ;;  %v1054_v52 = vrot.slane %v1053_v42, 2  ;;  %v1085_v53 = vadd.f32 %v1084_v43, %v1070_v30 }
 0x39d   :  { %v1048_v54 = vrot.slane %v1047_v44, 2  ;;  %v1079_v55 = vadd.f32 %v1078_v46, %v1069_v34  ;;  %v1060_v47 = vrot.slane %v1059_v48, 2  ;;  %v1091_v45 = vadd.f32 %v1090_v49, %v1071_v36 }
 0x39e   :  { %v1043_v56 = vadd.f32 %v1042_v50, %v1041_v37  ;;  %v1074_v57 = vrot.slane %v1073_v51, 2  ;;  %v1055_v58 = vadd.f32 %v1054_v52, %v1053_v42  ;;  %v1086_v59 = vrot.slane %v1085_v53, 2 }
 0x39f   :  { %v1049_v60 = vadd.f32 %v1048_v54, %v1047_v44  ;;  %v1080_v61 = vrot.slane %v1079_v55, 2  ;;  %v1061_v62 = vadd.f32 %v1060_v47, %v1059_v48  ;;  %v1092_v63 = vrot.slane %v1091_v45, 2 }
 0x3a0   :  { %v1044_v0 = vrot.slane %v1043_v56, 1  ;;  %v1075_v4 = vadd.f32 %v1074_v57, %v1073_v51  ;;  %v1056_v8 = vrot.slane %v1055_v58, 1  ;;  %v1087_v10 = vadd.f32 %v1086_v59, %v1085_v53 }
 0x3a1   :  { %v1050_v12 = vrot.slane %v1049_v60, 1  ;;  %v1081_v13 = vadd.f32 %v1080_v61, %v1079_v55  ;;  %v1062_v14 = vrot.slane %v1061_v62, 1  ;;  %v1093_v15 = vadd.f32 %v1092_v63, %v1091_v45 }
 0x3a2   :  { %v1045_v16 = vadd.f32 %v1044_v0, %v1043_v56  ;;  %v1076_v17 = vrot.slane %v1075_v4, 1  ;;  %v1057_v20 = vadd.f32 %v1056_v8, %v1055_v58  ;;  %v1088_v21 = vrot.slane %v1087_v10, 1 }
 0x3a3   :  { %v1051_v24 = vadd.f32 %v1050_v12, %v1049_v60  ;;  %v1082_v25 = vrot.slane %v1081_v13, 1  ;;  %v1063_v27 = vadd.f32 %v1062_v14, %v1061_v62  ;;  %v1094_v28 = vrot.slane %v1093_v15, 1 }
 0x3a4   :  { %v1064_v29 = vmul.f32 0.125, %v1045_v16  ;;  %v1077_v30 = vadd.f32 %v1076_v17, %v1075_v4  ;;  %v1066_v31 = vmul.f32 0.125, %v1057_v20  ;;  %v1089_v32 = vadd.f32 %v1088_v21, %v1087_v10  ;;  %v1108_v4 = vld [vmem:[%s5853_s9] sm:$0xf] }
 0x3a5   :  { %v1065_v33 = vmul.f32 0.125, %v1051_v24  ;;  %v1083_v34 = vadd.f32 %v1082_v25, %v1081_v13  ;;  %v1067_v35 = vmul.f32 0.125, %v1063_v27  ;;  %v1095_v36 = vadd.f32 %v1094_v28, %v1093_v15 }
 0x3a6   :  { %v1096_v37 = vmul.f32 0.125, %v1077_v30  ;;  %v1100_v40 = vmul.f32 %v1064_v29, %v1064_v29  ;;  %v1098_v42 = vmul.f32 0.125, %v1089_v32  ;;  %v1102_v43 = vmul.f32 %v1066_v31, %v1066_v31 }
 0x3a7   :  { %v1097_v44 = vmul.f32 0.125, %v1083_v34  ;;  %v1101_v46 = vmul.f32 %v1065_v33, %v1065_v33  ;;  %v1099_v48 = vmul.f32 0.125, %v1095_v36  ;;  %v1103_v49 = vmul.f32 %v1067_v35, %v1067_v35 }
 0x3a8   :  { %v1104_v50 = vsub.f32 %v1096_v37, %v1100_v40  ;;  %v1106_v51 = vsub.f32 %v1098_v42, %v1102_v43 }
 0x3a9   :  { %v1105_v52 = vsub.f32 %v1097_v44, %v1101_v46  ;;  %v1107_v53 = vsub.f32 %v1099_v48, %v1103_v49  ;;  %v1384_v49 = vld [vmem:[#allocation14 + $0x440] sm:$0xff] }
 0x3aa   :  { %v1109_v54 = vadd.f32 0.8, %v1104_v50  ;;  %v1111_v55 = vadd.f32 0.8, %v1106_v51 }
 0x3ab   :  { %v1110_v47 = vadd.f32 0.8, %v1105_v52  ;;  %v1112_v45 = vadd.f32 0.8, %v1107_v53  ;;  %v1388_v52 = vld [vmem:[#allocation14 + $0x460] sm:$0xff]  ;;  %v1385_v53 = vld [vmem:[#allocation14 + $0x448] sm:$0xff] }
 0x3ac   :  { %5033 = vrsqrt.f32 %v1109_v54  ;;  %v1389_v54 = vld [vmem:[#allocation14 + $0x468] sm:$0xff] }
 0x3ad   :  { %5035 = vrsqrt.f32 %v1111_v55 }
 0x3ae   :  { %5037 = vrsqrt.f32 %v1110_v47 }
 0x3af   :  { %5039 = vrsqrt.f32 %v1112_v45 }
 0x3b6   :  { %v5034_v56 = vpop.eup %5033 }
 0x3b7   :  { %v5036_v57 = vpop.eup %5035 }
 0x3b8   :  { %v5038_v58 = vpop.eup %5037 }
 0x3b9   :  { %v5040_v59 = vpop.eup %5039  ;;  %v1121_v60 = vcombine.low %v5034_v56, %v5038_v58  ;;  %v1392_v56 = vld [vmem:[#allocation14 + $0x480] sm:$0xff]  ;;  %v4492_v58 = vcombine.high %v1385_v53, %v1389_v54 }
 0x3ba   :  { %v1122_v61 = vcombine.low %v5036_v57, %v5040_v59  ;;  %v4490_v57 = vcombine.high %v1384_v49, %v1388_v52  ;;  %v1396_v59 = vld [vmem:[#allocation14 + $0x4a0] sm:$0xff] }
 0x3bb   :  { %v1129_v62 = vrot.slane %v1121_v60, %v5545_v26  ;;  %v1393_v60 = vld [vmem:[#allocation14 + $0x488] sm:$0xff]  ;;  %v4497_v1 = vcombine.low %v1392_v56, %v1396_v59 }
 0x3bc   :  { %v1136_v63 = vrot.slane %v1122_v61, %v5545_v26  ;;  %v1397_v61 = vld [vmem:[#allocation14 + $0x4a8] sm:$0xff] }
 0x3bd   :  { %v4499_v2 = vcombine.low %v1393_v60, %v1397_v61 }
 0x3be   :  { %v1137_v0 = vcombine.low %v1129_v62, %v1136_v63  ;;  %v4489_v63 = vcombine.low %v1384_v49, %v1388_v52  ;;  %v1440_v52 = vld [vmem:[#allocation14 + $0x600] sm:$0xff] }
 0x3c0   :  { %v1144_v8 = vrot.slane %v1137_v0, %v5545_v26  ;;  %v4491_v0 = vcombine.low %v1385_v53, %v1389_v54  ;;  %v1444_v53 = vld [vmem:[#allocation14 + $0x620] sm:$0xff]  ;;  %v1441_v54 = vld [vmem:[#allocation14 + $0x608] sm:$0xff] }
 0x3c2   :  { %v1146_v10 = vmul.f32 %v1144_v8, %v1108_v4  ;;  %v4498_v4 = vcombine.high %v1392_v56, %v1396_v59  ;;  %v4500_v8 = vcombine.high %v1393_v60, %v1397_v61  ;;  %v1448_v60 = vld [vmem:[#allocation14 + $0x640] sm:$0xff] }
 0x3c3   :  { %v1452_v61 = vld [vmem:[#allocation14 + $0x660] sm:$0xff] }
 0x3c4   :  { %v1152_v12 = vrot.slane %v1146_v10, %v5537_v39  ;;  %v1156_v13 = vrot.slane %v1146_v10, %v5540_v41  ;;  %v1160_v14 = vrot.slane %v1146_v10, %v5572_v9  ;;  %v1164_v15 = vrot.slane %v1146_v10, %v5578_v11  ;;  %v1400_v10 = vld [vmem:[#allocation14 + $0x4c0] sm:$0xff] }
 0x3c6   :  { %v1169_v16 = vmul.f32 %v1152_v12, %v1064_v29  ;;  %v1170_v17 = vmul.f32 %v1156_v13, %v1065_v33  ;;  %v1171_v20 = vmul.f32 %v1160_v14, %v1066_v31  ;;  %v1172_v21 = vmul.f32 %v1164_v15, %v1067_v35  ;;  %v1147_v29 = vld [vmem:[%s5854_s10] sm:$0xf] }
 0x3c7   :  { %v1206_v24 = vmul.f32 %v1164_v15, %v5590_v23  ;;  %v1204_v25 = vmul.f32 %v1156_v13, %v5588_v22  ;;  %v1203_v27 = vmul.f32 %v1152_v12, %v5584_v18  ;;  %v1205_v28 = vmul.f32 %v1160_v14, %v5586_v19  ;;  %v1404_v12 = vld [vmem:[#allocation14 + $0x4e0] sm:$0xff]  ;;  %v1401_v13 = vld [vmem:[#allocation14 + $0x4c8] sm:$0xff] }
 0x3c8   :  { %v1177_v30 = vcombine.low %v1169_v16, %v1170_v17  ;;  %v1178_v32 = vcombine.low %v1171_v20, %v1172_v21  ;;  %v1405_v14 = vld [vmem:[#allocation14 + $0x4e8] sm:$0xff]  ;;  %v4506_v3 = vcombine.high %v1400_v10, %v1404_v12  ;;  %v4505_v17 = vcombine.low %v1400_v10, %v1404_v12 }
 0x3c9   :  { %v4508_v5 = vcombine.high %v1401_v13, %v1405_v14  ;;  %v1409_v15 = vld [vmem:[#allocation14 + $0x508] sm:$0xff]  ;;  %v4507_v20 = vcombine.low %v1401_v13, %v1405_v14  ;;  %v4554_v10 = vcombine.high %v1448_v60, %v1452_v61  ;;  %v1456_v13 = vld [vmem:[#allocation14 + $0x680] sm:$0xff] }
 0x3ca   :  { %v1185_v34 = vrot.slane %v1177_v30, %v5545_v26  ;;  %v1192_v36 = vrot.slane %v1178_v32, %v5545_v26  ;;  %v1413_v16 = vld [vmem:[#allocation14 + $0x528] sm:$0xff]  ;;  %v1460_v14 = vld [vmem:[#allocation14 + $0x6a0] sm:$0xff] }
 0x3cb   :  { %v1421_v30 = vld [vmem:[#allocation14 + $0x568] sm:$0xff] }
 0x3cc   :  { %v1193_v37 = vcombine.low %v1185_v34, %v1192_v36  ;;  %v4515_v34 = vcombine.low %v1409_v15, %v1413_v16 }
 0x3ce   :  { %v1200_v31 = vrot.slane %v1193_v37, %v5545_v26 }
 0x3d0   :  { %v1202_v23 = vsub.f32 %v1147_v29, %v1200_v31  ;;  %v1424_v29 = vld [vmem:[#allocation14 + $0x580] sm:$0xff] }
 0x3d1   :  { %v1428_v31 = vld [vmem:[#allocation14 + $0x5a0] sm:$0xff] }
 0x3d2   :  { %v1223_v22 = vrot.slane %v1202_v23, %v5578_v11  ;;  %v1215_v18 = vrot.slane %v1202_v23, %v5540_v41  ;;  %v1211_v19 = vrot.slane %v1202_v23, %v5537_v39  ;;  %v1219_v33 = vrot.slane %v1202_v23, %v5572_v9  ;;  %v1425_v23 = vld [vmem:[#allocation14 + $0x588] sm:$0xff] }
 0x3d4   :  { %v1231_v35 = vadd.f32 %v1223_v22, %v1206_v24  ;;  %v1229_v40 = vadd.f32 %v1215_v18, %v1204_v25  ;;  %v1228_v42 = vadd.f32 %v1211_v19, %v1203_v27  ;;  %v5632_v43 = vadd.f32 %v1219_v33, %v1205_v28  ;;  %v1416_v25 = vld [vmem:[#allocation14 + $0x540] sm:$0xff]  ;;  %v1417_v28 = vld [vmem:[#allocation14 + $0x548] sm:$0xff] }
 0x3d5   :  { %v4516_v24 = vcombine.high %v1409_v15, %v1413_v16  ;;  %v1420_v27 = vld [vmem:[#allocation14 + $0x560] sm:$0xff]  ;;  %v4524_v37 = vcombine.high %v1417_v28, %v1421_v30  ;;  %v1429_v22 = vld [vmem:[#allocation14 + $0x5a8] sm:$0xff]  ;;  %v4523_v19 = vcombine.low %v1417_v28, %v1421_v30  ;;  %v4530_v33 = vcombine.high %v1424_v29, %v1428_v31 }
 0x3d6   :  { %vm1233_vm4 = vcmp.gt.f32.partialorder %v1229_v40, 0.0  ;;  %v1237_v44 = vmul.f32 0.2, %v1229_v40  ;;  %vm1232_vm5 = vcmp.gt.f32.partialorder %v1228_v42, 0.0  ;;  %v1236_v46 = vmul.f32 0.2, %v1228_v42 }
 0x3d7   :  { %vm1235_vm6 = vcmp.gt.f32.partialorder %v1231_v35, 0.0  ;;  %v1239_v48 = vmul.f32 0.2, %v1231_v35  ;;  %v4522_v36 = vcombine.high %v1416_v25, %v1420_v27  ;;  %v4521_v18 = vcombine.low %v1416_v25, %v1420_v27  ;;  %v1464_v15 = vld [vmem:[#allocation14 + $0x6c0] sm:$0xff] }
 0x3d8   :  { %v1241_v50 = vsel %vm1233_vm4, %v1229_v40, %v1237_v44  ;;  %v1240_v51 = vsel %vm1232_vm5, %v1228_v42, %v1236_v46  ;;  %v1432_v40 = vld [vmem:[#allocation14 + $0x5c0] sm:$0xff]  ;;  %v1433_v44 = vld [vmem:[#allocation14 + $0x5c8] sm:$0xff]  ;;  %v4531_v49 = vcombine.low %v1425_v23, %v1429_v22  ;;  %vm1234_vm7 = vcmp.gt.f32.partialorder %v5632_v43, 0.0 }
 0x3d9   :  { %v5634_v55 = vpack.c.bf16 %v1241_v50, %v1241_v50  ;;  %v5636_v47 = vpack.c.bf16 %v1240_v51, %v1240_v51  ;;  %v1243_v45 = vsel %vm1235_vm6, %v1231_v35, %v1239_v48  ;;  %v4532_v35 = vcombine.high %v1425_v23, %v1429_v22  ;;  %v1436_v42 = vld [vmem:[#allocation14 + $0x5e0] sm:$0xff]  ;;  %v1437_v46 = vld [vmem:[#allocation14 + $0x5e8] sm:$0xff] }
 0x3da   :  { %v5642_v62 = vpack.c.bf16 %v1243_v45, %v1243_v45  ;;  %v4529_v48 = vcombine.low %v1424_v29, %v1428_v31  ;;  %v4538_v50 = vcombine.high %v1432_v40, %v1436_v42  ;;  %v4540_v51 = vcombine.high %v1433_v44, %v1437_v46  ;;  %v1445_v45 = vld [vmem:[#allocation14 + $0x628] sm:$0xff]  ;;  %v1468_v16 = vld [vmem:[#allocation14 + $0x6e0] sm:$0xff] }
 0x3db   :  { %2858 = vmatprep.mubr.bf16.mxu0 %v5634_v55  ;;  %2940 = vmatprep.mubr.bf16.mxu1 %v5634_v55  ;;  %v4537_v56 = vcombine.low %v1432_v40, %v1436_v42  ;;  %v4548_v59 = vcombine.high %v1441_v54, %v1445_v45  ;;  %v4570_v25 = vcombine.high %v1464_v15, %v1468_v16  ;;  %v1472_v28 = vld [vmem:[#allocation14 + $0x700] sm:$0xff] }
 0x3dc   :  { %2859 = vmatmul.mubr.bf16.vlgmr.msra.gmra.mrb[8].mxu0 %v5636_v47  ;;  %2941 = vmatmul.mubr.bf16.vlgmr.msra.gmra.mrb[8].mxu1 %v5636_v47  ;;  %v1476_v30 = vld [vmem:[#allocation14 + $0x720] sm:$0xff] }
 0x3dd   :  { %2868 = vmatpush1.bf16.msra.mxu0 %v4481_v6  ;;  %2950 = vmatpush1.bf16.msra.mxu1 %v4483_v7  ;;  %v1408_v6 = vld [vmem:[#allocation14 + $0x500] sm:$0xff]  ;;  %v4578_v29 = vcombine.high %v1472_v28, %v1476_v30 }
 0x3de   :  { %2899 = vmatprep.mubr.bf16.mxu0 %v5642_v62  ;;  %2981 = vmatprep.mubr.bf16.mxu1 %v5642_v62  ;;  %v1412_v7 = vld [vmem:[#allocation14 + $0x520] sm:$0xff] }
 0x3df   :  { %2869 = vmatprep.subr.bf16.mxu0 %v4490_v57  ;;  %2951 = vmatprep.subr.bf16.mxu1 %v4492_v58  ;;  %v4514_v21 = vcombine.high %v1408_v6, %v1412_v7  ;;  %v4513_v32 = vcombine.low %v1408_v6, %v1412_v7  ;;  %v4539_v57 = vcombine.low %v1433_v44, %v1437_v46  ;;  %v1480_v23 = vld [vmem:[#allocation14 + $0x740] sm:$0xff] }
 0x3e0   :  { %v4546_v58 = vcombine.high %v1440_v52, %v1444_v53  ;;  %v4562_v6 = vcombine.high %v1456_v13, %v1460_v14  ;;  %v1484_v22 = vld [vmem:[#allocation14 + $0x760] sm:$0xff] }
 0x3e1   :  { %2870 = vmatpush1.bf16.msra.mxu0 %v4489_v63  ;;  %2952 = vmatpush1.bf16.msra.mxu1 %v4491_v0  ;;  %v1449_v63 = vld [vmem:[#allocation14 + $0x648] sm:$0xff]  ;;  %v4586_v40 = vcombine.high %v1480_v23, %v1484_v22  ;;  %v1488_v44 = vld [vmem:[#allocation14 + $0x780] sm:$0xff] }
 0x3e2   :  { %2871 = vmatprep.subr.bf16.mxu0 %v4498_v4  ;;  %2953 = vmatprep.subr.bf16.mxu1 %v4500_v8  ;;  %v1453_v0 = vld [vmem:[#allocation14 + $0x668] sm:$0xff]  ;;  %v4545_v4 = vcombine.low %v1440_v52, %v1444_v53  ;;  %v4547_v8 = vcombine.low %v1441_v54, %v1445_v45  ;;  %v1492_v46 = vld [vmem:[#allocation14 + $0x7a0] sm:$0xff] }
 0x3e3   :  { %v4556_v12 = vcombine.high %v1449_v63, %v1453_v0  ;;  %v4594_v52 = vcombine.high %v1488_v44, %v1492_v46  ;;  %v1496_v54 = vld [vmem:[#allocation14 + $0x7c0] sm:$0xff] }
 0x3e4   :  { %v1500_v45 = vld [vmem:[#allocation14 + $0x7e0] sm:$0xff] }
 0x3e5   :  { %2872 = vmatpush1.bf16.msra.mxu0 %v4497_v1  ;;  %2954 = vmatpush1.bf16.msra.mxu1 %v4499_v2  ;;  %v1457_v1 = vld [vmem:[#allocation14 + $0x688] sm:$0xff] }
 0x3e6   :  { %2873 = vmatprep.subr.bf16.mxu0 %v4506_v3  ;;  %2955 = vmatprep.subr.bf16.mxu1 %v4508_v5  ;;  %v1461_v2 = vld [vmem:[#allocation14 + $0x6a8] sm:$0xff]  ;;  %v4553_v3 = vcombine.low %v1448_v60, %v1452_v61  ;;  %v4555_v5 = vcombine.low %v1449_v63, %v1453_v0  ;;  %v4602_v60 = vcombine.high %v1496_v54, %v1500_v45  ;;  %v1250_v63 = vld [vmem:[#allocation14 + $0x10] sm:$0xff]  ;;  %v1238_v0 = vmul.f32 0.2, %v5632_v43 }
 0x3e7   :  { %v4564_v7 = vcombine.high %v1457_v1, %v1461_v2 }
 0x3e9   :  { %2874 = vmatpush1.bf16.msra.mxu0 %v4505_v17  ;;  %2956 = vmatpush1.bf16.msra.mxu1 %v4507_v20  ;;  %v1465_v17 = vld [vmem:[#allocation14 + $0x6c8] sm:$0xff] }
 0x3ea   :  { %2875 = vmatprep.subr.bf16.mxu0 %v4514_v21  ;;  %2957 = vmatprep.subr.bf16.mxu1 %v4516_v24  ;;  %v1469_v20 = vld [vmem:[#allocation14 + $0x6e8] sm:$0xff]  ;;  %v4561_v21 = vcombine.low %v1456_v13, %v1460_v14  ;;  %v4563_v24 = vcombine.low %v1457_v1, %v1461_v2  ;;  %v1242_v2 = vsel %vm1234_vm7, %v5632_v43, %v1238_v0  ;;  %v1267_v43 = vld [vmem:[#allocation14 + $0x98] sm:$0xff] }
 0x3eb   :  { %v4572_v27 = vcombine.high %v1465_v17, %v1469_v20 }
 0x3ed   :  { %2876 = vmatpush1.bf16.msra.mxu0 %v4513_v32  ;;  %2958 = vmatpush1.bf16.msra.mxu1 %v4515_v34  ;;  %v1473_v32 = vld [vmem:[#allocation14 + $0x708] sm:$0xff] }
 0x3ee   :  { %2877 = vmatprep.subr.bf16.mxu0 %v4522_v36  ;;  %2959 = vmatprep.subr.bf16.mxu1 %v4524_v37  ;;  %v1477_v34 = vld [vmem:[#allocation14 + $0x728] sm:$0xff]  ;;  %v4569_v36 = vcombine.low %v1464_v15, %v1468_v16  ;;  %v4571_v37 = vcombine.low %v1465_v17, %v1469_v20  ;;  %v5655_v16 = vpack.c.bf16 %v1242_v2, %v1242_v2 }
 0x3ef   :  { %v4580_v31 = vcombine.high %v1473_v32, %v1477_v34 }
 0x3f1   :  { %2878 = vmatpush1.bf16.msra.mxu0 %v4521_v18  ;;  %2960 = vmatpush1.bf16.msra.mxu1 %v4523_v19  ;;  %v1481_v18 = vld [vmem:[#allocation14 + $0x748] sm:$0xff] }
 0x3f2   :  { %2879 = vmatprep.subr.bf16.mxu0 %v4530_v33  ;;  %2961 = vmatprep.subr.bf16.mxu1 %v4532_v35  ;;  %v1485_v19 = vld [vmem:[#allocation14 + $0x768] sm:$0xff]  ;;  %v4577_v33 = vcombine.low %v1472_v28, %v1476_v30  ;;  %v4579_v35 = vcombine.low %v1473_v32, %v1477_v34 }
 0x3f3   :  { %v4588_v42 = vcombine.high %v1481_v18, %v1485_v19 }
 0x3f5   :  { %2880 = vmatpush1.bf16.msra.mxu0 %v4529_v48  ;;  %2962 = vmatpush1.bf16.msra.mxu1 %v4531_v49  ;;  %v1489_v48 = vld [vmem:[#allocation14 + $0x788] sm:$0xff] }
 0x3f6   :  { %2881 = vmatprep.subr.bf16.mxu0 %v4538_v50  ;;  %2963 = vmatprep.subr.bf16.mxu1 %v4540_v51  ;;  %v1493_v49 = vld [vmem:[#allocation14 + $0x7a8] sm:$0xff]  ;;  %v4585_v50 = vcombine.low %v1480_v23, %v1484_v22  ;;  %v4587_v51 = vcombine.low %v1481_v18, %v1485_v19 }
 0x3f7   :  { %v4596_v53 = vcombine.high %v1489_v48, %v1493_v49 }
 0x3f9   :  { %2882 = vmatpush1.bf16.msra.mxu0 %v4537_v56  ;;  %2964 = vmatpush1.bf16.msra.mxu1 %v4539_v57  ;;  %v1497_v56 = vld [vmem:[#allocation14 + $0x7c8] sm:$0xff] }
 0x3fa   :  { %2883 = vmatprep.subr.bf16.mxu0 %v4546_v58  ;;  %2965 = vmatprep.subr.bf16.mxu1 %v4548_v59  ;;  %v1501_v57 = vld [vmem:[#allocation14 + $0x7e8] sm:$0xff]  ;;  %v4593_v58 = vcombine.low %v1488_v44, %v1492_v46  ;;  %v4595_v59 = vcombine.low %v1489_v48, %v1493_v49  ;;  %v1290_v49 = vld [vmem:[#allocation14 + $0x150] sm:$0xff] }
 0x3fb   :  { %v4604_v61 = vcombine.high %v1497_v56, %v1501_v57  ;;  %v4603_v13 = vcombine.low %v1497_v56, %v1501_v57  ;;  %v1298_v57 = vld [vmem:[#allocation14 + $0x190] sm:$0xff] }
 0x3fd   :  { %2884 = vmatpush1.bf16.msra.mxu0 %v4545_v4  ;;  %2966 = vmatpush1.bf16.msra.mxu1 %v4547_v8  ;;  %v1254_v4 = vld [vmem:[#allocation14 + $0x30] sm:$0xff]  ;;  %v1251_v8 = vld [vmem:[#allocation14 + $0x18] sm:$0xff] }
 0x3fe   :  { %2885 = vmatprep.subr.bf16.mxu0 %v4554_v10  ;;  %2967 = vmatprep.subr.bf16.mxu1 %v4556_v12  ;;  %v1255_v10 = vld [vmem:[#allocation14 + $0x38] sm:$0xff]  ;;  %v4601_v12 = vcombine.low %v1496_v54, %v1500_v45  ;;  %v4358_v14 = vcombine.high %v1250_v63, %v1254_v4  ;;  %v4357_v15 = vcombine.low %v1250_v63, %v1254_v4 }
 0x3ff   :  { %v4360_v1 = vcombine.high %v1251_v8, %v1255_v10  ;;  %v4359_v17 = vcombine.low %v1251_v8, %v1255_v10  ;;  %v1306_v8 = vld [vmem:[#allocation14 + $0x1d0] sm:$0xff] }
 0x400   :  { %v1310_v10 = vld [vmem:[#allocation14 + $0x1f0] sm:$0xff] }
 0x401   :  { %2886 = vmatpush1.bf16.msra.mxu0 %v4553_v3  ;;  %2968 = vmatpush1.bf16.msra.mxu1 %v4555_v5  ;;  %v1258_v3 = vld [vmem:[#allocation14 + $0x50] sm:$0xff]  ;;  %v4414_v2 = vcombine.high %v1306_v8, %v1310_v10 }
 0x402   :  { %2887 = vmatprep.subr.bf16.mxu0 %v4562_v6  ;;  %2969 = vmatprep.subr.bf16.mxu1 %v4564_v7  ;;  %v1262_v5 = vld [vmem:[#allocation14 + $0x70] sm:$0xff]  ;;  %v1259_v6 = vld [vmem:[#allocation14 + $0x58] sm:$0xff] }
 0x403   :  { %v1263_v7 = vld [vmem:[#allocation14 + $0x78] sm:$0xff]  ;;  %v4366_v20 = vcombine.high %v1258_v3, %v1262_v5  ;;  %v4365_v28 = vcombine.low %v1258_v3, %v1262_v5  ;;  %v1314_v5 = vld [vmem:[#allocation14 + $0x210] sm:$0xff] }
 0x404   :  { %v4367_v30 = vcombine.low %v1259_v6, %v1263_v7 }
 0x405   :  { %2888 = vmatpush1.bf16.msra.mxu0 %v4561_v21  ;;  %2970 = vmatpush1.bf16.msra.mxu1 %v4563_v24  ;;  %v4368_v21 = vcombine.high %v1259_v6, %v1263_v7  ;;  %v1266_v24 = vld [vmem:[#allocation14 + $0x90] sm:$0xff]  ;;  %v1315_v7 = vld [vmem:[#allocation14 + $0x218] sm:$0xff] }
 0x406   :  { %2889 = vmatprep.subr.bf16.mxu0 %v4570_v25  ;;  %2971 = vmatprep.subr.bf16.mxu1 %v4572_v27  ;;  %v1270_v25 = vld [vmem:[#allocation14 + $0xb0] sm:$0xff]  ;;  %v1271_v27 = vld [vmem:[#allocation14 + $0xb8] sm:$0xff] }
 0x407   :  { %v4374_v32 = vcombine.high %v1266_v24, %v1270_v25  ;;  %v4376_v34 = vcombine.high %v1267_v43, %v1271_v27  ;;  %v4373_v23 = vcombine.low %v1266_v24, %v1270_v25  ;;  %v4375_v22 = vcombine.low %v1267_v43, %v1271_v27  ;;  %v1318_v6 = vld [vmem:[#allocation14 + $0x230] sm:$0xff]  ;;  %v1323_v27 = vld [vmem:[#allocation14 + $0x258] sm:$0xff] }
 0x408   :  { %v1322_v25 = vld [vmem:[#allocation14 + $0x250] sm:$0xff] }
 0x409   :  { %2890 = vmatpush1.bf16.msra.mxu0 %v4569_v36  ;;  %2972 = vmatpush1.bf16.msra.mxu1 %v4571_v37  ;;  %v1274_v36 = vld [vmem:[#allocation14 + $0xd0] sm:$0xff] }
 0x40a   :  { %2891 = vmatprep.subr.bf16.mxu0 %v4578_v29  ;;  %2973 = vmatprep.subr.bf16.mxu1 %v4580_v31  ;;  %v1278_v37 = vld [vmem:[#allocation14 + $0xf0] sm:$0xff]  ;;  %v1275_v29 = vld [vmem:[#allocation14 + $0xd8] sm:$0xff] }
 0x40b   :  { %v1279_v31 = vld [vmem:[#allocation14 + $0xf8] sm:$0xff]  ;;  %v4382_v18 = vcombine.high %v1274_v36, %v1278_v37  ;;  %v1326_v43 = vld [vmem:[#allocation14 + $0x270] sm:$0xff] }
 0x40c   :  { %v4384_v19 = vcombine.high %v1275_v29, %v1279_v31  ;;  %v4383_v44 = vcombine.low %v1275_v29, %v1279_v31  ;;  %v1334_v29 = vld [vmem:[#allocation14 + $0x2b0] sm:$0xff]  ;;  %v1331_v31 = vld [vmem:[#allocation14 + $0x298] sm:$0xff] }
 0x40d   :  { %2892 = vmatpush1.bf16.msra.mxu0 %v4577_v33  ;;  %2974 = vmatpush1.bf16.msra.mxu1 %v4579_v35  ;;  %v1282_v33 = vld [vmem:[#allocation14 + $0x110] sm:$0xff] }
 0x40e   :  { %2893 = vmatprep.subr.bf16.mxu0 %v4586_v40  ;;  %2975 = vmatprep.subr.bf16.mxu1 %v4588_v42  ;;  %v1286_v35 = vld [vmem:[#allocation14 + $0x130] sm:$0xff]  ;;  %v1287_v40 = vld [vmem:[#allocation14 + $0x138] sm:$0xff]  ;;  %v4381_v42 = vcombine.low %v1274_v36, %v1278_v37 }
 0x40f   :  { %v4390_v46 = vcombine.high %v1282_v33, %v1286_v35  ;;  %v1330_v37 = vld [vmem:[#allocation14 + $0x290] sm:$0xff] }
 0x411   :  { %2894 = vmatpush1.bf16.msra.mxu0 %v4585_v50  ;;  %2976 = vmatpush1.bf16.msra.mxu1 %v4587_v51  ;;  %v1294_v50 = vld [vmem:[#allocation14 + $0x170] sm:$0xff]  ;;  %v1291_v51 = vld [vmem:[#allocation14 + $0x158] sm:$0xff] }
 0x412   :  { %2895 = vmatprep.subr.bf16.mxu0 %v4594_v52  ;;  %2977 = vmatprep.subr.bf16.mxu1 %v4596_v53  ;;  %v1295_v52 = vld [vmem:[#allocation14 + $0x178] sm:$0xff]  ;;  %v4389_v53 = vcombine.low %v1282_v33, %v1286_v35  ;;  %v4398_v45 = vcombine.high %v1290_v49, %v1294_v50  ;;  %v1338_v35 = vld [vmem:[#allocation14 + $0x2d0] sm:$0xff] }
 0x413   :  { %v4400_v56 = vcombine.high %v1291_v51, %v1295_v52  ;;  %v4399_v63 = vcombine.low %v1291_v51, %v1295_v52  ;;  %v1350_v51 = vld [vmem:[#allocation14 + $0x330] sm:$0xff]  ;;  %v1347_v52 = vld [vmem:[#allocation14 + $0x318] sm:$0xff] }
 0x415   :  { %2896 = vmatpush1.bf16.msra.mxu0 %v4593_v58  ;;  %2978 = vmatpush1.bf16.msra.mxu1 %v4595_v59  ;;  %v1302_v58 = vld [vmem:[#allocation14 + $0x1b0] sm:$0xff]  ;;  %v1299_v59 = vld [vmem:[#allocation14 + $0x198] sm:$0xff] }
 0x416   :  { %2897 = vmatprep.subr.bf16.mxu0 %v4602_v60  ;;  %2979 = vmatprep.subr.bf16.mxu1 %v4604_v61  ;;  %v1303_v60 = vld [vmem:[#allocation14 + $0x1b8] sm:$0xff]  ;;  %v4397_v61 = vcombine.low %v1290_v49, %v1294_v50  ;;  %v4406_v0 = vcombine.high %v1298_v57, %v1302_v58  ;;  %v1346_v50 = vld [vmem:[#allocation14 + $0x310] sm:$0xff] }
 0x417   :  { %v4408_v4 = vcombine.high %v1299_v59, %v1303_v60 }
 0x419   :  { %2898 = vmatpush1.bf16.msra.mxu0 %v4601_v12  ;;  %2980 = vmatpush1.bf16.msra.mxu1 %v4603_v13  ;;  %v1307_v12 = vld [vmem:[#allocation14 + $0x1d8] sm:$0xff] }
 0x41a   :  { %2990 = vmatprep.subr.bf16.mxu0 %v4358_v14  ;;  %3072 = vmatprep.subr.bf16.mxu1 %v4360_v1  ;;  %v1311_v13 = vld [vmem:[#allocation14 + $0x1f8] sm:$0xff]  ;;  %v4405_v14 = vcombine.low %v1298_v57, %v1302_v58  ;;  %v4407_v1 = vcombine.low %v1299_v59, %v1303_v60  ;;  %v1354_v58 = vld [vmem:[#allocation14 + $0x350] sm:$0xff] }
 0x41b   :  { %v4416_v3 = vcombine.high %v1307_v12, %v1311_v13  ;;  %v1358_v59 = vld [vmem:[#allocation14 + $0x370] sm:$0xff]  ;;  %v1355_v60 = vld [vmem:[#allocation14 + $0x358] sm:$0xff] }
 0x41c   :  { %2900 = vmatmul.mubr.bf16.vlgmr.msra.gmra.mrb[8].mxu0 %v5655_v16  ;;  %2982 = vmatmul.mubr.bf16.vlgmr.msra.gmra.mrb[8].mxu1 %v5655_v16 }
 0x41d   :  { %2991 = vmatpush1.bf16.msra.mxu0 %v4357_v15  ;;  %3022 = vmatprep.mubr.bf16.mxu0 %v5634_v55  ;;  %v1319_v15 = vld [vmem:[#allocation14 + $0x238] sm:$0xff] }
 0x41e   :  { %3073 = vmatpush1.bf16.msra.mxu1 %v4359_v17  ;;  %3104 = vmatprep.mubr.bf16.mxu1 %v5634_v55  ;;  %v1283_v55 = vld [vmem:[#allocation14 + $0x118] sm:$0xff]  ;;  %v4413_v17 = vcombine.low %v1306_v8, %v1310_v10  ;;  %v4424_v24 = vcombine.high %v1315_v7, %v1319_v15  ;;  %v1362_v10 = vld [vmem:[#allocation14 + $0x390] sm:$0xff] }
 0x41f   :  { %2992 = vmatprep.subr.bf16.mxu0 %v4366_v20  ;;  %3074 = vmatprep.subr.bf16.mxu1 %v4368_v21  ;;  %v4392_v48 = vcombine.high %v1283_v55, %v1287_v40  ;;  %v4391_v54 = vcombine.low %v1283_v55, %v1287_v40  ;;  %v4415_v20 = vcombine.low %v1307_v12, %v1311_v13  ;;  %v1342_v55 = vld [vmem:[#allocation14 + $0x2f0] sm:$0xff]  ;;  %v1339_v40 = vld [vmem:[#allocation14 + $0x2d8] sm:$0xff] }
 0x420   :  { %v4422_v21 = vcombine.high %v1314_v5, %v1318_v6  ;;  %v1366_v12 = vld [vmem:[#allocation14 + $0x3b0] sm:$0xff]  ;;  %v1363_v13 = vld [vmem:[#allocation14 + $0x398] sm:$0xff] }
 0x421   :  { %2993 = vmatpush1.bf16.msra.mxu0 %v4365_v28  ;;  %v1327_v28 = vld [vmem:[#allocation14 + $0x278] sm:$0xff] }
 0x422   :  { %3075 = vmatpush1.bf16.msra.mxu1 %v4367_v30  ;;  %2994 = vmatprep.subr.bf16.mxu0 %v4374_v32  ;;  %v4421_v30 = vcombine.low %v1314_v5, %v1318_v6  ;;  %v4423_v32 = vcombine.low %v1315_v7, %v1319_v15  ;;  %v4432_v36 = vcombine.high %v1323_v27, %v1327_v28  ;;  %v1370_v6 = vld [vmem:[#allocation14 + $0x3d0] sm:$0xff]  ;;  %v1371_v15 = vld [vmem:[#allocation14 + $0x3d8] sm:$0xff] }
 0x423   :  { %3076 = vmatprep.subr.bf16.mxu1 %v4376_v34  ;;  %v4430_v34 = vcombine.high %v1322_v25, %v1326_v43  ;;  %v1374_v7 = vld [vmem:[#allocation14 + $0x3f0] sm:$0xff] }
 0x425   :  { %2995 = vmatpush1.bf16.msra.mxu0 %v4373_v23  ;;  %v1335_v23 = vld [vmem:[#allocation14 + $0x2b8] sm:$0xff] }
 0x426   :  { %3077 = vmatpush1.bf16.msra.mxu1 %v4375_v22  ;;  %2996 = vmatprep.subr.bf16.mxu0 %v4382_v18  ;;  %v4429_v22 = vcombine.low %v1322_v25, %v1326_v43  ;;  %v4431_v18 = vcombine.low %v1323_v27, %v1327_v28  ;;  %v4440_v33 = vcombine.high %v1331_v31, %v1335_v23  ;;  %v1378_v43 = vld [vmem:[#allocation14 + $0x410] sm:$0xff]  ;;  %v1379_v28 = vld [vmem:[#allocation14 + $0x418] sm:$0xff] }
 0x427   :  { %3078 = vmatprep.subr.bf16.mxu1 %v4384_v19  ;;  %v4438_v19 = vcombine.high %v1330_v37, %v1334_v29  ;;  %v1382_v27 = vld [vmem:[#allocation14 + $0x430] sm:$0xff] }
 0x429   :  { %2997 = vmatpush1.bf16.msra.mxu0 %v4381_v42  ;;  %v1343_v42 = vld [vmem:[#allocation14 + $0x2f8] sm:$0xff] }
 0x42a   :  { %3079 = vmatpush1.bf16.msra.mxu1 %v4383_v44  ;;  %2998 = vmatprep.subr.bf16.mxu0 %v4390_v46  ;;  %v4437_v44 = vcombine.low %v1330_v37, %v1334_v29  ;;  %v4439_v46 = vcombine.low %v1331_v31, %v1335_v23  ;;  %v4448_v49 = vcombine.high %v1339_v40, %v1343_v42  ;;  %v1386_v29 = vld [vmem:[#allocation14 + $0x450] sm:$0xff] }
 0x42b   :  { %3080 = vmatprep.subr.bf16.mxu1 %v4392_v48  ;;  %v4446_v48 = vcombine.high %v1338_v35, %v1342_v55  ;;  %v1390_v31 = vld [vmem:[#allocation14 + $0x470] sm:$0xff]  ;;  %v4485_v23 = vcombine.low %v1378_v43, %v1382_v27 }
 0x42d   :  { %2999 = vmatpush1.bf16.msra.mxu0 %v4389_v53  ;;  %v1351_v53 = vld [vmem:[#allocation14 + $0x338] sm:$0xff] }
 0x42e   :  { %3081 = vmatpush1.bf16.msra.mxu1 %v4391_v54  ;;  %3000 = vmatprep.subr.bf16.mxu0 %v4398_v45  ;;  %v4445_v54 = vcombine.low %v1338_v35, %v1342_v55  ;;  %v4447_v45 = vcombine.low %v1339_v40, %v1343_v42  ;;  %v4456_v57 = vcombine.high %v1347_v52, %v1351_v53  ;;  %v1394_v35 = vld [vmem:[#allocation14 + $0x490] sm:$0xff]  ;;  %v1395_v42 = vld [vmem:[#allocation14 + $0x498] sm:$0xff] }
 0x42f   :  { %3082 = vmatprep.subr.bf16.mxu1 %v4400_v56  ;;  %v4454_v56 = vcombine.high %v1346_v50, %v1350_v51  ;;  %v1398_v55 = vld [vmem:[#allocation14 + $0x4b0] sm:$0xff] }
 0x431   :  { %3001 = vmatpush1.bf16.msra.mxu0 %v4397_v61  ;;  %v1359_v61 = vld [vmem:[#allocation14 + $0x378] sm:$0xff] }
 0x432   :  { %3083 = vmatpush1.bf16.msra.mxu1 %v4399_v63  ;;  %3002 = vmatprep.subr.bf16.mxu0 %v4406_v0  ;;  %v4453_v63 = vcombine.low %v1346_v50, %v1350_v51  ;;  %v4455_v0 = vcombine.low %v1347_v52, %v1351_v53  ;;  %v4464_v8 = vcombine.high %v1355_v60, %v1359_v61  ;;  %v1402_v51 = vld [vmem:[#allocation14 + $0x4d0] sm:$0xff]  ;;  %v1403_v53 = vld [vmem:[#allocation14 + $0x4d8] sm:$0xff] }
 0x433   :  { %3084 = vmatprep.subr.bf16.mxu1 %v4408_v4  ;;  %v4462_v4 = vcombine.high %v1354_v58, %v1358_v59  ;;  %v1406_v52 = vld [vmem:[#allocation14 + $0x4f0] sm:$0xff] }
 0x435   :  { %3003 = vmatpush1.bf16.msra.mxu0 %v4405_v14  ;;  %v1367_v14 = vld [vmem:[#allocation14 + $0x3b8] sm:$0xff] }
 0x436   :  { %3085 = vmatpush1.bf16.msra.mxu1 %v4407_v1  ;;  %3004 = vmatprep.subr.bf16.mxu0 %v4414_v2  ;;  %v4461_v1 = vcombine.low %v1354_v58, %v1358_v59  ;;  %v4463_v2 = vcombine.low %v1355_v60, %v1359_v61  ;;  %v4472_v5 = vcombine.high %v1363_v13, %v1367_v14  ;;  %v1410_v58 = vld [vmem:[#allocation14 + $0x510] sm:$0xff]  ;;  %v1411_v60 = vld [vmem:[#allocation14 + $0x518] sm:$0xff] }
 0x437   :  { %3086 = vmatprep.subr.bf16.mxu1 %v4416_v3  ;;  %v4470_v3 = vcombine.high %v1362_v10, %v1366_v12  ;;  %v1414_v59 = vld [vmem:[#allocation14 + $0x530] sm:$0xff]  ;;  %v1415_v61 = vld [vmem:[#allocation14 + $0x538] sm:$0xff] }
 0x439   :  { %3005 = vmatpush1.bf16.msra.mxu0 %v4413_v17  ;;  %v1375_v17 = vld [vmem:[#allocation14 + $0x3f8] sm:$0xff] }
 0x43a   :  { %3087 = vmatpush1.bf16.msra.mxu1 %v4415_v20  ;;  %3006 = vmatprep.subr.bf16.mxu0 %v4422_v21  ;;  %v4469_v20 = vcombine.low %v1362_v10, %v1366_v12  ;;  %v4471_v21 = vcombine.low %v1363_v13, %v1367_v14  ;;  %v4480_v25 = vcombine.high %v1371_v15, %v1375_v17  ;;  %v1422_v10 = vld [vmem:[#allocation14 + $0x570] sm:$0xff]  ;;  %v1419_v12 = vld [vmem:[#allocation14 + $0x558] sm:$0xff] }
 0x43b   :  { %3088 = vmatprep.subr.bf16.mxu1 %v4424_v24  ;;  %v4478_v24 = vcombine.high %v1370_v6, %v1374_v7  ;;  %v1423_v13 = vld [vmem:[#allocation14 + $0x578] sm:$0xff]  ;;  %v4517_v14 = vcombine.low %v1410_v58, %v1414_v59 }
 0x43d   :  { %3007 = vmatpush1.bf16.msra.mxu0 %v4421_v30  ;;  %v1383_v30 = vld [vmem:[#allocation14 + $0x438] sm:$0xff] }
 0x43e   :  { %3089 = vmatpush1.bf16.msra.mxu1 %v4423_v32  ;;  %3008 = vmatprep.subr.bf16.mxu0 %v4430_v34  ;;  %v4477_v32 = vcombine.low %v1370_v6, %v1374_v7  ;;  %v4479_v34 = vcombine.low %v1371_v15, %v1375_v17  ;;  %v4488_v37 = vcombine.high %v1379_v28, %v1383_v30  ;;  %v1430_v6 = vld [vmem:[#allocation14 + $0x5b0] sm:$0xff]  ;;  %v1427_v7 = vld [vmem:[#allocation14 + $0x598] sm:$0xff] }
 0x43f   :  { %3090 = vmatprep.subr.bf16.mxu1 %v4432_v36  ;;  %v4486_v36 = vcombine.high %v1378_v43, %v1382_v27  ;;  %v1431_v15 = vld [vmem:[#allocation14 + $0x5b8] sm:$0xff]  ;;  %v1438_v43 = vld [vmem:[#allocation14 + $0x5f0] sm:$0xff] }
 0x440   :  { %v1435_v27 = vld [vmem:[#allocation14 + $0x5d8] sm:$0xff] }
 0x441   :  { %3009 = vmatpush1.bf16.msra.mxu0 %v4429_v22  ;;  %v1387_v22 = vld [vmem:[#allocation14 + $0x458] sm:$0xff] }
 0x442   :  { %3091 = vmatpush1.bf16.msra.mxu1 %v4431_v18  ;;  %3010 = vmatprep.subr.bf16.mxu0 %v4438_v19  ;;  %v1391_v18 = vld [vmem:[#allocation14 + $0x478] sm:$0xff]  ;;  %v4487_v19 = vcombine.low %v1379_v28, %v1383_v30 }
 0x443   :  { %3092 = vmatprep.subr.bf16.mxu1 %v4440_v33  ;;  %v4494_v33 = vcombine.high %v1386_v29, %v1390_v31  ;;  %v4496_v40 = vcombine.high %v1387_v22, %v1391_v18  ;;  %v1439_v28 = vld [vmem:[#allocation14 + $0x5f8] sm:$0xff] }
 0x445   :  { %3011 = vmatpush1.bf16.msra.mxu0 %v4437_v44  ;;  %v1399_v44 = vld [vmem:[#allocation14 + $0x4b8] sm:$0xff] }
 0x446   :  { %3093 = vmatpush1.bf16.msra.mxu1 %v4439_v46  ;;  %3012 = vmatprep.subr.bf16.mxu0 %v4446_v48  ;;  %v4493_v46 = vcombine.low %v1386_v29, %v1390_v31  ;;  %v4495_v48 = vcombine.low %v1387_v22, %v1391_v18  ;;  %v4504_v50 = vcombine.high %v1395_v42, %v1399_v44  ;;  %v1446_v29 = vld [vmem:[#allocation14 + $0x630] sm:$0xff]  ;;  %v1443_v31 = vld [vmem:[#allocation14 + $0x618] sm:$0xff] }
 0x447   :  { %3094 = vmatprep.subr.bf16.mxu1 %v4448_v49  ;;  %v4502_v49 = vcombine.high %v1394_v35, %v1398_v55  ;;  %v4543_v18 = vcombine.low %v1435_v27, %v1439_v28 }
 0x449   :  { %3013 = vmatpush1.bf16.msra.mxu0 %v4445_v54  ;;  %v1407_v54 = vld [vmem:[#allocation14 + $0x4f8] sm:$0xff] }
 0x44a   :  { %3095 = vmatpush1.bf16.msra.mxu1 %v4447_v45  ;;  %3014 = vmatprep.subr.bf16.mxu0 %v4454_v56  ;;  %v4501_v45 = vcombine.low %v1394_v35, %v1398_v55  ;;  %v4510_v56 = vcombine.high %v1402_v51, %v1406_v52  ;;  %v1450_v35 = vld [vmem:[#allocation14 + $0x650] sm:$0xff] }
 0x44b   :  { %3096 = vmatprep.subr.bf16.mxu1 %v4456_v57  ;;  %v4512_v57 = vcombine.high %v1403_v53, %v1407_v54  ;;  %v1454_v55 = vld [vmem:[#allocation14 + $0x670] sm:$0xff] }
 0x44d   :  { %3015 = vmatpush1.bf16.msra.mxu0 %v4453_v63  ;;  %v4511_v63 = vcombine.low %v1403_v53, %v1407_v54  ;;  %v1463_v53 = vld [vmem:[#allocation14 + $0x6b8] sm:$0xff]  ;;  %v4557_v54 = vcombine.low %v1450_v35, %v1454_v55 }
 0x44e   :  { %3097 = vmatpush1.bf16.msra.mxu1 %v4455_v0  ;;  %3016 = vmatprep.subr.bf16.mxu0 %v4462_v4  ;;  %v4518_v0 = vcombine.high %v1410_v58, %v1414_v59  ;;  %v4520_v4 = vcombine.high %v1411_v60, %v1415_v61  ;;  %v1470_v58 = vld [vmem:[#allocation14 + $0x6f0] sm:$0xff]  ;;  %v1467_v59 = vld [vmem:[#allocation14 + $0x6d8] sm:$0xff] }
 0x44f   :  { %3098 = vmatprep.subr.bf16.mxu1 %v4464_v8  ;;  %v1418_v8 = vld [vmem:[#allocation14 + $0x550] sm:$0xff] }
 0x450   :  { %v4525_v17 = vcombine.low %v1418_v8, %v1422_v10 }
 0x451   :  { %3017 = vmatpush1.bf16.msra.mxu0 %v4461_v1  ;;  %v4519_v1 = vcombine.low %v1411_v60, %v1415_v61  ;;  %v1471_v60 = vld [vmem:[#allocation14 + $0x6f8] sm:$0xff] }
 0x452   :  { %3099 = vmatpush1.bf16.msra.mxu1 %v4463_v2  ;;  %3018 = vmatprep.subr.bf16.mxu0 %v4470_v3  ;;  %v4526_v2 = vcombine.high %v1418_v8, %v1422_v10  ;;  %v4528_v3 = vcombine.high %v1419_v12, %v1423_v13  ;;  %v1478_v8 = vld [vmem:[#allocation14 + $0x730] sm:$0xff]  ;;  %v1475_v10 = vld [vmem:[#allocation14 + $0x718] sm:$0xff] }
 0x453   :  { %3100 = vmatprep.subr.bf16.mxu1 %v4472_v5  ;;  %v1426_v5 = vld [vmem:[#allocation14 + $0x590] sm:$0xff] }
 0x454   :  { %v4533_v30 = vcombine.low %v1426_v5, %v1430_v6 }
 0x455   :  { %3019 = vmatpush1.bf16.msra.mxu0 %v4469_v20  ;;  %v4527_v20 = vcombine.low %v1419_v12, %v1423_v13  ;;  %v1479_v12 = vld [vmem:[#allocation14 + $0x738] sm:$0xff] }
 0x456   :  { %3101 = vmatpush1.bf16.msra.mxu1 %v4471_v21  ;;  %3020 = vmatprep.subr.bf16.mxu0 %v4478_v24  ;;  %v4534_v21 = vcombine.high %v1426_v5, %v1430_v6  ;;  %v4536_v24 = vcombine.high %v1427_v7, %v1431_v15  ;;  %v1486_v5 = vld [vmem:[#allocation14 + $0x770] sm:$0xff]  ;;  %v1483_v6 = vld [vmem:[#allocation14 + $0x758] sm:$0xff] }
 0x457   :  { %3102 = vmatprep.subr.bf16.mxu1 %v4480_v25  ;;  %v1434_v25 = vld [vmem:[#allocation14 + $0x5d0] sm:$0xff] }
 0x458   :  { %v4541_v22 = vcombine.low %v1434_v25, %v1438_v43 }
 0x459   :  { %3021 = vmatpush1.bf16.msra.mxu0 %v4477_v32  ;;  %v4535_v32 = vcombine.low %v1427_v7, %v1431_v15  ;;  %v1487_v7 = vld [vmem:[#allocation14 + $0x778] sm:$0xff] }
 0x45a   :  { %3103 = vmatpush1.bf16.msra.mxu1 %v4479_v34  ;;  %3031 = vmatprep.subr.bf16.mxu0 %v4486_v36  ;;  %v4542_v34 = vcombine.high %v1434_v25, %v1438_v43  ;;  %v4544_v36 = vcombine.high %v1435_v27, %v1439_v28  ;;  %v1494_v25 = vld [vmem:[#allocation14 + $0x7b0] sm:$0xff]  ;;  %v1491_v43 = vld [vmem:[#allocation14 + $0x798] sm:$0xff] }
 0x45b   :  { %3113 = vmatprep.subr.bf16.mxu1 %v4488_v37  ;;  %v1442_v37 = vld [vmem:[#allocation14 + $0x610] sm:$0xff]  ;;  %v1495_v27 = vld [vmem:[#allocation14 + $0x7b8] sm:$0xff] }
 0x45c   :  { %3023 = vmatmul.mubr.bf16.vlgmr.msra.gmra.mrb[12].mxu0 %v5636_v47 }
 0x45d   :  { %3105 = vmatmul.mubr.bf16.vlgmr.msra.gmra.mrb[12].mxu1 %v5636_v47  ;;  %3032 = vmatpush1.bf16.msra.mxu0 %v4485_v23  ;;  %v4503_v47 = vcombine.low %v1395_v42, %v1399_v44  ;;  %v1447_v23 = vld [vmem:[#allocation14 + $0x638] sm:$0xff]  ;;  %v4549_v44 = vcombine.low %v1442_v37, %v1446_v29 }
 0x45e   :  { %3063 = vmatprep.mubr.bf16.mxu0 %v5642_v62  ;;  %3114 = vmatpush1.bf16.msra.mxu1 %v4487_v19  ;;  %v4550_v19 = vcombine.high %v1442_v37, %v1446_v29  ;;  %v1455_v42 = vld [vmem:[#allocation14 + $0x678] sm:$0xff]  ;;  %v1502_v37 = vld [vmem:[#allocation14 + $0x7f0] sm:$0xff] }
 0x45f   :  { %3145 = vmatprep.mubr.bf16.mxu1 %v5642_v62  ;;  %3033 = vmatprep.subr.bf16.mxu0 %v4494_v33  ;;  %v4509_v62 = vcombine.low %v1402_v51, %v1406_v52  ;;  %v4552_v33 = vcombine.high %v1443_v31, %v1447_v23  ;;  %v1462_v51 = vld [vmem:[#allocation14 + $0x6b0] sm:$0xff]  ;;  %v1459_v52 = vld [vmem:[#allocation14 + $0x698] sm:$0xff] }
 0x460   :  { %3115 = vmatprep.subr.bf16.mxu1 %v4496_v40  ;;  %v1451_v40 = vld [vmem:[#allocation14 + $0x658] sm:$0xff] }
 0x461   :  { %3034 = vmatpush1.bf16.msra.mxu0 %v4493_v46  ;;  %v4551_v46 = vcombine.low %v1443_v31, %v1447_v23  ;;  %v1499_v29 = vld [vmem:[#allocation14 + $0x7d8] sm:$0xff] }
 0x462   :  { %3116 = vmatpush1.bf16.msra.mxu1 %v4495_v48  ;;  %3035 = vmatprep.subr.bf16.mxu0 %v4502_v49  ;;  %v4558_v48 = vcombine.high %v1450_v35, %v1454_v55  ;;  %v4560_v49 = vcombine.high %v1451_v40, %v1455_v42  ;;  %v1503_v31 = vld [vmem:[#allocation14 + $0x7f8] sm:$0xff] }
 0x463   :  { %3117 = vmatprep.subr.bf16.mxu1 %v4504_v50  ;;  %v1458_v50 = vld [vmem:[#allocation14 + $0x690] sm:$0xff]  ;;  %v4607_v35 = vcombine.low %v1499_v29, %v1503_v31 }
 0x464   :  { %v4565_v61 = vcombine.low %v1458_v50, %v1462_v51  ;;  %v5670_v55 = vld [vmem:[%s5856_s12] sm:$0xff] }
 0x465   :  { %3036 = vmatpush1.bf16.msra.mxu0 %v4501_v45  ;;  %v4559_v45 = vcombine.low %v1451_v40, %v1455_v42  ;;  %v1509_v40 = vrot.slane %v5670_v55, %v5537_v39  ;;  %v1517_v42 = vrot.slane %v5670_v55, %v5572_v9 }
 0x466   :  { %3118 = vmatpush1.bf16.msra.mxu1 %v4503_v47  ;;  %3037 = vmatprep.subr.bf16.mxu0 %v4510_v56  ;;  %v4566_v47 = vcombine.high %v1458_v50, %v1462_v51  ;;  %v4568_v56 = vcombine.high %v1459_v52, %v1463_v53 }
 0x467   :  { %3119 = vmatprep.subr.bf16.mxu1 %v4512_v57  ;;  %v1466_v57 = vld [vmem:[#allocation14 + $0x6d0] sm:$0xff] }
 0x468   :  { %v4573_v13 = vcombine.low %v1466_v57, %v1470_v58 }
 0x469   :  { %3038 = vmatpush1.bf16.msra.mxu0 %v4509_v62  ;;  %v4567_v62 = vcombine.low %v1459_v52, %v1463_v53 }
 0x46a   :  { %3120 = vmatpush1.bf16.msra.mxu1 %v4511_v63  ;;  %3039 = vmatprep.subr.bf16.mxu0 %v4518_v0  ;;  %v4574_v63 = vcombine.high %v1466_v57, %v1470_v58  ;;  %v4576_v0 = vcombine.high %v1467_v59, %v1471_v60 }
 0x46b   :  { %3121 = vmatprep.subr.bf16.mxu1 %v4520_v4  ;;  %v1474_v4 = vld [vmem:[#allocation14 + $0x710] sm:$0xff] }
 0x46c   :  { %v4581_v15 = vcombine.low %v1474_v4, %v1478_v8 }
 0x46d   :  { %3040 = vmatpush1.bf16.msra.mxu0 %v4517_v14  ;;  %v4575_v14 = vcombine.low %v1467_v59, %v1471_v60 }
 0x46e   :  { %3122 = vmatpush1.bf16.msra.mxu1 %v4519_v1  ;;  %3041 = vmatprep.subr.bf16.mxu0 %v4526_v2  ;;  %v4582_v1 = vcombine.high %v1474_v4, %v1478_v8  ;;  %v4584_v2 = vcombine.high %v1475_v10, %v1479_v12 }
 0x46f   :  { %3123 = vmatprep.subr.bf16.mxu1 %v4528_v3  ;;  %v1482_v3 = vld [vmem:[#allocation14 + $0x750] sm:$0xff] }
 0x470   :  { %v4589_v28 = vcombine.low %v1482_v3, %v1486_v5 }
 0x471   :  { %3042 = vmatpush1.bf16.msra.mxu0 %v4525_v17  ;;  %v4583_v17 = vcombine.low %v1475_v10, %v1479_v12 }
 0x472   :  { %3124 = vmatpush1.bf16.msra.mxu1 %v4527_v20  ;;  %3043 = vmatprep.subr.bf16.mxu0 %v4534_v21  ;;  %v4590_v20 = vcombine.high %v1482_v3, %v1486_v5  ;;  %v4592_v21 = vcombine.high %v1483_v6, %v1487_v7 }
 0x473   :  { %3125 = vmatprep.subr.bf16.mxu1 %v4536_v24  ;;  %v1490_v24 = vld [vmem:[#allocation14 + $0x790] sm:$0xff] }
 0x474   :  { %v4597_v23 = vcombine.low %v1490_v24, %v1494_v25 }
 0x475   :  { %3044 = vmatpush1.bf16.msra.mxu0 %v4533_v30  ;;  %v4591_v30 = vcombine.low %v1483_v6, %v1487_v7 }
 0x476   :  { %3126 = vmatpush1.bf16.msra.mxu1 %v4535_v32  ;;  %3045 = vmatprep.subr.bf16.mxu0 %v4542_v34  ;;  %v4598_v32 = vcombine.high %v1490_v24, %v1494_v25  ;;  %v4600_v34 = vcombine.high %v1491_v43, %v1495_v27 }
 0x477   :  { %3127 = vmatprep.subr.bf16.mxu1 %v4544_v36  ;;  %v1498_v36 = vld [vmem:[#allocation14 + $0x7d0] sm:$0xff] }
 0x479   :  { %3046 = vmatpush1.bf16.msra.mxu0 %v4541_v22  ;;  %v4599_v22 = vcombine.low %v1491_v43, %v1495_v27 }
 0x47a   :  { %3128 = vmatpush1.bf16.msra.mxu1 %v4543_v18  ;;  %3047 = vmatprep.subr.bf16.mxu0 %v4550_v19  ;;  %v4606_v18 = vcombine.high %v1498_v36, %v1502_v37  ;;  %v4608_v19 = vcombine.high %v1499_v29, %v1503_v31 }
 0x47b   :  { %3129 = vmatprep.subr.bf16.mxu1 %v4552_v33  ;;  %v4605_v33 = vcombine.low %v1498_v36, %v1502_v37 }
 0x47d   :  { %3048 = vmatpush1.bf16.msra.mxu0 %v4549_v44  ;;  %v1513_v44 = vrot.slane %v5670_v55, %v5540_v41 }
 0x47e   :  { %3130 = vmatpush1.bf16.msra.mxu1 %v4551_v46  ;;  %3049 = vmatprep.subr.bf16.mxu0 %v4558_v48  ;;  %v1521_v46 = vrot.slane %v5670_v55, %v5578_v11 }
 0x47f   :  { %3131 = vmatprep.subr.bf16.mxu1 %v4560_v49 }
 0x481   :  { %3050 = vmatpush1.bf16.msra.mxu0 %v4557_v54 }
 0x482   :  { %3132 = vmatpush1.bf16.msra.mxu1 %v4559_v45  ;;  %3051 = vmatprep.subr.bf16.mxu0 %v4566_v47 }
 0x483   :  { %3133 = vmatprep.subr.bf16.mxu1 %v4568_v56 }
 0x485   :  { %3052 = vmatpush1.bf16.msra.mxu0 %v4565_v61 }
 0x486   :  { %3134 = vmatpush1.bf16.msra.mxu1 %v4567_v62  ;;  %3053 = vmatprep.subr.bf16.mxu0 %v4574_v63 }
 0x487   :  { %3135 = vmatprep.subr.bf16.mxu1 %v4576_v0 }
 0x489   :  { %3054 = vmatpush1.bf16.msra.mxu0 %v4573_v13 }
 0x48a   :  { %3136 = vmatpush1.bf16.msra.mxu1 %v4575_v14  ;;  %3055 = vmatprep.subr.bf16.mxu0 %v4582_v1 }
 0x48b   :  { %3137 = vmatprep.subr.bf16.mxu1 %v4584_v2 }
 0x48d   :  { %3056 = vmatpush1.bf16.msra.mxu0 %v4581_v15 }
 0x48e   :  { %3138 = vmatpush1.bf16.msra.mxu1 %v4583_v17  ;;  %3057 = vmatprep.subr.bf16.mxu0 %v4590_v20 }
 0x48f   :  { %3139 = vmatprep.subr.bf16.mxu1 %v4592_v21 }
 0x491   :  { %3058 = vmatpush1.bf16.msra.mxu0 %v4589_v28 }
 0x492   :  { %3140 = vmatpush1.bf16.msra.mxu1 %v4591_v30  ;;  %3059 = vmatprep.subr.bf16.mxu0 %v4598_v32 }
 0x493   :  { %3141 = vmatprep.subr.bf16.mxu1 %v4600_v34 }
 0x495   :  { %3060 = vmatpush1.bf16.msra.mxu0 %v4597_v23 }
 0x496   :  { %3142 = vmatpush1.bf16.msra.mxu1 %v4599_v22  ;;  %3061 = vmatprep.subr.bf16.mxu0 %v4606_v18 }
 0x497   :  { %3143 = vmatprep.subr.bf16.mxu1 %v4608_v19 }
 0x499   :  { %3062 = vmatpush1.bf16.msra.mxu0 %v4605_v33 }
 0x49a   :  { %3144 = vmatpush1.bf16.msra.mxu1 %v4607_v35 }
 0x49c   :  { %3064 = vmatmul.mubr.bf16.vlgmr.msra.gmra.mrb[12].mxu0 %v5655_v16 }
 0x49d   :  { %3146 = vmatmul.mubr.bf16.vlgmr.msra.gmra.mrb[12].mxu1 %v5655_v16 }
 0x4ef   :  { %v2901_v48 = vpop.f32.mrb[8].mxu0  ;;  %v2983_v49 = vpop.f32.mrb[8].mxu1 }
 0x4f0   :  { %v5680_v16 = vadd.f32 %v2901_v48, %v1509_v40  ;;  %v5682_v50 = vadd.f32 %v2983_v49, %v1517_v42  ;;  %v2903_v51 = vpop.f32.mrb[9].mxu0  ;;  %v2985_v52 = vpop.f32.mrb[9].mxu1 }
 0x4f1   :  { %v5684_v53 = vadd.f32 %v2903_v51, %v1513_v44  ;;  %v5686_v54 = vadd.f32 %v2985_v52, %v1521_v46  ;;  %v2905_v45 = vpop.f32.mrb[10].mxu0  ;;  %v2987_v47 = vpop.f32.mrb[10].mxu1 }
 0x4f2   :  { %v3154_v56 = vrot.slane %v5680_v16, 4  ;;  %v3210_v57 = vmul.f32 %v5680_v16, %v5680_v16  ;;  %v3166_v58 = vrot.slane %v5682_v50, 4  ;;  %v3212_v59 = vmul.f32 %v5682_v50, %v5682_v50  ;;  %v2906_v60 = vpop.f32.mrb[11].mxu0  ;;  %v2988_v61 = vpop.f32.mrb[11].mxu1 }
 0x4f3   :  { %v3160_v62 = vrot.slane %v5684_v53, 4  ;;  %v3211_v63 = vmul.f32 %v5684_v53, %v5684_v53  ;;  %v3172_v0 = vrot.slane %v5686_v54, 4  ;;  %v3213_v4 = vmul.f32 %v5686_v54, %v5686_v54 }
 0x4f4   :  { %v3155_v8 = vadd.f32 %v5680_v16, %v3154_v56  ;;  %v3218_v10 = vrot.slane %v3210_v57, 4  ;;  %v3167_v12 = vadd.f32 %v5682_v50, %v3166_v58  ;;  %v3230_v13 = vrot.slane %v3212_v59, 4 }
 0x4f5   :  { %v3161_v14 = vadd.f32 %v5684_v53, %v3160_v62  ;;  %v3224_v1 = vrot.slane %v3211_v63, 4  ;;  %v3173_v2 = vadd.f32 %v5686_v54, %v3172_v0  ;;  %v3236_v3 = vrot.slane %v3213_v4, 4 }
 0x4f6   :  { %v3156_v5 = vrot.slane %v3155_v8, 2  ;;  %v3219_v6 = vadd.f32 %v3218_v10, %v3210_v57  ;;  %v3168_v7 = vrot.slane %v3167_v12, 2  ;;  %v3231_v15 = vadd.f32 %v3230_v13, %v3212_v59 }
 0x4f7   :  { %v3162_v17 = vrot.slane %v3161_v14, 2  ;;  %v3225_v20 = vadd.f32 %v3224_v1, %v3211_v63  ;;  %v3174_v21 = vrot.slane %v3173_v2, 2  ;;  %v3237_v24 = vadd.f32 %v3236_v3, %v3213_v4 }
 0x4f8   :  { %v3157_v25 = vadd.f32 %v3156_v5, %v3155_v8  ;;  %v3220_v43 = vrot.slane %v3219_v6, 2  ;;  %v3169_v27 = vadd.f32 %v3168_v7, %v3167_v12  ;;  %v3232_v28 = vrot.slane %v3231_v15, 2 }
 0x4f9   :  { %v3163_v30 = vadd.f32 %v3162_v17, %v3161_v14  ;;  %v3226_v32 = vrot.slane %v3225_v20, 2  ;;  %v3175_v34 = vadd.f32 %v3174_v21, %v3173_v2  ;;  %v3238_v36 = vrot.slane %v3237_v24, 2 }
 0x4fa   :  { %v3158_v37 = vrot.slane %v3157_v25, 1  ;;  %v3221_v29 = vadd.f32 %v3220_v43, %v3219_v6  ;;  %v3170_v31 = vrot.slane %v3169_v27, 1  ;;  %v3233_v23 = vadd.f32 %v3232_v28, %v3231_v15 }
 0x4fb   :  { %v3164_v22 = vrot.slane %v3163_v30, 1  ;;  %v3227_v18 = vadd.f32 %v3226_v32, %v3225_v20  ;;  %v3176_v19 = vrot.slane %v3175_v34, 1  ;;  %v3239_v33 = vadd.f32 %v3238_v36, %v3237_v24  ;;  %v4966_v32 = vld [vmem:[#allocation16 + $0xc0] sm:$0xff]  }
 0x4fc   :  { %v3159_v35 = vadd.f32 %v3158_v37, %v3157_v25  ;;  %v3222_v40 = vrot.slane %v3221_v29, 1  ;;  %v3171_v42 = vadd.f32 %v3170_v31, %v3169_v27  ;;  %v3234_v44 = vrot.slane %v3233_v23, 1  ;;  %v4968_v36 = vld [vmem:[#allocation16 + $0x80] sm:$0xff]   ;;  %4705 = vmatprep.subr.bf16.mxu1 %v4966_v32  ;;  %v4969_v37 = vld [vmem:[#allocation16 + $0x48] sm:$0xff]  }
 0x4fd   :  { %v3165_v46 = vadd.f32 %v3164_v22, %v3163_v30  ;;  %v3228_v48 = vrot.slane %v3227_v18, 1  ;;  %v3177_v49 = vadd.f32 %v3176_v19, %v3175_v34  ;;  %v3240_v51 = vrot.slane %v3239_v33, 1  ;;  %v4965_v30 = vld [vmem:[#allocation16 + $0x40] sm:$0xff]   ;;  %4706 = vmatpush3.bf16.msra.mxu1 %v4968_v36  ;;  %v4971_v31 = vld [vmem:[#allocation16 + $0x8] sm:$0xff]   ;;  %v4973_v22 = vld [vmem:[#allocation16 + $0x50] sm:$0xff]  }
 0x4fe   :  { %v5704_v52 = vmul.f32 0.125, %v3159_v35  ;;  %v3223_v45 = vadd.f32 %v3222_v40, %v3221_v29  ;;  %v5706_v47 = vmul.f32 0.125, %v3171_v42  ;;  %v3235_v56 = vadd.f32 %v3234_v44, %v3233_v23  ;;  %v4967_v34 = vld [vmem:[#allocation16] sm:$0xff]   ;;  %4683 = vmatprep.subr.bf16.mxu0 %v4965_v30  ;;  %v4970_v29 = vld [vmem:[#allocation16 + $0xc8] sm:$0xff]   ;;  %v4975_v19 = vld [vmem:[#allocation16 + $0x10] sm:$0xff]  }
 0x4ff   :  { %v5708_v57 = vmul.f32 0.125, %v3165_v46  ;;  %v3229_v58 = vadd.f32 %v3228_v48, %v3227_v18  ;;  %v5710_v59 = vmul.f32 0.125, %v3177_v49  ;;  %v3241_v60 = vadd.f32 %v3240_v51, %v3239_v33  ;;  %4684 = vmatpush3.bf16.msra.mxu0 %v4967_v34  ;;  %v4972_v23 = vld [vmem:[#allocation16 + $0x88] sm:$0xff]   ;;  %4707 = vmatprep.subr.bf16.mxu1 %v4970_v29  ;;  %v4974_v18 = vld [vmem:[#allocation16 + $0xd0] sm:$0xff]   ;;  %v4977_v35 = vld [vmem:[#allocation16 + $0x58] sm:$0xff]  }
 0x500   :  { %v3266_v61 = vmul.f32 0.125, %v3223_v45  ;;  %v3274_v62 = vmul.f32 %v5704_v52, %v5704_v52  ;;  %v3268_v63 = vmul.f32 0.125, %v3235_v56  ;;  %v3276_v0 = vmul.f32 %v5706_v47, %v5706_v47  ;;  %4685 = vmatprep.subr.bf16.mxu0 %v4969_v37  ;;  %v4976_v33 = vld [vmem:[#allocation16 + $0x90] sm:$0xff]   ;;  %v4978_v40 = vld [vmem:[#allocation16 + $0xd8] sm:$0xff]   ;;  %v4981_v46 = vld [vmem:[#allocation16 + $0x60] sm:$0xff]  }
 0x501   :  { %v3267_v4 = vmul.f32 0.125, %v3229_v58  ;;  %v3275_v8 = vmul.f32 %v5708_v57, %v5708_v57  ;;  %v3269_v10 = vmul.f32 0.125, %v3241_v60  ;;  %v3277_v12 = vmul.f32 %v5710_v59, %v5710_v59  ;;  %4708 = vmatpush3.bf16.msra.mxu1 %v4972_v23  ;;  %v4979_v42 = vld [vmem:[#allocation16 + $0x18] sm:$0xff]   ;;  %v4982_v48 = vld [vmem:[#allocation16 + $0xe0] sm:$0xff]   ;;  %v4985_v45 = vld [vmem:[#allocation16 + $0x68] sm:$0xff]  }
 0x502   :  { %v3282_v13 = vsub.f32 %v3266_v61, %v3274_v62  ;;  %v3284_v14 = vsub.f32 %v3268_v63, %v3276_v0  ;;  %4709 = vmatprep.subr.bf16.mxu1 %v4974_v18  ;;  %v4980_v44 = vld [vmem:[#allocation16 + $0x98] sm:$0xff]   ;;  %v4983_v49 = vld [vmem:[#allocation16 + $0x20] sm:$0xff]   ;;  %v4986_v56 = vld [vmem:[#allocation16 + $0xe8] sm:$0xff]  }
 0x503   :  { %v3283_v1 = vsub.f32 %v3267_v4, %v3275_v8  ;;  %v3285_v2 = vsub.f32 %v3269_v10, %v3277_v12  ;;  %4686 = vmatpush3.bf16.msra.mxu0 %v4971_v31  ;;  %v4984_v51 = vld [vmem:[#allocation16 + $0xa0] sm:$0xff]   ;;  %v4987_v58 = vld [vmem:[#allocation16 + $0x28] sm:$0xff]   ;;  %v4989_v61 = vld [vmem:[#allocation16 + $0x70] sm:$0xff]  }
 0x504   :  { %v3291_v3 = vadd.f32 0.8, %v3282_v13  ;;  %v3293_v5 = vadd.f32 0.8, %v3284_v14  ;;  %4687 = vmatprep.subr.bf16.mxu0 %v4973_v22  ;;  %v4988_v60 = vld [vmem:[#allocation16 + $0xa8] sm:$0xff]   ;;  %v4990_v62 = vld [vmem:[#allocation16 + $0xf0] sm:$0xff]  }
 0x505   :  { %v3292_v6 = vadd.f32 0.8, %v3283_v1  ;;  %v3294_v7 = vadd.f32 0.8, %v3285_v2  ;;  %4710 = vmatpush3.bf16.msra.mxu1 %v4976_v33  ;;  %v4991_v63 = vld [vmem:[#allocation16 + $0x30] sm:$0xff]   ;;  %v4993_v4 = vld [vmem:[#allocation16 + $0x78] sm:$0xff]  }
 0x506   :  { %5041 = vrsqrt.f32 %v3291_v3  ;;  %4711 = vmatprep.subr.bf16.mxu1 %v4978_v40  ;;  %v4992_v0 = vld [vmem:[#allocation16 + $0xb0] sm:$0xff]   ;;  %v4994_v8 = vld [vmem:[#allocation16 + $0xf8] sm:$0xff]   ;;  %v4997_v13 = vld [vmem:[#allocation16 + $0x140] sm:$0xff]   ;;  %v5729_v1 = vsub.s32 4, %v5534_v38  ;;  %v5732_v2 = vsub.s32 6, %v5534_v38  ;;  %v5735_v3 = vsub.s32 5, %v5534_v38 }
 0x507   :  { %5043 = vrsqrt.f32 %v3293_v5  ;;  %4688 = vmatpush3.bf16.msra.mxu0 %v4975_v19  ;;  %v4995_v10 = vld [vmem:[#allocation16 + $0x38] sm:$0xff]   ;;  %v4998_v14 = vld [vmem:[#allocation16 + $0x1c0] sm:$0xff]   ;;  %v5738_v5 = vsub.s32 7, %v5534_v38 }
 0x508   :  { %5045 = vrsqrt.f32 %v3292_v6  ;;  %4689 = vmatprep.subr.bf16.mxu0 %v4977_v35  ;;  %v4996_v12 = vld [vmem:[#allocation16 + $0xb8] sm:$0xff]   ;;  %v1525_v6 = vrot.slane %v5670_v55, %v5729_v1 }
 0x509   :  { %5047 = vrsqrt.f32 %v3294_v7  ;;  %4712 = vmatpush3.bf16.msra.mxu1 %v4980_v44  ;;  %v1533_v7 = vrot.slane %v5670_v55, %v5732_v2 }
 0x50a   :  { %4713 = vmatprep.subr.bf16.mxu1 %v4982_v48 }
 0x50b   :  { %4690 = vmatpush3.bf16.msra.mxu0 %v4979_v42 }
 0x50c   :  { %4691 = vmatprep.subr.bf16.mxu0 %v4981_v46 }
 0x50d   :  { %4714 = vmatpush3.bf16.msra.mxu1 %v4984_v51 }
 0x50e   :  { %4715 = vmatprep.subr.bf16.mxu1 %v4986_v56 }
 0x50f   :  { %4692 = vmatpush3.bf16.msra.mxu0 %v4983_v49 }
 0x510   :  { %v5042_v15 = vpop.eup %5041  ;;  %4693 = vmatprep.subr.bf16.mxu0 %v4985_v45 }
 0x511   :  { %v5044_v17 = vpop.eup %5043  ;;  %4716 = vmatpush3.bf16.msra.mxu1 %v4988_v60 }
 0x512   :  { %v5046_v20 = vpop.eup %5045  ;;  %4717 = vmatprep.subr.bf16.mxu1 %v4990_v62 }
 0x513   :  { %v5048_v21 = vpop.eup %5047  ;;  %v3315_v24 = vcombine.low %v5042_v15, %v5046_v20  ;;  %4694 = vmatpush3.bf16.msra.mxu0 %v4987_v58  ;;  %v1529_v15 = vrot.slane %v5670_v55, %v5735_v3 }
 0x514   :  { %v3316_v25 = vcombine.low %v5044_v17, %v5048_v21  ;;  %4695 = vmatprep.subr.bf16.mxu0 %v4989_v61  ;;  %v1537_v17 = vrot.slane %v5670_v55, %v5738_v5 }
 0x515   :  { %v5721_v43 = vrot.slane %v3315_v24, %v5545_v26  ;;  %4718 = vmatpush3.bf16.msra.mxu1 %v4992_v0 }
 0x516   :  { %v5724_v27 = vrot.slane %v3316_v25, %v5545_v26  ;;  %4719 = vmatprep.subr.bf16.mxu1 %v4994_v8 }
 0x517   :  { %4696 = vmatpush3.bf16.msra.mxu0 %v4991_v63 }
 0x518   :  { %v3347_v28 = vcombine.low %v5721_v43, %v5724_v27  ;;  %4697 = vmatprep.subr.bf16.mxu0 %v4993_v4 }
 0x519   :  { %4720 = vmatpush3.bf16.msra.mxu1 %v4996_v12 }
 0x51a   :  { %4749 = vmatprep.subr.bf16.mxu1 %v4998_v14 }
 0x51b   :  { %4698 = vmatpush3.bf16.msra.mxu0 %v4995_v10 }
 0x51c   :  { %4727 = vmatprep.subr.bf16.mxu0 %v4997_v13 }
 0x56f   :  { %v3065_v20 = vpop.f32.mrb[12].mxu0 }
 0x570   :  { %v5748_v21 = vadd.f32 %v3065_v20, %v1525_v6  ;;  %v3147_v24 = vpop.f32.mrb[12].mxu1  ;;  %v3067_v25 = vpop.f32.mrb[13].mxu0 }
 0x571   :  { %v5750_v30 = vadd.f32 %v3147_v24, %v1533_v7  ;;  %v5752_v38 = vadd.f32 %v3067_v25, %v1529_v15  ;;  %v3149_v32 = vpop.f32.mrb[13].mxu1  ;;  %v3069_v34 = vpop.f32.mrb[14].mxu0 }
 0x572   :  { %v3178_v36 = vrot.slane %v5748_v21, 4  ;;  %v3214_v37 = vmul.f32 %v5748_v21, %v5748_v21  ;;  %v5757_v29 = vadd.f32 %v3149_v32, %v1537_v17  ;;  %v3151_v31 = vpop.f32.mrb[14].mxu1  ;;  %v3070_v55 = vpop.f32.mrb[15].mxu0 }
 0x573   :  { %v3190_v23 = vrot.slane %v5750_v30, 4  ;;  %v3216_v22 = vmul.f32 %v5750_v30, %v5750_v30  ;;  %v3184_v18 = vrot.slane %v5752_v38, 4  ;;  %v3215_v19 = vmul.f32 %v5752_v38, %v5752_v38  ;;  %v3152_v33 = vpop.f32.mrb[15].mxu1 }
 0x574   :  { %v3179_v35 = vadd.f32 %v5748_v21, %v3178_v36  ;;  %v3242_v40 = vrot.slane %v3214_v37, 4  ;;  %v3196_v42 = vrot.slane %v5757_v29, 4  ;;  %v3217_v44 = vmul.f32 %v5757_v29, %v5757_v29 }
 0x575   :  { %v3191_v46 = vadd.f32 %v5750_v30, %v3190_v23  ;;  %v3254_v48 = vrot.slane %v3216_v22, 4  ;;  %v3185_v49 = vadd.f32 %v5752_v38, %v3184_v18  ;;  %v3248_v51 = vrot.slane %v3215_v19, 4 }
 0x576   :  { %v3180_v45 = vrot.slane %v3179_v35, 2  ;;  %v3243_v56 = vadd.f32 %v3242_v40, %v3214_v37  ;;  %v3197_v58 = vadd.f32 %v5757_v29, %v3196_v42  ;;  %v3260_v60 = vrot.slane %v3217_v44, 4 }
 0x577   :  { %v3192_v61 = vrot.slane %v3191_v46, 2  ;;  %v3255_v62 = vadd.f32 %v3254_v48, %v3216_v22  ;;  %v3186_v63 = vrot.slane %v3185_v49, 2  ;;  %v3249_v0 = vadd.f32 %v3248_v51, %v3215_v19 }
 0x578   :  { %v3181_v4 = vadd.f32 %v3180_v45, %v3179_v35  ;;  %v3244_v8 = vrot.slane %v3243_v56, 2  ;;  %v3198_v10 = vrot.slane %v3197_v58, 2  ;;  %v3261_v12 = vadd.f32 %v3260_v60, %v3217_v44 }
 0x579   :  { %v3193_v13 = vadd.f32 %v3192_v61, %v3191_v46  ;;  %v3256_v14 = vrot.slane %v3255_v62, 2  ;;  %v3187_v6 = vadd.f32 %v3186_v63, %v3185_v49  ;;  %v3250_v7 = vrot.slane %v3249_v0, 2 }
 0x57a   :  { %v3182_v15 = vrot.slane %v3181_v4, 1  ;;  %v3245_v17 = vadd.f32 %v3244_v8, %v3243_v56  ;;  %v3199_v20 = vadd.f32 %v3198_v10, %v3197_v58  ;;  %v3262_v24 = vrot.slane %v3261_v12, 2 }
 0x57b   :  { %v3194_v25 = vrot.slane %v3193_v13, 1  ;;  %v3257_v32 = vadd.f32 %v3256_v14, %v3255_v62  ;;  %v3188_v34 = vrot.slane %v3187_v6, 1  ;;  %v3251_v36 = vadd.f32 %v3250_v7, %v3249_v0 }
 0x57c   :  { %v3183_v37 = vadd.f32 %v3182_v15, %v3181_v4  ;;  %v3246_v31 = vrot.slane %v3245_v17, 1  ;;  %v3200_v55 = vrot.slane %v3199_v20, 1  ;;  %v3263_v23 = vadd.f32 %v3262_v24, %v3261_v12 }
 0x57d   :  { %v3195_v22 = vadd.f32 %v3194_v25, %v3193_v13  ;;  %v3258_v18 = vrot.slane %v3257_v32, 1  ;;  %v3189_v19 = vadd.f32 %v3188_v34, %v3187_v6  ;;  %v3252_v33 = vrot.slane %v3251_v36, 1 }
 0x57e   :  { %v3206_v35 = vmul.f32 0.125, %v3183_v37  ;;  %v3247_v40 = vadd.f32 %v3246_v31, %v3245_v17  ;;  %v3201_v42 = vadd.f32 %v3200_v55, %v3199_v20  ;;  %v3264_v44 = vrot.slane %v3263_v23, 1 }
 0x57f   :  { %v3208_v46 = vmul.f32 0.125, %v3195_v22  ;;  %v3259_v48 = vadd.f32 %v3258_v18, %v3257_v32  ;;  %v3207_v49 = vmul.f32 0.125, %v3189_v19  ;;  %v3253_v51 = vadd.f32 %v3252_v33, %v3251_v36  ;;  %v3290_v18 = vld [vmem:[%s5857_s13] sm:$0xff] }
 0x580   :  { %v3270_v45 = vmul.f32 0.125, %v3247_v40  ;;  %v3278_v56 = vmul.f32 %v3206_v35, %v3206_v35  ;;  %v3209_v58 = vmul.f32 0.125, %v3201_v42  ;;  %v3265_v60 = vadd.f32 %v3264_v44, %v3263_v23 }
 0x581   :  { %v3272_v61 = vmul.f32 0.125, %v3259_v48  ;;  %v3280_v62 = vmul.f32 %v3208_v46, %v3208_v46  ;;  %v3271_v63 = vmul.f32 0.125, %v3253_v51  ;;  %v3279_v0 = vmul.f32 %v3207_v49, %v3207_v49 }
 0x582   :  { %v3286_v4 = vsub.f32 %v3270_v45, %v3278_v56  ;;  %v3273_v8 = vmul.f32 0.125, %v3265_v60  ;;  %v3281_v10 = vmul.f32 %v3209_v58, %v3209_v58  ;;  %v3355_v23 = vrot.slane %v3347_v28, %v5545_v26 }
 0x583   :  { %v3288_v12 = vsub.f32 %v3272_v61, %v3280_v62  ;;  %v3287_v13 = vsub.f32 %v3271_v63, %v3279_v0 }
 0x584   :  { %v3295_v14 = vadd.f32 0.8, %v3286_v4  ;;  %v3289_v6 = vsub.f32 %v3273_v8, %v3281_v10 }
 0x585   :  { %v3297_v7 = vadd.f32 0.8, %v3288_v12  ;;  %v3296_v15 = vadd.f32 0.8, %v3287_v13 }
 0x586   :  { %5049 = vrsqrt.f32 %v3295_v14  ;;  %v3298_v17 = vadd.f32 0.8, %v3289_v6 }
 0x587   :  { %5051 = vrsqrt.f32 %v3297_v7 }
 0x588   :  { %5053 = vrsqrt.f32 %v3296_v15  ;;  %v3366_v15 = vld [vmem:[%s5858_s14] sm:$0xff] }
 0x589   :  { %5055 = vrsqrt.f32 %v3298_v17 }
 0x590   :  { %v5050_v20 = vpop.eup %5049 }
 0x591   :  { %v5052_v24 = vpop.eup %5051 }
 0x592   :  { %v5054_v25 = vpop.eup %5053 }
 0x593   :  { %v5056_v32 = vpop.eup %5055  ;;  %v3317_v34 = vcombine.low %v5050_v20, %v5054_v25 }
 0x594   :  { %v3318_v36 = vcombine.low %v5052_v24, %v5056_v32 }
 0x595   :  { %v3339_v37 = vrot.slane %v3317_v34, %v5545_v26 }
 0x596   :  { %v3346_v31 = vrot.slane %v3318_v36, %v5545_v26 }
 0x598   :  { %v3348_v55 = vcombine.low %v3339_v37, %v3346_v31 }
 0x59a   :  { %v3362_v22 = vrot.slane %v3348_v55, %v5545_v26 }
 0x59c   :  { %v3363_v19 = vcombine.low %v3355_v23, %v3362_v22 }
 0x59e   :  { %v3365_v33 = vmul.f32 %v3363_v19, %v3290_v18 }
 0x5a0   :  { %v3387_v40 = vrot.slane %v3365_v33, %v5729_v1  ;;  %v3391_v42 = vrot.slane %v3365_v33, %v5735_v3  ;;  %v3395_v44 = vrot.slane %v3365_v33, %v5732_v2  ;;  %v3399_v48 = vrot.slane %v3365_v33, %v5738_v5 }
 0x5a1   :  { %v3371_v51 = vrot.slane %v3365_v33, %v5537_v39  ;;  %v3375_v43 = vrot.slane %v3365_v33, %v5540_v41  ;;  %v3379_v27 = vrot.slane %v3365_v33, %v5572_v9  ;;  %v3383_v28 = vrot.slane %v3365_v33, %v5578_v11 }
 0x5a2   :  { %v3412_v45 = vmul.f32 %v3387_v40, %v3206_v35  ;;  %v3413_v56 = vmul.f32 %v3391_v42, %v3207_v49  ;;  %v3414_v60 = vmul.f32 %v3395_v44, %v3208_v46  ;;  %v3415_v61 = vmul.f32 %v3399_v48, %v3209_v58 }
 0x5a3   :  { %v3482_v62 = vmul.f32 %v5757_v29, %v3399_v48  ;;  %v3408_v63 = vmul.f32 %v3371_v51, %v5704_v52  ;;  %v3409_v0 = vmul.f32 %v3375_v43, %v5708_v57  ;;  %v3410_v4 = vmul.f32 %v3379_v27, %v5706_v47  ;;  %v5000_v48 = vld [vmem:[#allocation16 + $0x180] sm:$0xff]  }
 0x5a4   :  { %v3426_v8 = vcombine.low %v3412_v45, %v3413_v56  ;;  %v3427_v10 = vcombine.low %v3414_v60, %v3415_v61  ;;  %v3411_v12 = vmul.f32 %v3383_v28, %v5710_v59  ;;  %v3476_v13 = vmul.f32 %v5684_v53, %v3375_v43  ;;  %v5002_v56 = vld [vmem:[#allocation16 + $0x1c8] sm:$0xff]  }
 0x5a5   :  { %v3424_v14 = vcombine.low %v3408_v63, %v3409_v0  ;;  %v3478_v35 = vmul.f32 %v5686_v54, %v3383_v28  ;;  %v3475_v46 = vmul.f32 %v5680_v16, %v3371_v51  ;;  %v3477_v49 = vmul.f32 %v5682_v50, %v3379_v27  ;;  %v5001_v28 = vld [vmem:[#allocation16 + $0x148] sm:$0xff]  }
 0x5a6   :  { %v3448_v29 = vrot.slane %v3426_v8, %v5545_v26  ;;  %v3455_v52 = vrot.slane %v3427_v10, %v5545_v26  ;;  %v3425_v57 = vcombine.low %v3410_v4, %v3411_v12  ;;  %v3480_v47 = vmul.f32 %v5752_v38, %v3391_v42  ;;  %v5004_v63 = vld [vmem:[#allocation16 + $0x188] sm:$0xff]   ;;  %v5005_v4 = vld [vmem:[#allocation16 + $0x150] sm:$0xff]  }
 0x5a7   :  { %v3434_v58 = vrot.slane %v3424_v14, %v5545_v26  ;;  %v3479_v59 = vmul.f32 %v5748_v21, %v3387_v40  ;;  %v3481_v53 = vmul.f32 %v5750_v30, %v3395_v44  ;;  %v4999_v44 = vld [vmem:[#allocation16 + $0x100] sm:$0xff]   ;;  %v5006_v8 = vld [vmem:[#allocation16 + $0x1d0] sm:$0xff]   ;;  %v5010_v14 = vld [vmem:[#allocation16 + $0x1d8] sm:$0xff]  }
 0x5a8   :  { %v3457_v6 = vcombine.low %v3448_v29, %v3455_v52  ;;  %v3441_v54 = vrot.slane %v3425_v57, %v5545_v26  ;;  %v5007_v10 = vld [vmem:[#allocation16 + $0x110] sm:$0xff]   ;;  %v5014_v29 = vld [vmem:[#allocation16 + $0x1e0] sm:$0xff]  }
 0x5a9   :  { %v5008_v12 = vld [vmem:[#allocation16 + $0x190] sm:$0xff]   ;;  %v5015_v52 = vld [vmem:[#allocation16 + $0x120] sm:$0xff]  }
 0x5aa   :  { %v3471_v16 = vrot.slane %v3457_v6, %v5545_v26  ;;  %v3456_v7 = vcombine.low %v3434_v58, %v3441_v54  ;;  %v5016_v57 = vld [vmem:[#allocation16 + $0x1a0] sm:$0xff]   ;;  %v5018_v58 = vld [vmem:[#allocation16 + $0x1e8] sm:$0xff]   ;;  %v5021_v6 = vld [vmem:[#allocation16 + $0x170] sm:$0xff]  }
 0x5ab   :  { %v5022_v54 = vld [vmem:[#allocation16 + $0x1f0] sm:$0xff]  }
 0x5ac   :  { %v3464_v50 = vrot.slane %v3456_v7, %v5545_v26  ;;  %v5024_v7 = vld [vmem:[#allocation16 + $0x1b0] sm:$0xff]  }
 0x5ae   :  { %v3472_v17 = vcombine.low %v3464_v50, %v3471_v16  ;;  %v5023_v16 = vld [vmem:[#allocation16 + $0x130] sm:$0xff]   ;;  %v5025_v50 = vld [vmem:[#allocation16 + $0x178] sm:$0xff]  }
 0x5b0   :  { %v3474_v38 = vsub.f32 %v3366_v15, %v3472_v17  ;;  %v5026_v15 = vld [vmem:[#allocation16 + $0x1f8] sm:$0xff]  }
 0x5b2   :  { %v3491_v20 = vrot.slane %v3474_v38, %v5540_v41  ;;  %v3499_v21 = vrot.slane %v3474_v38, %v5578_v11  ;;  %v3487_v30 = vrot.slane %v3474_v38, %v5537_v39  ;;  %v3495_v24 = vrot.slane %v3474_v38, %v5572_v9 }
 0x5b3   :  { %v3507_v25 = vrot.slane %v3474_v38, %v5735_v3  ;;  %v3515_v32 = vrot.slane %v3474_v38, %v5738_v5  ;;  %v3503_v26 = vrot.slane %v3474_v38, %v5729_v1  ;;  %v3511_v34 = vrot.slane %v3474_v38, %v5732_v2 }
 0x5b4   :  { %v3525_v36 = vadd.f32 %v3491_v20, %v3476_v13  ;;  %v3527_v37 = vadd.f32 %v3499_v21, %v3478_v35  ;;  %v3524_v31 = vadd.f32 %v3487_v30, %v3475_v46  ;;  %v3526_v55 = vadd.f32 %v3495_v24, %v3477_v49  ;;  %v5009_v13 = vld [vmem:[#allocation16 + $0x158] sm:$0xff]   ;;  %v5013_v49 = vld [vmem:[#allocation16 + $0x160] sm:$0xff]  }
 0x5b5   :  { %v3529_v23 = vadd.f32 %v3507_v25, %v3480_v47  ;;  %v3531_v41 = vadd.f32 %v3515_v32, %v3482_v62  ;;  %v5819_v22 = vadd.f32 %v3503_v26, %v3479_v59  ;;  %v5821_v11 = vadd.f32 %v3511_v34, %v3481_v53  ;;  %v5003_v62 = vld [vmem:[#allocation16 + $0x108] sm:$0xff]   ;;  %v5011_v35 = vld [vmem:[#allocation16 + $0x118] sm:$0xff]  }
 0x5b6   :  { %vm3533_vm8 = vcmp.gt.f32.partialorder %v3525_v36, 0.0  ;;  %v3541_v39 = vmul.f32 0.2, %v3525_v36  ;;  %vm3535_vm9 = vcmp.gt.f32.partialorder %v3527_v37, 0.0  ;;  %v3543_v9 = vmul.f32 0.2, %v3527_v37 }
 0x5b7   :  { %vm3532_vm10 = vcmp.gt.f32.partialorder %v3524_v31, 0.0  ;;  %v3540_v3 = vmul.f32 0.2, %v3524_v31  ;;  %vm3534_vm11 = vcmp.gt.f32.partialorder %v3526_v55, 0.0  ;;  %v3542_v1 = vmul.f32 0.2, %v3526_v55 }
 0x5b8   :  { %v3549_v5 = vsel %vm3533_vm8, %v3525_v36, %v3541_v39  ;;  %v3551_v2 = vsel %vm3535_vm9, %v3527_v37, %v3543_v9  ;;  %vm3537_vm12 = vcmp.gt.f32.partialorder %v3529_v23, 0.0  ;;  %v3545_v18 = vmul.f32 0.2, %v3529_v23  ;;  %v5012_v46 = vld [vmem:[#allocation16 + $0x198] sm:$0xff]   ;;  %v5017_v47 = vld [vmem:[#allocation16 + $0x168] sm:$0xff]  }
 0x5b9   :  { %v3557_v19 = vpack.c.bf16 %v3549_v5, %v3549_v5  ;;  %v3559_v33 = vpack.c.bf16 %v3551_v2, %v3551_v2  ;;  %v3548_v40 = vsel %vm3532_vm10, %v3524_v31, %v3540_v3  ;;  %v3550_v42 = vsel %vm3534_vm11, %v3526_v55, %v3542_v1  ;;  %v5019_v59 = vld [vmem:[#allocation16 + $0x128] sm:$0xff]   ;;  %v5027_v20 = vld [vmem:[#allocation16 + $0x138] sm:$0xff]   ;;  %v4609_v36 = vld [vmem:[%s5871_s17] ss:$0 sm:$0xff] }
 0x5ba   :  { %v3556_v51 = vpack.c.bf16 %v3548_v40, %v3548_v40  ;;  %v3558_v43 = vpack.c.bf16 %v3550_v42, %v3550_v42  ;;  %v3553_v27 = vsel %vm3537_vm12, %v3529_v23, %v3545_v18  ;;  %vm3539_vm13 = vcmp.gt.f32.partialorder %v3531_v41, 0.0  ;;  %v5020_v53 = vld [vmem:[#allocation16 + $0x1a8] sm:$0xff]   ;;  %v5028_v21 = vld [vmem:[#allocation16 + $0x1b8] sm:$0xff]  }
 0x5bb   :  { %4115 = vmatprep.mubr.bf16.mxu0 %v3557_v19  ;;  %4155 = vmatprep.mubr.bf16.mxu1 %v3559_v33  ;;  %v3547_v45 = vmul.f32 0.2, %v3531_v41  ;;  %v3561_v60 = vpack.c.bf16 %v3553_v27, %v3553_v27  ;;  %v3544_v17 = vmul.f32 0.2, %v5819_v22  ;;  %v3546_v38 = vmul.f32 0.2, %v5821_v11 }
 0x5bc   :  { %4116 = vmatmul.mubr.bf16.vlgmr.msra.gmra.mrb[16].mxu0 %v3556_v51  ;;  %4156 = vmatmul.mubr.bf16.vlgmr.msra.gmra.mrb[16].mxu1 %v3558_v43  ;;  %vm3536_vm14 = vcmp.gt.f32.partialorder %v5819_v22, 0.0  ;;  %vm3538_vm15 = vcmp.gt.f32.partialorder %v5821_v11, 0.0 }
 0x5bd   :  { %4728 = vmatpush3.bf16.msra.mxu0 %v4999_v44  ;;  %4750 = vmatpush3.bf16.msra.mxu1 %v5000_v48  ;;  %v3555_v61 = vsel %vm3539_vm13, %v3531_v41, %v3547_v45  ;;  %v3552_v30 = vsel %vm3536_vm14, %v5819_v22, %v3544_v17  ;;  %v3554_v24 = vsel %vm3538_vm15, %v5821_v11, %v3546_v38 }
 0x5be   :  { %4195 = vmatprep.mubr.bf16.mxu0 %v3561_v60  ;;  %v3563_v0 = vpack.c.bf16 %v3555_v61, %v3555_v61  ;;  %4729 = vmatprep.subr.bf16.mxu0 %v5001_v28  ;;  %v3560_v25 = vpack.c.bf16 %v3552_v30, %v3552_v30  ;;  %v3562_v32 = vpack.c.bf16 %v3554_v24, %v3554_v24 }
 0x5bf   :  { %4751 = vmatprep.subr.bf16.mxu1 %v5002_v56 }
 0x5c0   :  { %4235 = vmatprep.mubr.bf16.mxu1 %v3563_v0 }
 0x5c1   :  { %4730 = vmatpush3.bf16.msra.mxu0 %v5003_v62  ;;  %4752 = vmatpush3.bf16.msra.mxu1 %v5004_v63 }
 0x5c2   :  { %4731 = vmatprep.subr.bf16.mxu0 %v5005_v4  ;;  %4753 = vmatprep.subr.bf16.mxu1 %v5006_v8 }
 0x5c5   :  { %4732 = vmatpush3.bf16.msra.mxu0 %v5007_v10  ;;  %4754 = vmatpush3.bf16.msra.mxu1 %v5008_v12 }
 0x5c6   :  { %4733 = vmatprep.subr.bf16.mxu0 %v5009_v13  ;;  %4755 = vmatprep.subr.bf16.mxu1 %v5010_v14 }
 0x5c9   :  { %4734 = vmatpush3.bf16.msra.mxu0 %v5011_v35  ;;  %4756 = vmatpush3.bf16.msra.mxu1 %v5012_v46 }
 0x5ca   :  { %4735 = vmatprep.subr.bf16.mxu0 %v5013_v49  ;;  %4757 = vmatprep.subr.bf16.mxu1 %v5014_v29 }
 0x5cd   :  { %4736 = vmatpush3.bf16.msra.mxu0 %v5015_v52  ;;  %4758 = vmatpush3.bf16.msra.mxu1 %v5016_v57 }
 0x5ce   :  { %4737 = vmatprep.subr.bf16.mxu0 %v5017_v47  ;;  %4759 = vmatprep.subr.bf16.mxu1 %v5018_v58 }
 0x5d1   :  { %4738 = vmatpush3.bf16.msra.mxu0 %v5019_v59  ;;  %4760 = vmatpush3.bf16.msra.mxu1 %v5020_v53 }
 0x5d2   :  { %4739 = vmatprep.subr.bf16.mxu0 %v5021_v6  ;;  %4761 = vmatprep.subr.bf16.mxu1 %v5022_v54 }
 0x5d5   :  { %4740 = vmatpush3.bf16.msra.mxu0 %v5023_v16  ;;  %4762 = vmatpush3.bf16.msra.mxu1 %v5024_v7 }
 0x5d6   :  { %4741 = vmatprep.subr.bf16.mxu0 %v5025_v50  ;;  %4763 = vmatprep.subr.bf16.mxu1 %v5026_v15 }
 0x5d9   :  { %4742 = vmatpush3.bf16.msra.mxu0 %v5027_v20  ;;  %4764 = vmatpush3.bf16.msra.mxu1 %v5028_v21 }
 0x5dc   :  { %4196 = vmatmul.mubr.bf16.vlgmr.msra.gmra.mrb[20].mxu0 %v3560_v25  ;;  %4236 = vmatmul.mubr.bf16.vlgmr.msra.gmra.mrb[20].mxu1 %v3562_v32 }
 0x68f   :  { %v4699_v26 = vpop.f32.mrb[16].mxu0  ;;  %v4721_v34 = vpop.f32.mrb[16].mxu1 }
 0x690   :  { %v4700_v37 = vpop.f32.mrb[17].mxu0  ;;  %v4722_v31 = vpop.f32.mrb[17].mxu1 }
 0x691   :  { %v4701_v55 = vadd.f32 %v4700_v37, %v4699_v26  ;;  %v4723_v23 = vadd.f32 %v4722_v31, %v4721_v34  ;;  %v4702_v41 = vpop.f32.mrb[18].mxu0  ;;  %v4724_v22 = vpop.f32.mrb[18].mxu1 }
 0x692   :  { %v4703_v39 = vpop.f32.mrb[19].mxu0  ;;  %v4725_v11 = vpop.f32.mrb[19].mxu1 }
 0x693   :  { %v4118_v9 = vadd.f32 %v4701_v55, %v4609_v36 }
 0x695   :  { %v4158_v3 = vadd.f32 %v4723_v23, %v4118_v9 }
 0x6af   :  { %v4743_v1 = vpop.f32.mrb[20].mxu0  ;;  %v4765_v5 = vpop.f32.mrb[20].mxu1 }
 0x6b0   :  { %v4744_v2 = vpop.f32.mrb[21].mxu0  ;;  %v4766_v18 = vpop.f32.mrb[21].mxu1 }
 0x6b1   :  { %v4745_v19 = vadd.f32 %v4744_v2, %v4743_v1  ;;  %v4767_v33 = vadd.f32 %v4766_v18, %v4765_v5  ;;  %v4746_v40 = vpop.f32.mrb[22].mxu0  ;;  %v4768_v42 = vpop.f32.mrb[22].mxu1 }
 0x6b2   :  { %v4747_v44 = vpop.f32.mrb[23].mxu0  ;;  %v4769_v48 = vpop.f32.mrb[23].mxu1 }
 0x6b3   :  { %v4198_v51 = vadd.f32 %v4745_v19, %v4158_v3 }
 0x6b5   :  { %v4238_v43 = vadd.f32 %v4767_v33, %v4198_v51 }
 0x6b7   :  { %5057 = vtanh.f32 %v4238_v43 }
 0x6c1   :  { %v5058_v27 = vpop.eup %5057 }
 0x6c2   :  { %4244 = vst [vmem:[#allocation17] sm:$0xff] %v5058_v27 }
 0x6c3   :  { %5268 = shalt.err (!%p5265_p6)
}
 0x6c4   :  { %s5872_s25 = sld [smem:[#allocation27_spill]] }
 0x6ca   :  { %s5269_s3 = scalar_lea.hbm %s5872_s25, 128 }
 0x6cb   :  { %p5270_p7 = scmp.ne.s32.totalorder %s5872_s25, %s5269_s3  ;;  %p5273_p8 = scmp.lt.u32.totalorder %s5269_s3, %s5872_s25 }
 0x6cd   :  { %p5275_p9 = pnand %p5273_p8, %p5270_p7 }
 0x6cf   :  { %5278 = shalt.err (!%p5275_p9)
}
 0x6d0   :  { %4254 = dma.vmem_to_hbm [thread:$0]  %s4252_s0, 128, %s5872_s25, [#allocation4]  }
 0x6d1   :  { %5289 = dma.done.wait [#allocation4], 128  }
 0x6d2   :  { %5290 = vsyncadd [#allocation4], 4294967168 }
 0x6d3   :  { %4258 = vsyncpa [#allocation3], 1 }
 0x6d4   :  { %4259 = vsyncpa [#allocation6], 1 }
 0x6d5   :  { %4260 = vsyncpa [#allocation9], 1 }
 0x6d6   :  { %4261 = vsyncpa [#allocation12], 1 }
 0x6d7   :  { %4262 = vsyncpa [#allocation15], 1 }
 0x6d8   :  { %4263 = vsyncpa [#allocation4], 1 }

</bundles_post_ra>
